<compile_context>
chip_gen: v6e
topology: v6e:2x2x1
jax: 0.10.0
libtpu: 0.0.40
codegen_flags: <defaults>
</compile_context>

<pallas_src>
import functools

import jax
import jax.numpy as jnp
import numpy as np
from jax import lax
from jax.experimental import pallas as pl
from jax.experimental.pallas import tpu as pltpu


# --------------------------------------------------------------------------
# Fused kernel factory
# --------------------------------------------------------------------------
def _make_fused_kernel(*, h, w, c1, c2, c3, stride, th, wo,
                       identity_sc, split_taps, nhwc_out):
    p_rows = (th - 1) * stride + 3     # padded-cv1 rows needed per output tile
    x_rows = (th - 1) * stride + 1     # x rows needed by the strided 1x1 shortcut

    def kernel(x_ref, w1_ref, b1_ref, w2_ref, b2_ref, w3_ref, b3_ref,
               o_ref, y1p_ref):
        t = pl.program_id(1)           # output-row tile index

        # ---- cv1 (1x1 conv + BN + SiLU) over the whole image, once per batch
        #      element, written zero-padded (bf16) into VMEM scratch for the
        #      3x3.  Interior rows are stored directly; only the two border
        #      rows are written as zeros (no full-size row concats).
        @pl.when(t == 0)
        def _():
            x2d = x_ref[0].reshape(h * w, c1)                        # bf16
            y1 = jnp.dot(x2d, w1_ref[...],
                         preferred_element_type=jnp.float32) + b1_ref[...]
            y1 = y1 * jax.nn.sigmoid(y1)                             # SiLU (f32)
            y1 = y1.reshape(h, w, c2).astype(y1p_ref.dtype)          # -> bf16
            zc = jnp.zeros((h, 1, c2), y1p_ref.dtype)
            y1p_ref[pl.ds(1, h), :, :] = jnp.concatenate([zc, y1, zc], axis=1)
            zr = jnp.zeros((1, w + 2, c2), y1p_ref.dtype)
            y1p_ref[pl.ds(0, 1), :, :] = zr
            y1p_ref[pl.ds(h + 1, 1), :, :] = zr

        # ---- cv2 (3x3, stride s, pad 1 + BN + SiLU) on this row tile.
        base = pl.multiple_of(t * (th * stride), th * stride)
        ytile = y1p_ref[pl.ds(base, p_rows), :, :]       # (p_rows, w+2, c2) bf16
        taps = []
        for kh in range(3):
            for kw in range(3):
                patch = lax.slice(
                    ytile, (kh, kw, 0),
                    (kh + (th - 1) * stride + 1,
                     kw + (wo - 1) * stride + 1, c2),
                    (stride, stride, 1))                 # (th, wo, c2) bf16
                taps.append(patch.reshape(th * wo, c2))

        if split_taps:
            # Nine accumulating K=c2 matmuls: skips the big lane-dim concat
            # (better when c2 is large on the 256-wide MXUs).
            acc = jnp.dot(taps[0], w2_ref[0], preferred_element_type=jnp.float32)
            for idx in range(1, 9):
                acc = acc + jnp.dot(taps[idx], w2_ref[idx],
                                    preferred_element_type=jnp.float32)
            y2 = acc + b2_ref[...]
        else:
            # Single K = 9*c2 MXU matmul via in-VMEM im2col (bf16, no cast).
            im2col = jnp.concatenate(taps, axis=-1)      # (th*wo, 9*c2) bf16
            y2 = jnp.dot(im2col, w2_ref[...],
                         preferred_element_type=jnp.float32) + b2_ref[...]
        y2 = y2 * jax.nn.sigmoid(y2)                     # SiLU (f32)
        y2_bf = y2.astype(jnp.bfloat16)

        # ---- cv3 (+ shortcut) + residual + ReLU
        if identity_sc:                       # s == 1 and c1 == c3
            r0 = pl.multiple_of(t * th, th)
            sc = x_ref[0, pl.ds(r0, th), :, :].reshape(th * wo, c3)
            y3 = jnp.dot(y2_bf, w3_ref[...],
                         preferred_element_type=jnp.float32) + b3_ref[...]
            y = jnp.maximum(y3 + sc.astype(jnp.float32), 0.0)
        else:
            # cv3 and the 1x1 shortcut conv fused into ONE matmul over
            # K = c2 + c1 (weights stacked / biases pre-added wrapper-side).
            r0 = pl.multiple_of(t * (th * stride), th * stride)
            xs = x_ref[0, pl.ds(r0, x_rows), :, :]                    # bf16
            xs = lax.slice(xs, (0, 0, 0),
                           (x_rows, (wo - 1) * stride + 1, c1),
                           (stride, stride, 1)).reshape(th * wo, c1)
            km = jnp.concatenate([y2_bf, xs], axis=-1)                # (th*wo, c2+c1)
            y = jnp.maximum(
                jnp.dot(km, w3_ref[...],
                        preferred_element_type=jnp.float32) + b3_ref[...], 0.0)

        # ---- store (bf16)
        if nhwc_out:
            # c3 % 128 == 0: plain NHWC block store is already lane-dense.
            o_ref[0] = y.reshape(th, wo, c3).astype(o_ref.dtype)
        else:
            # Small c3: pack rows lane-dense (last dim = wo*c3) so the store is
            # unmasked full-lane vst instead of c3-lane masked stores.
            y3d = y.reshape(th, wo, c3)
            o_ref[0] = jnp.concatenate([y3d[:, j, :] for j in range(wo)],
                                       axis=-1).astype(o_ref.dtype)

    return kernel


# --------------------------------------------------------------------------
# VMEM budgeting / tile selection
# --------------------------------------------------------------------------
def _vmem_limit_bytes():
    """Per-generation scoped VMEM budget (~96 MiB on v5e/v6e, ~48 MiB on v7x)."""
    try:
        cap = int(pltpu.get_tpu_info().vmem_capacity_bytes)
    except Exception:
        cap = 64 * 1024 * 1024
    return max(32 * 1024 * 1024, min(cap * 3 // 4, 96 * 1024 * 1024))


def _estimate_vmem_bytes(th, *, h, w, c1, c2, c3, wo, stride, out_bytes,
                         split_taps):
    bf = 2
    m = th * wo
    x_img = 2 * h * w * c1 * bf                       # double-buffered bf16 image
    scratch = (h + 2) * (w + 2) * c2 * bf             # padded cv1 scratch (bf16)
    out_blk = 2 * m * c3 * out_bytes                  # double-buffered out tile
    weights = 2 * (c1 * c2 + 9 * c2 * c2 + (c2 + c1) * c3 + 3 * c3) * 4
    ytile = ((th - 1) * stride + 3) * (w + 2) * c2 * bf
    im2col = 0 if split_taps else m * 9 * c2 * bf
    f32tmp = m * (c2 + max(c2, c3)) * 4
    return x_img + scratch + out_blk + weights + ytile + im2col + f32tmp


def _pick_row_tile(ho, *, budget, **est_kw):
    """Largest output-row tile (multiple of 8, dividing ho) whose VMEM estimate
    fits the budget; explicit single full-extent-tile fallback otherwise."""
    cands = [t for t in (128, 64, 32, 16, 8) if ho % t == 0]
    if not cands:
        # ho not a multiple of 8: one full-height tile (valid BlockSpec; no row
        # pipelining).
        cands = [ho]
    for th in cands:                       # descending -> biggest that fits
        if _estimate_vmem_bytes(th, **est_kw) <= budget:
            return th
    return cands[-1]


# --------------------------------------------------------------------------
# Wrapper
# --------------------------------------------------------------------------
def resnet_block_forward(x_nchw, params, *, stride, out_dtype=jnp.bfloat16,
                         split_taps=None):
    (w1, b1), (w2, b2), (w3, b3), shortcut = params
    x = jnp.transpose(x_nchw, (0, 2, 3, 1))              # NCHW -> NHWC
    n, h, w, c1 = x.shape
    c2 = w1.shape[-1]
    c3 = w3.shape[-1]
    ho = (h + 2 - 3) // stride + 1
    wo = (w + 2 - 3) // stride + 1
    identity_sc = shortcut is None
    if split_taps is None:
        split_taps = c2 >= 256            # big c2: skip the 9-tap lane concat
    nhwc_out = (c3 % 128 == 0)            # plain NHWC store already lane-dense

    vmem_limit = _vmem_limit_bytes()
    out_bytes = jnp.dtype(out_dtype).itemsize
    th = _pick_row_tile(ho, budget=int(vmem_limit * 0.7),
                        h=h, w=w, c1=c1, c2=c2, c3=c3, wo=wo, stride=stride,
                        out_bytes=out_bytes, split_taps=split_taps)
    n_tiles = ho // th

    # bf16 operands feed the MXU; accumulation and activation/residual math
    # stay in f32 inside the kernel.
    x_bf = x.astype(jnp.bfloat16)
    w1b = w1.reshape(c1, c2).astype(jnp.bfloat16)
    if split_taps:
        w2b = w2.reshape(9, c2, c2).astype(jnp.bfloat16)   # per-tap weights
        w2_spec = pl.BlockSpec((9, c2, c2), lambda b, t: (0, 0, 0))
    else:
        w2b = w2.reshape(9 * c2, c2).astype(jnp.bfloat16)  # (kh,kw,ci) -> K
        w2_spec = pl.BlockSpec((9 * c2, c2), lambda b, t: (0, 0))

    if identity_sc:
        w3b = w3.reshape(c2, c3).astype(jnp.bfloat16)
        b3b = b3
        k3 = c2
    else:
        wsc, bsc = shortcut
        # Fuse cv3 + shortcut 1x1 into one matmul: stack weights along K.
        w3b = jnp.concatenate([w3.reshape(c2, c3), wsc.reshape(c1, c3)],
                              axis=0).astype(jnp.bfloat16)
        b3b = b3 + bsc
        k3 = c2 + c1

    inputs = [x_bf, w1b, b1, w2b, b2, w3b, b3b]
    in_specs = [
        # Full image per batch element; block index independent of the tile
        # axis, so it is DMA'd once per batch element and reused across tiles.
        pl.BlockSpec((1, h, w, c1), lambda b, t: (b, 0, 0, 0)),
        pl.BlockSpec((c1, c2), lambda b, t: (0, 0)),
        pl.BlockSpec((1, c2), lambda b, t: (0, 0)),
        w2_spec,
        pl.BlockSpec((1, c2), lambda b, t: (0, 0)),
        pl.BlockSpec((k3, c3), lambda b, t: (0, 0)),
        pl.BlockSpec((1, c3), lambda b, t: (0, 0)),
    ]

    if nhwc_out:
        out_shape = jax.ShapeDtypeStruct((n, ho, wo, c3), out_dtype)
        out_spec = pl.BlockSpec((1, th, wo, c3), lambda b, t: (b, t, 0, 0))
    else:
        out_shape = jax.ShapeDtypeStruct((n, ho, wo * c3), out_dtype)
        out_spec = pl.BlockSpec((1, th, wo * c3), lambda b, t: (b, t, 0))

    kernel = _make_fused_kernel(h=h, w=w, c1=c1, c2=c2, c3=c3, stride=stride,
                                th=th, wo=wo, identity_sc=identity_sc,
                                split_taps=split_taps, nhwc_out=nhwc_out)

    out = pl.pallas_call(
        kernel,
        grid=(n, n_tiles),
        in_specs=in_specs,
        out_specs=out_spec,
        out_shape=out_shape,
        scratch_shapes=[pltpu.VMEM((h + 2, w + 2, c2), jnp.bfloat16)],
        compiler_params=pltpu.CompilerParams(
            dimension_semantics=("parallel", "arbitrary"),
            vmem_limit_bytes=int(vmem_limit)),
    )(*inputs)

    if not nhwc_out:
        out = out.reshape(n, ho, wo, c3)
    return jnp.transpose(out, (0, 3, 1, 2))              # NHWC -> NCHW


# --------------------------------------------------------------------------
# Deterministic parameter init: Conv2d weight + BatchNorm (folded, eval mode)
# --------------------------------------------------------------------------
def init_conv_bn(key, k, cin, cout, eps=1e-5):
    k1, k2, k3, k4, k5 = jax.random.split(key, 5)
    w = jax.random.normal(k1, (k, k, cin, cout), jnp.float32) * 0.1     # HWIO
    gamma = 1.0 + 0.1 * jax.random.normal(k2, (cout,), jnp.float32)
    beta = 0.1 * jax.random.normal(k3, (cout,), jnp.float32)
    mean = 0.1 * jax.random.normal(k4, (cout,), jnp.float32)
    var = jnp.abs(jax.random.normal(k5, (cout,), jnp.float32)) + 0.5
    scale = gamma / jnp.sqrt(var + eps)
    w_f = w * scale                                  # fold BN scale into conv
    b_f = (beta - mean * scale).reshape(1, cout)     # folded bias
    return w_f, b_f


# --------------------------------------------------------------------------
# Pure-JAX f32 reference for verification
# --------------------------------------------------------------------------
def _ref_conv_bn(x, w, b, stride, pad, act):
    y = lax.conv_general_dilated(x, w, (stride, stride),
                                 [(pad, pad), (pad, pad)],
                                 dimension_numbers=('NHWC', 'HWIO', 'NHWC'))
    y = y + b.reshape(1, 1, 1, -1)
    if act:
        y = y * jax.nn.sigmoid(y)
    return y


def resnet_block_ref(x_nchw, params, stride):
    (w1, b1), (w2, b2), (w3, b3), shortcut = params
    x = jnp.transpose(x_nchw, (0, 2, 3, 1)).astype(jnp.float32)
    y = _ref_conv_bn(x, w1, b1, 1, 0, True)
    y = _ref_conv_bn(y, w2, b2, stride, 1, True)
    y = _ref_conv_bn(y, w3, b3, 1, 0, False)
    sc = x if shortcut is None else _ref_conv_bn(x, shortcut[0], shortcut[1],
                                                 stride, 0, False)
    out = jnp.maximum(y + sc, 0.0)
    return jnp.transpose(out, (0, 3, 1, 2))


# --------------------------------------------------------------------------
if __name__ == "__main__":
    key = jax.random.PRNGKey(0)
    n, h, w = 2, 16, 16
    configs = [
        # (c1, c2, e, s, split_taps): covers conv-shortcut (fused cv3+shortcut
        # matmul), identity-shortcut, lane-dense store, NHWC-direct store
        # (c3 % 128 == 0), and the 9-accumulating-matmul cv2 path.
        dict(c1=4,  c2=8,  e=4, s=1, split_taps=None),
        dict(c1=32, c2=8,  e=4, s=1, split_taps=None),
        dict(c1=4,  c2=32, e=4, s=1, split_taps=True),
    ]

    for cfg in configs:
        c1, c2, e, s = cfg["c1"], cfg["c2"], cfg["e"], cfg["s"]
        c3 = e * c2
        key, k_x, k1, k2, k3, k4 = jax.random.split(key, 6)
        x = jax.random.normal(k_x, (n, c1, h, w), jnp.float32)

        p1 = init_conv_bn(k1, 1, c1, c2)                          # cv1
        p2 = init_conv_bn(k2, 3, c2, c2)                          # cv2
        p3 = init_conv_bn(k3, 1, c2, c3)                          # cv3
        shortcut = None if (s == 1 and c1 == c3) else init_conv_bn(k4, 1, c1, c3)
        params = (p1, p2, p3, shortcut)

        fwd = jax.jit(functools.partial(resnet_block_forward, stride=s,
                                        split_taps=cfg["split_taps"]))
        out = jax.block_until_ready(fwd(x, params))

        # Kernel runs matmuls with bf16 operands (f32 accumulation) and emits a
        # bf16 result, so compare against the f32 reference with a
        # correspondingly loosened tolerance.
        ref = resnet_block_ref(x, params, s)
        np.testing.assert_allclose(np.asarray(out.astype(jnp.float32)),
                                   np.asarray(ref), rtol=3e-2, atol=3e-2)
        assert out.shape == (n, c3, h // s, w // s)

    print("KERNEL_OK")
</pallas_src>

<mosaic_0001>
module attributes {stable_mosaic.version = 11 : i64} {
  func.func @kernel(%arg0: i32, %arg1: i32, %arg2: memref<1x16x16x4xbf16, #tpu.memory_space<vmem>>, %arg3: memref<4x8xbf16, #tpu.memory_space<vmem>>, %arg4: memref<1x8xf32, #tpu.memory_space<vmem>>, %arg5: memref<72x8xbf16, #tpu.memory_space<vmem>>, %arg6: memref<1x8xf32, #tpu.memory_space<vmem>>, %arg7: memref<12x32xbf16, #tpu.memory_space<vmem>>, %arg8: memref<1x32xf32, #tpu.memory_space<vmem>>, %arg9: memref<1x16x512xbf16, #tpu.memory_space<vmem>>, %arg10: memref<18x18x8xbf16, #tpu.memory_space<vmem>>) attributes {dimension_semantics = [#tpu.dimension_semantics<parallel>, #tpu.dimension_semantics<arbitrary>], iteration_bounds = array<i64: 2, 1>, scalar_prefetch = 0 : i64, scratch_operands = 1 : i64, tpu.core_type = #tpu.core_type<tc>, window_params = [{transform_indices = @transform_0, window_bounds = array<i64: 1, 16, 16, 4>}, {pipeline_mode = #tpu.pipeline_mode<synchronous>, transform_indices = @transform_1, window_bounds = array<i64: 4, 8>}, {pipeline_mode = #tpu.pipeline_mode<synchronous>, transform_indices = @transform_2, window_bounds = array<i64: 1, 8>}, {pipeline_mode = #tpu.pipeline_mode<synchronous>, transform_indices = @transform_3, window_bounds = array<i64: 72, 8>}, {pipeline_mode = #tpu.pipeline_mode<synchronous>, transform_indices = @transform_4, window_bounds = array<i64: 1, 8>}, {pipeline_mode = #tpu.pipeline_mode<synchronous>, transform_indices = @transform_5, window_bounds = array<i64: 12, 32>}, {pipeline_mode = #tpu.pipeline_mode<synchronous>, transform_indices = @transform_6, window_bounds = array<i64: 1, 32>}, {transform_indices = @transform_7, window_bounds = array<i64: 1, 16, 512>}]} {
    %c0_i32 = arith.constant 0 : i32
    %0 = arith.cmpi eq, %arg1, %c0_i32 : i32
    %1 = arith.extui %0 : i1 to i32
    %c0_i32_0 = arith.constant 0 : i32
    %2 = arith.cmpi ne, %1, %c0_i32_0 : i32
    scf.if %2 {
      %c0_20 = arith.constant 0 : index
      %c0_21 = arith.constant 0 : index
      %c0_22 = arith.constant 0 : index
      %c0_23 = arith.constant 0 : index
      %91 = vector.load %arg2[%c0_20, %c0_21, %c0_22, %c0_23] : memref<1x16x16x4xbf16, #tpu.memory_space<vmem>>, vector<1x16x16x4xbf16>
      %92 = vector.shape_cast %91 : vector<1x16x16x4xbf16> to vector<16x16x4xbf16>
      %93 = vector.shape_cast %92 : vector<16x16x4xbf16> to vector<256x4xbf16>
      %c0_24 = arith.constant 0 : index
      %c0_25 = arith.constant 0 : index
      %94 = vector.load %arg3[%c0_24, %c0_25] : memref<4x8xbf16, #tpu.memory_space<vmem>>, vector<4x8xbf16>
      %cst_26 = arith.constant dense<0.000000e+00> : vector<256x8xf32>
      %95 = tpu.matmul %93, %94, %cst_26 {dimension_numbers = #tpu.dot_dimension_numbers<[1], [0], [0], [1], [0, 0, 1, 1], [], []>} : vector<256x4xbf16>, vector<4x8xbf16>, vector<256x8xf32> -> vector<256x8xf32>
      %c0_27 = arith.constant 0 : index
      %c0_28 = arith.constant 0 : index
      %96 = vector.load %arg4[%c0_27, %c0_28] : memref<1x8xf32, #tpu.memory_space<vmem>>, vector<1x8xf32>
      %97 = vector.broadcast %96 : vector<1x8xf32> to vector<256x8xf32>
      %98 = arith.addf %95, %97 : vector<256x8xf32>
      %99 = arith.negf %98 : vector<256x8xf32>
      %100 = math.exp %99 : vector<256x8xf32>
      %cst_29 = arith.constant 1.000000e+00 : f32
      %101 = vector.broadcast %cst_29 : f32 to vector<256x8xf32>
      %102 = arith.addf %101, %100 : vector<256x8xf32>
      %103 = arith.divf %101, %102 : vector<256x8xf32>
      %104 = arith.mulf %98, %103 : vector<256x8xf32>
      %105 = vector.shape_cast %104 : vector<256x8xf32> to vector<16x16x8xf32>
      %106 = arith.truncf %105 : vector<16x16x8xf32> to vector<16x16x8xbf16>
      %cst_30 = arith.constant 0.000000e+00 : bf16
      %107 = vector.broadcast %cst_30 : bf16 to vector<16x1x8xbf16>
      %108 = tpu.concatenate %107, %106, %107 in 1 : vector<16x1x8xbf16>, vector<16x16x8xbf16>, vector<16x1x8xbf16> -> vector<16x18x8xbf16>
      %c1 = arith.constant 1 : index
      %c0_31 = arith.constant 0 : index
      %c0_32 = arith.constant 0 : index
      %109 = vector.load %arg10[%c1, %c0_31, %c0_32] : memref<18x18x8xbf16, #tpu.memory_space<vmem>>, vector<16x18x8xbf16>
      tpu.vector_store %arg10[%c1, %c0_31, %c0_32], %108 {strides = array<i32>} : memref<18x18x8xbf16, #tpu.memory_space<vmem>>, vector<16x18x8xbf16>,
      %cst_33 = arith.constant 0.000000e+00 : bf16
      %110 = vector.broadcast %cst_33 : bf16 to vector<1x18x8xbf16>
      %c0_34 = arith.constant 0 : index
      %c0_35 = arith.constant 0 : index
      %c0_36 = arith.constant 0 : index
      %111 = vector.load %arg10[%c0_34, %c0_35, %c0_36] : memref<18x18x8xbf16, #tpu.memory_space<vmem>>, vector<1x18x8xbf16>
      tpu.vector_store %arg10[%c0_34, %c0_35, %c0_36], %110 {strides = array<i32>} : memref<18x18x8xbf16, #tpu.memory_space<vmem>>, vector<1x18x8xbf16>,
      %c17 = arith.constant 17 : index
      %c0_37 = arith.constant 0 : index
      %c0_38 = arith.constant 0 : index
      %112 = vector.load %arg10[%c17, %c0_37, %c0_38] : memref<18x18x8xbf16, #tpu.memory_space<vmem>>, vector<1x18x8xbf16>
      tpu.vector_store %arg10[%c17, %c0_37, %c0_38], %110 {strides = array<i32>} : memref<18x18x8xbf16, #tpu.memory_space<vmem>>, vector<1x18x8xbf16>,
    } else {
    }
    %c16_i32 = arith.constant 16 : i32
    %3 = arith.muli %arg1, %c16_i32 : i32
    %4 = tpu.assume_multiple %3, 16 : i32
    %5 = arith.index_cast %4 : i32 to index
    %c0 = arith.constant 0 : index
    %c0_1 = arith.constant 0 : index
    %6 = vector.load %arg10[%5, %c0, %c0_1] : memref<18x18x8xbf16, #tpu.memory_space<vmem>>, vector<18x18x8xbf16>
    %7 = vector.extract_strided_slice %6 {offsets = [0, 0, 0], sizes = [16, 16, 8], strides = [1, 1, 1]} : vector<18x18x8xbf16> to vector<16x16x8xbf16>
    %8 = vector.shape_cast %7 : vector<16x16x8xbf16> to vector<256x8xbf16>
    %9 = vector.extract_strided_slice %6 {offsets = [0, 1, 0], sizes = [16, 16, 8], strides = [1, 1, 1]} : vector<18x18x8xbf16> to vector<16x16x8xbf16>
    %10 = vector.shape_cast %9 : vector<16x16x8xbf16> to vector<256x8xbf16>
    %11 = vector.extract_strided_slice %6 {offsets = [0, 2, 0], sizes = [16, 16, 8], strides = [1, 1, 1]} : vector<18x18x8xbf16> to vector<16x16x8xbf16>
    %12 = vector.shape_cast %11 : vector<16x16x8xbf16> to vector<256x8xbf16>
    %13 = vector.extract_strided_slice %6 {offsets = [1, 0, 0], sizes = [16, 16, 8], strides = [1, 1, 1]} : vector<18x18x8xbf16> to vector<16x16x8xbf16>
    %14 = vector.shape_cast %13 : vector<16x16x8xbf16> to vector<256x8xbf16>
    %15 = vector.extract_strided_slice %6 {offsets = [1, 1, 0], sizes = [16, 16, 8], strides = [1, 1, 1]} : vector<18x18x8xbf16> to vector<16x16x8xbf16>
    %16 = vector.shape_cast %15 : vector<16x16x8xbf16> to vector<256x8xbf16>
    %17 = vector.extract_strided_slice %6 {offsets = [1, 2, 0], sizes = [16, 16, 8], strides = [1, 1, 1]} : vector<18x18x8xbf16> to vector<16x16x8xbf16>
    %18 = vector.shape_cast %17 : vector<16x16x8xbf16> to vector<256x8xbf16>
    %19 = vector.extract_strided_slice %6 {offsets = [2, 0, 0], sizes = [16, 16, 8], strides = [1, 1, 1]} : vector<18x18x8xbf16> to vector<16x16x8xbf16>
    %20 = vector.shape_cast %19 : vector<16x16x8xbf16> to vector<256x8xbf16>
    %21 = vector.extract_strided_slice %6 {offsets = [2, 1, 0], sizes = [16, 16, 8], strides = [1, 1, 1]} : vector<18x18x8xbf16> to vector<16x16x8xbf16>
    %22 = vector.shape_cast %21 : vector<16x16x8xbf16> to vector<256x8xbf16>
    %23 = vector.extract_strided_slice %6 {offsets = [2, 2, 0], sizes = [16, 16, 8], strides = [1, 1, 1]} : vector<18x18x8xbf16> to vector<16x16x8xbf16>
    %24 = vector.shape_cast %23 : vector<16x16x8xbf16> to vector<256x8xbf16>
    %25 = tpu.concatenate %8, %10, %12, %14, %16, %18, %20, %22, %24 in 1 : vector<256x8xbf16>, vector<256x8xbf16>, vector<256x8xbf16>, vector<256x8xbf16>, vector<256x8xbf16>, vector<256x8xbf16>, vector<256x8xbf16>, vector<256x8xbf16>, vector<256x8xbf16> -> vector<256x72xbf16>
    %c0_2 = arith.constant 0 : index
    %c0_3 = arith.constant 0 : index
    %26 = vector.load %arg5[%c0_2, %c0_3] : memref<72x8xbf16, #tpu.memory_space<vmem>>, vector<72x8xbf16>
    %cst = arith.constant dense<0.000000e+00> : vector<256x8xf32>
    %27 = tpu.matmul %25, %26, %cst {dimension_numbers = #tpu.dot_dimension_numbers<[1], [0], [0], [1], [0, 0, 1, 1], [], []>} : vector<256x72xbf16>, vector<72x8xbf16>, vector<256x8xf32> -> vector<256x8xf32>
    %c0_4 = arith.constant 0 : index
    %c0_5 = arith.constant 0 : index
    %28 = vector.load %arg6[%c0_4, %c0_5] : memref<1x8xf32, #tpu.memory_space<vmem>>, vector<1x8xf32>
    %29 = vector.broadcast %28 : vector<1x8xf32> to vector<256x8xf32>
    %30 = arith.addf %27, %29 : vector<256x8xf32>
    %31 = arith.negf %30 : vector<256x8xf32>
    %32 = math.exp %31 : vector<256x8xf32>
    %cst_6 = arith.constant 1.000000e+00 : f32
    %33 = vector.broadcast %cst_6 : f32 to vector<256x8xf32>
    %34 = arith.addf %33, %32 : vector<256x8xf32>
    %35 = arith.divf %33, %34 : vector<256x8xf32>
    %36 = arith.mulf %30, %35 : vector<256x8xf32>
    %37 = arith.truncf %36 : vector<256x8xf32> to vector<256x8xbf16>
    %c16_i32_7 = arith.constant 16 : i32
    %38 = arith.muli %arg1, %c16_i32_7 : i32
    %39 = tpu.assume_multiple %38, 16 : i32
    %c0_8 = arith.constant 0 : index
    %40 = arith.index_cast %39 : i32 to index
    %c0_9 = arith.constant 0 : index
    %c0_10 = arith.constant 0 : index
    %41 = vector.load %arg2[%c0_8, %40, %c0_9, %c0_10] : memref<1x16x16x4xbf16, #tpu.memory_space<vmem>>, vector<1x16x16x4xbf16>
    %42 = vector.shape_cast %41 : vector<1x16x16x4xbf16> to vector<16x16x4xbf16>
    %43 = vector.extract_strided_slice %42 {offsets = [0, 0, 0], sizes = [16, 16, 4], strides = [1, 1, 1]} : vector<16x16x4xbf16> to vector<16x16x4xbf16>
    %44 = vector.shape_cast %43 : vector<16x16x4xbf16> to vector<256x4xbf16>
    %45 = tpu.concatenate %37, %44 in 1 : vector<256x8xbf16>, vector<256x4xbf16> -> vector<256x12xbf16>
    %c0_11 = arith.constant 0 : index
    %c0_12 = arith.constant 0 : index
    %46 = vector.load %arg7[%c0_11, %c0_12] : memref<12x32xbf16, #tpu.memory_space<vmem>>, vector<12x32xbf16>
    %cst_13 = arith.constant dense<0.000000e+00> : vector<256x32xf32>
    %47 = tpu.matmul %45, %46, %cst_13 {dimension_numbers = #tpu.dot_dimension_numbers<[1], [0], [0], [1], [0, 0, 1, 1], [], []>} : vector<256x12xbf16>, vector<12x32xbf16>, vector<256x32xf32> -> vector<256x32xf32>
    %c0_14 = arith.constant 0 : index
    %c0_15 = arith.constant 0 : index
    %48 = vector.load %arg8[%c0_14, %c0_15] : memref<1x32xf32, #tpu.memory_space<vmem>>, vector<1x32xf32>
    %49 = vector.broadcast %48 : vector<1x32xf32> to vector<256x32xf32>
    %50 = arith.addf %47, %49 : vector<256x32xf32>
    %cst_16 = arith.constant 0.000000e+00 : f32
    %51 = vector.broadcast %cst_16 : f32 to vector<256x32xf32>
    %52 = arith.maximumf %50, %51 : vector<256x32xf32>
    %53 = vector.shape_cast %52 : vector<256x32xf32> to vector<16x16x32xf32>
    %54 = vector.extract_strided_slice %53 {offsets = [0, 0, 0], sizes = [16, 1, 32], strides = [1, 1, 1]} : vector<16x16x32xf32> to vector<16x1x32xf32>
    %55 = vector.shape_cast %54 : vector<16x1x32xf32> to vector<16x32xf32>
    %56 = vector.extract_strided_slice %53 {offsets = [0, 1, 0], sizes = [16, 1, 32], strides = [1, 1, 1]} : vector<16x16x32xf32> to vector<16x1x32xf32>
    %57 = vector.shape_cast %56 : vector<16x1x32xf32> to vector<16x32xf32>
    %58 = vector.extract_strided_slice %53 {offsets = [0, 2, 0], sizes = [16, 1, 32], strides = [1, 1, 1]} : vector<16x16x32xf32> to vector<16x1x32xf32>
    %59 = vector.shape_cast %58 : vector<16x1x32xf32> to vector<16x32xf32>
    %60 = vector.extract_strided_slice %53 {offsets = [0, 3, 0], sizes = [16, 1, 32], strides = [1, 1, 1]} : vector<16x16x32xf32> to vector<16x1x32xf32>
    %61 = vector.shape_cast %60 : vector<16x1x32xf32> to vector<16x32xf32>
    %62 = vector.extract_strided_slice %53 {offsets = [0, 4, 0], sizes = [16, 1, 32], strides = [1, 1, 1]} : vector<16x16x32xf32> to vector<16x1x32xf32>
    %63 = vector.shape_cast %62 : vector<16x1x32xf32> to vector<16x32xf32>
    %64 = vector.extract_strided_slice %53 {offsets = [0, 5, 0], sizes = [16, 1, 32], strides = [1, 1, 1]} : vector<16x16x32xf32> to vector<16x1x32xf32>
    %65 = vector.shape_cast %64 : vector<16x1x32xf32> to vector<16x32xf32>
    %66 = vector.extract_strided_slice %53 {offsets = [0, 6, 0], sizes = [16, 1, 32], strides = [1, 1, 1]} : vector<16x16x32xf32> to vector<16x1x32xf32>
    %67 = vector.shape_cast %66 : vector<16x1x32xf32> to vector<16x32xf32>
    %68 = vector.extract_strided_slice %53 {offsets = [0, 7, 0], sizes = [16, 1, 32], strides = [1, 1, 1]} : vector<16x16x32xf32> to vector<16x1x32xf32>
    %69 = vector.shape_cast %68 : vector<16x1x32xf32> to vector<16x32xf32>
    %70 = vector.extract_strided_slice %53 {offsets = [0, 8, 0], sizes = [16, 1, 32], strides = [1, 1, 1]} : vector<16x16x32xf32> to vector<16x1x32xf32>
    %71 = vector.shape_cast %70 : vector<16x1x32xf32> to vector<16x32xf32>
    %72 = vector.extract_strided_slice %53 {offsets = [0, 9, 0], sizes = [16, 1, 32], strides = [1, 1, 1]} : vector<16x16x32xf32> to vector<16x1x32xf32>
    %73 = vector.shape_cast %72 : vector<16x1x32xf32> to vector<16x32xf32>
    %74 = vector.extract_strided_slice %53 {offsets = [0, 10, 0], sizes = [16, 1, 32], strides = [1, 1, 1]} : vector<16x16x32xf32> to vector<16x1x32xf32>
    %75 = vector.shape_cast %74 : vector<16x1x32xf32> to vector<16x32xf32>
    %76 = vector.extract_strided_slice %53 {offsets = [0, 11, 0], sizes = [16, 1, 32], strides = [1, 1, 1]} : vector<16x16x32xf32> to vector<16x1x32xf32>
    %77 = vector.shape_cast %76 : vector<16x1x32xf32> to vector<16x32xf32>
    %78 = vector.extract_strided_slice %53 {offsets = [0, 12, 0], sizes = [16, 1, 32], strides = [1, 1, 1]} : vector<16x16x32xf32> to vector<16x1x32xf32>
    %79 = vector.shape_cast %78 : vector<16x1x32xf32> to vector<16x32xf32>
    %80 = vector.extract_strided_slice %53 {offsets = [0, 13, 0], sizes = [16, 1, 32], strides = [1, 1, 1]} : vector<16x16x32xf32> to vector<16x1x32xf32>
    %81 = vector.shape_cast %80 : vector<16x1x32xf32> to vector<16x32xf32>
    %82 = vector.extract_strided_slice %53 {offsets = [0, 14, 0], sizes = [16, 1, 32], strides = [1, 1, 1]} : vector<16x16x32xf32> to vector<16x1x32xf32>
    %83 = vector.shape_cast %82 : vector<16x1x32xf32> to vector<16x32xf32>
    %84 = vector.extract_strided_slice %53 {offsets = [0, 15, 0], sizes = [16, 1, 32], strides = [1, 1, 1]} : vector<16x16x32xf32> to vector<16x1x32xf32>
    %85 = vector.shape_cast %84 : vector<16x1x32xf32> to vector<16x32xf32>
    %86 = tpu.concatenate %55, %57, %59, %61, %63, %65, %67, %69, %71, %73, %75, %77, %79, %81, %83, %85 in 1 : vector<16x32xf32>, vector<16x32xf32>, vector<16x32xf32>, vector<16x32xf32>, vector<16x32xf32>, vector<16x32xf32>, vector<16x32xf32>, vector<16x32xf32>, vector<16x32xf32>, vector<16x32xf32>, vector<16x32xf32>, vector<16x32xf32>, vector<16x32xf32>, vector<16x32xf32>, vector<16x32xf32>, vector<16x32xf32> -> vector<16x512xf32>
    %87 = arith.truncf %86 : vector<16x512xf32> to vector<16x512xbf16>
    %c0_17 = arith.constant 0 : index
    %c0_18 = arith.constant 0 : index
    %c0_19 = arith.constant 0 : index
    %88 = vector.load %arg9[%c0_17, %c0_18, %c0_19] : memref<1x16x512xbf16, #tpu.memory_space<vmem>>, vector<1x16x512xbf16>
    %89 = vector.shape_cast %88 : vector<1x16x512xbf16> to vector<16x512xbf16>
    %90 = vector.shape_cast %87 : vector<16x512xbf16> to vector<1x16x512xbf16>
    tpu.vector_store %arg9[%c0_17, %c0_18, %c0_19], %90 {strides = array<i32>} : memref<1x16x512xbf16, #tpu.memory_space<vmem>>, vector<1x16x512xbf16>,
    return
  }
  func.func @transform_0(%arg0: i32, %arg1: i32) -> (i32, i32, i32, i32) {
    %c0_i32 = arith.constant 0 : i32
    %c0_i32_0 = arith.constant 0 : i32
    %c0_i32_1 = arith.constant 0 : i32
    %c0_i32_2 = arith.constant 0 : i32
    return %arg0, %c0_i32, %c0_i32_0, %c0_i32_1 : i32, i32, i32, i32
  }
  func.func @transform_1(%arg0: i32, %arg1: i32) -> (i32, i32) {
    %c0_i32 = arith.constant 0 : i32
    %c0_i32_0 = arith.constant 0 : i32
    %c0_i32_1 = arith.constant 0 : i32
    return %c0_i32, %c0_i32_0 : i32, i32
  }
  func.func @transform_2(%arg0: i32, %arg1: i32) -> (i32, i32) {
    %c0_i32 = arith.constant 0 : i32
    %c0_i32_0 = arith.constant 0 : i32
    %c0_i32_1 = arith.constant 0 : i32
    return %c0_i32, %c0_i32_0 : i32, i32
  }
  func.func @transform_3(%arg0: i32, %arg1: i32) -> (i32, i32) {
    %c0_i32 = arith.constant 0 : i32
    %c0_i32_0 = arith.constant 0 : i32
    %c0_i32_1 = arith.constant 0 : i32
    return %c0_i32, %c0_i32_0 : i32, i32
  }
  func.func @transform_4(%arg0: i32, %arg1: i32) -> (i32, i32) {
    %c0_i32 = arith.constant 0 : i32
    %c0_i32_0 = arith.constant 0 : i32
    %c0_i32_1 = arith.constant 0 : i32
    return %c0_i32, %c0_i32_0 : i32, i32
  }
  func.func @transform_5(%arg0: i32, %arg1: i32) -> (i32, i32) {
    %c0_i32 = arith.constant 0 : i32
    %c0_i32_0 = arith.constant 0 : i32
    %c0_i32_1 = arith.constant 0 : i32
    return %c0_i32, %c0_i32_0 : i32, i32
  }
  func.func @transform_6(%arg0: i32, %arg1: i32) -> (i32, i32) {
    %c0_i32 = arith.constant 0 : i32
    %c0_i32_0 = arith.constant 0 : i32
    %c0_i32_1 = arith.constant 0 : i32
    return %c0_i32, %c0_i32_0 : i32, i32
  }
  func.func @transform_7(%arg0: i32, %arg1: i32) -> (i32, i32, i32) {
    %c0_i32 = arith.constant 0 : i32
    %c0_i32_0 = arith.constant 0 : i32
    return %arg0, %arg1, %c0_i32 : i32, i32, i32
  }
}

</mosaic_0001>

<bundles_post_ra>
// kernel: resnet_block_forward.1
= control target key start
LH: loop header
LB: loop body
LE: loop exit
PB: predicated region body
PF: predicated region fallthrough
CT: control target
= control target key end

     0   :  { %s5247_s24 = smov 0   ;;  %s5249_s25 = smov 0   ;;  %s7641_s0 = inlined_call_operand.vmem [shape: bf16[2,16,16,4], index: 0, kind: input, shape index: {}]   ;;  %s7642_s1 = inlined_call_operand.vmem [shape: bf16[4,8], index: 1, kind: input, shape index: {}]   ;;  %s7643_s2 = inlined_call_operand.vmem [shape: f32[1,8], index: 2, kind: input, shape index: {}]   ;;  %s7644_s3 = inlined_call_operand.vmem [shape: bf16[72,8], index: 3, kind: input, shape index: {}]   ;;  %s7645_s4 = inlined_call_operand.vmem [shape: f32[1,8], index: 4, kind: input, shape index: {}]   ;;  %s7646_s5 = inlined_call_operand.vmem [shape: bf16[12,32], index: 5, kind: input, shape index: {}]   ;;  %s7647_s6 = inlined_call_operand.vmem [shape: f32[1,32], index: 6, kind: input, shape index: {}]   ;;  %s7648_s7 = inlined_call_operand.vmem [shape: bf16[2,16,512], index: 7, kind: output, shape index: {}]  }
   0x1   :  { %s5251_s26 = smov 0  }
   0x2 LB: > { %s29_s27 = sadd.s32 1, %s5191_s25  ;;  %p4305_p0 = scmp.ge.s32.totalorder %s5195_s26, 1  ;;  %s5195_s26 = sphi %s5251_s26, %s17_s26   ;;  %s5191_s25 = sphi %s5249_s25, %s7738_s25   ;;  %s5187_s24 = sphi %s5247_s24, %s7737_s24  }
   0x3   : > { %p31_p1 = scmp.ge.s32.totalorder %s29_s27, 2  ;;  %p251_p2 = scmp.lt.s32.totalorder %s5195_s26, 3 }
   0x5   : > { %s7740_s27 = smov (%p31_p1, %s29_s27), 0  ;;  %p252_p3 = pnand %p4305_p0, %p251_p2 }
   0x7   : > { %255 = sbr.rel (%p252_p3) target bundleno = 1244 (0x4dc), region = 48 }
   0xc   : > { %v341_v0 = vld [vmem:[%s7642_s1] sm:$0x3]  ;;  %vm478_vm0 = vcmask 1041408   ;;  %p288_p4 = scmp.lt.s32.totalorder %s5187_s24, 1  ;;  %vm429_vm1 = vcmask 31744   ;;  %vm1239_vm2 = vcmask 60416  }
   0xd   : > { %4762 = vmatprep.subr.msk.bf16.mxu0 %vm478_vm0, %v341_v0  ;;  %4763 = vmatprep.subr.msk.bf16.mxu1 %vm478_vm0, %v341_v0  ;;  %v480_v1 = vsel %vm478_vm0, %v341_v0, 0  ;;  %vm1242_vm3 = vcmask 57344   ;;  %v5197_v18 = vmov 0   ;;  %vm1789_vm4 = vcmask 1042432   ;;  %s5198_s11 = smov 16   ;;  %s5199_s12 = smov 8  }
   0xe   : > { %4651 = vmatpush3.bf16.msra.mxu0 %v480_v1  ;;  %4761 = vmatpush3.bf16.msra.mxu1 %v480_v1  ;;  %s7742_s24 = smov (!%p288_p4, %s5187_s24), 1  ;;  %1289 = vst.msk [vmem:[#allocation2] sm:$0xf] %vm1239_vm2, %v5197_v18  ;;  %1290 = vst.msk [vmem:[#allocation2 + $0x4] sm:$0xf] %vm1239_vm2, %v5197_v18  ;;  %vm1790_vm5 = vcmask 1046532  }
   0xf   : > { %s4589_s30 = sshll.u32 %s7742_s24, 7  ;;  %1291 = vst.msk [vmem:[#allocation2 + $0x8] sm:$0x1] %vm1242_vm3, %v5197_v18  ;;  %1295 = vst.msk [vmem:[#allocation2 + $0xd4] sm:$0x1] %vm1242_vm3, %v5197_v18  ;;  %vm1027_vm10 = vcmask 1040384  }
  0x10   : > { %s5274_s10 = scalar_lea.vmem %s7641_s0, %s4589_s30  ;;  %1293 = vst.msk [vmem:[#allocation2 + $0xcc] sm:$0xf] %vm1239_vm2, %v5197_v18  ;;  %1294 = vst.msk [vmem:[#allocation2 + $0xd0] sm:$0xf] %vm1239_vm2, %v5197_v18  ;;  %vm1354_vm7 = vsmask.f32 3328 }
  0x11   : > { %v4860_v2 = vld [vmem:[%s5274_s10] sm:$0xff]   ;;  %v4862_v4 = vld [vmem:[%s5274_s10 + $0x8] sm:$0xff]   ;;  %v4864_v6 = vld [vmem:[%s5274_s10 + $0x10] sm:$0xff]   ;;  %vm1355_vm8 = vsmask.f32 7440  ;;  %s5200_s15 = smov 48  }
  0x12   : > { %v4861_v3 = vld [vmem:[%s5274_s10 + $0x40] sm:$0xff]   ;;  %4652 = vmatprep.mubr.msk.bf16.mxu0 %vm429_vm1, %v4860_v2  ;;  %v4863_v5 = vld [vmem:[%s5274_s10 + $0x48] sm:$0xff]   ;;  %v4865_v7 = vld [vmem:[%s5274_s10 + $0x50] sm:$0xff]   ;;  %vm1028_vm11 = vsmask.f32 256  ;;  %s5201_s16 = smov 24  }
  0x13   : > { %4668 = vmatprep.mubr.msk.bf16.mxu1 %vm429_vm1, %v4861_v3  ;;  %4653 = vmatmul.mubr.msk.bf16.vlgmr.msra.gmra.mxu0 %vm429_vm1, %v4862_v4  ;;  %v4866_v8 = vld [vmem:[%s5274_s10 + $0x18] sm:$0xff]   ;;  %v4868_v10 = vld [vmem:[%s5274_s10 + $0x20] sm:$0xff]   ;;  %v4869_v12 = vld [vmem:[%s5274_s10 + $0x28] sm:$0xff]   ;;  %s5202_s17 = smov 40   ;;  %s5203_s18 = smov 64   ;;  %vm2746_vm13 = vcmask 1043456  }
  0x14   : > { %4669 = vmatmul.mubr.msk.bf16.vlgmr.msra.gmra.mxu1 %vm429_vm1, %v4863_v5  ;;  %4656 = vmatprep.mubr.msk.bf16.mxu0 %vm429_vm1, %v4864_v6  ;;  %v4867_v9 = vld [vmem:[%s5274_s10 + $0x58] sm:$0xff]   ;;  %v4870_v11 = vld [vmem:[%s5274_s10 + $0x60] sm:$0xff]   ;;  %v4871_v13 = vld [vmem:[%s5274_s10 + $0x68] sm:$0xff]   ;;  %s5204_s19 = smov 32   ;;  %s5205_s20 = smov 56   ;;  %vm2390_vm14 = vcmask 64512  }
  0x15   : > { %4672 = vmatprep.mubr.msk.bf16.mxu1 %vm429_vm1, %v4865_v7  ;;  %v4872_v14 = vld [vmem:[%s5274_s10 + $0x30] sm:$0xff]   ;;  %v4873_v16 = vld [vmem:[%s5274_s10 + $0x38] sm:$0xff]   ;;  %v1300_v19 = vld [vmem:[#allocation2] sm:$0xf]  ;;  %vm2439_vm15 = vcmask 130048   ;;  %vm2472_vm0 = vcmask 195584  }
  0x16   : > { %v4874_v15 = vld [vmem:[%s5274_s10 + $0x70] sm:$0xff]   ;;  %v4875_v17 = vld [vmem:[%s5274_s10 + $0x78] sm:$0xff]   ;;  %v1301_v20 = vld [vmem:[#allocation2 + $0x4] sm:$0xf]  ;;  %v1358_v21 = vshrl.u32 %v1300_v19, 16  ;;  %v1361_v22 = vshll.u32 %v1300_v19, 16 }
  0x17   : > { %v1367_v23 = vshll.u32 %v1301_v20, 16  ;;  %v1371_v24 = vshrl.u32 %v1301_v20, 16  ;;  %v1302_v29 = vld [vmem:[#allocation2 + $0x8] sm:$0x1]  ;;  %v1794_v30 = vrot.slane %v1301_v20, 5  ;;  %v4423_v34 = vrot.slane %v1300_v19, 9  ;;  %vm5314_vm6 = vmor %vm1789_vm4, %vm1790_vm5 }
  0x18   : > { %v1360_v25 = vrot.slane %v1358_v21, 4  ;;  %v1363_v26 = vrot.slane %v1361_v22, 5  ;;  %v1377_v33 = vshll.u32 %v1302_v29, 16  ;;  %v1797_v37 = vrot.slane %v1302_v29, 5  ;;  %vm5320_vm9 = vmor %vm1354_vm7, %vm1355_vm8  ;;  %v5335_v48 = vld [vmem:[%s7643_s2] ss:$0 sm:$0xff] }
  0x19   : > { %v1369_v27 = vrot.slane %v1367_v23, 5  ;;  %v1373_v28 = vrot.slane %v1371_v24, 4  ;;  %v1796_v35 = vrot.slane %v1794_v30, 4  ;;  %v1795_v39 = vsel %vm5314_vm6, %v4423_v34, %v1794_v30  ;;  %vm5447_vm12 = vmand %vm1027_vm10, %vm1028_vm11 }
  0x1a   : > { %v1364_v31 = vor.u32 %v1363_v26, %v1360_v25  ;;  %v1379_v42 = vrot.slane %v1377_v33, 5  ;;  %vm2571_vm4 = vcmask 392192   ;;  %vm2637_vm5 = vcmask 523264  }
  0x1b   : > { %4657 = vmatmul.mubr.msk.bf16.gmra.mxu0 %vm429_vm1, %v4866_v8  ;;  %v1374_v32 = vor.u32 %v1373_v28, %v1369_v27  ;;  %v1798_v43 = vsel %vm5314_vm6, %v1796_v35, %v1797_v37  ;;  %vm2713_vm7 = vcmask 588800   ;;  %vm3360_vm8 = vcmask 97280  }
  0x1c   : > { %4673 = vmatmul.mubr.msk.bf16.gmra.mxu1 %vm429_vm1, %v4867_v9  ;;  %4660 = vmatprep.mubr.msk.bf16.mxu0 %vm429_vm1, %v4868_v10  ;;  %v1365_v38 = vrot.slane %v1364_v31, 4  ;;  %v4473_v45 = vcombine.low %v1795_v39, %v1798_v43  ;;  %vm3610_vm10 = vcmask 1042434   ;;  %vm3613_vm11 = vcmask 1043459  }
  0x1d   : > { %4676 = vmatprep.mubr.msk.bf16.mxu1 %vm429_vm1, %v4870_v11  ;;  %v1375_v41 = vrot.slane %v1374_v32, 4 }
  0x1e   : > { %v1370_v44 = vsel %vm5320_vm9, %v1365_v38, %v1369_v27  ;;  %2148 = vrot.lane.b32.xlu1 %v4473_v45, %s5198_s11 }
  0x1f   : > { %v1380_v46 = vsel %vm5320_vm9, %v1375_v41, %v1379_v42 }
  0x20   : > { %v4457_v47 = vcombine.low %v1370_v44, %v1380_v46 }
  0x22   : > { %2068 = vrot.lane.b32.xlu0 %v4457_v47, %s5199_s12 }
  0x23   : > { %4661 = vmatmul.mubr.msk.bf16.gmra.mxu0 %vm429_vm1, %v4869_v12 }
  0x24   : > { %4677 = vmatmul.mubr.msk.bf16.gmra.mxu1 %vm429_vm1, %v4871_v13  ;;  %4664 = vmatprep.mubr.msk.bf16.mxu0 %vm429_vm1, %v4872_v14 }
  0x25   : > { %4680 = vmatprep.mubr.msk.bf16.mxu1 %vm429_vm1, %v4874_v15 }
  0x2b   : > { %4665 = vmatmul.mubr.msk.bf16.gmra.mxu0 %vm429_vm1, %v4873_v16 }
  0x2c   : > { %4681 = vmatmul.mubr.msk.bf16.gmra.mxu1 %vm429_vm1, %v4875_v17  ;;  %vm2505_vm1 = vcmask 261120  }
  0xd3   : > { %v4654_v49 = vpop.f32.mrf.mxu0 }
  0xd4   : > { %v5338_v50 = vadd.f32 %v4654_v49, %v5335_v48  ;;  %v4670_v51 = vpop.f32.mrf.mxu1 }
  0xd5   : > { %v5341_v52 = vadd.f32 %v4670_v51, %v5335_v48  ;;  %v516_v53 = vpop.f32.mrf.mxu0 }
  0xd6   : > { %v4345_v54 = vmul.f32 -1.442695, %v5338_v50  ;;  %v5345_v55 = vadd.f32 %v5335_v48, %v516_v53  ;;  %v580_v56 = vpop.f32.mrf.mxu1 }
  0xd7   : > { %v4361_v57 = vmul.f32 -1.442695, %v5341_v52  ;;  %v5349_v58 = vadd.f32 %v5335_v48, %v580_v56  ;;  %v4655_v59 = vpop.f32.mrf.mxu0 }
  0xd8   : > { %4915 = vpow2.f32 %v4345_v54  ;;  %v4343_v60 = vmul.f32 -1.442695, %v5345_v55  ;;  %v5353_v61 = vadd.f32 %v4655_v59, %v5335_v48  ;;  %v4671_v62 = vpop.f32.mrf.mxu1 }
  0xd9   : > { %4917 = vpow2.f32 %v4361_v57  ;;  %v4359_v63 = vmul.f32 -1.442695, %v5349_v58  ;;  %v5357_v0 = vadd.f32 %v4671_v62, %v5335_v48  ;;  %v519_v1 = vpop.f32.mrf.mxu0 }
  0xda   : > { %4919 = vpow2.f32 %v4343_v60  ;;  %v4346_v2 = vmul.f32 -1.442695, %v5353_v61  ;;  %v5361_v3 = vadd.f32 %v5335_v48, %v519_v1  ;;  %v583_v4 = vpop.f32.mrf.mxu1 }
  0xdb   : > { %4921 = vpow2.f32 %v4359_v63  ;;  %v4362_v5 = vmul.f32 -1.442695, %v5357_v0  ;;  %v5365_v6 = vadd.f32 %v5335_v48, %v583_v4  ;;  %v4658_v7 = vpop.f32.mrf.mxu0 }
  0xdc   : > { %4923 = vpow2.f32 %v4346_v2  ;;  %v4344_v8 = vmul.f32 -1.442695, %v5361_v3  ;;  %v5369_v9 = vadd.f32 %v4658_v7, %v5335_v48  ;;  %v4674_v10 = vpop.f32.mrf.mxu1 }
  0xdd   : > { %4925 = vpow2.f32 %v4362_v5  ;;  %v4360_v11 = vmul.f32 -1.442695, %v5365_v6  ;;  %v5373_v12 = vadd.f32 %v4674_v10, %v5335_v48  ;;  %v532_v13 = vpop.f32.mrf.mxu0 }
  0xde   : > { %4927 = vpow2.f32 %v4344_v8  ;;  %v4349_v14 = vmul.f32 -1.442695, %v5369_v9  ;;  %v5377_v15 = vadd.f32 %v5335_v48, %v532_v13  ;;  %v596_v16 = vpop.f32.mrf.mxu1 }
  0xdf   : > { %4929 = vpow2.f32 %v4360_v11  ;;  %v4365_v17 = vmul.f32 -1.442695, %v5373_v12  ;;  %v5381_v18 = vadd.f32 %v5335_v48, %v596_v16  ;;  %v4659_v19 = vpop.f32.mrf.mxu0 }
  0xe0   : > { %4931 = vpow2.f32 %v4349_v14  ;;  %v4347_v20 = vmul.f32 -1.442695, %v5377_v15  ;;  %v5385_v21 = vadd.f32 %v4659_v19, %v5335_v48  ;;  %v4675_v22 = vpop.f32.mrf.mxu1 }
  0xe1   : > { %4933 = vpow2.f32 %v4365_v17  ;;  %v4363_v23 = vmul.f32 -1.442695, %v5381_v18  ;;  %v5389_v24 = vadd.f32 %v4675_v22, %v5335_v48  ;;  %v535_v25 = vpop.f32.mrf.mxu0 }
  0xe2   : > { %4935 = vpow2.f32 %v4347_v20  ;;  %v4350_v26 = vmul.f32 -1.442695, %v5385_v21  ;;  %v5393_v27 = vadd.f32 %v5335_v48, %v535_v25  ;;  %v599_v28 = vpop.f32.mrf.mxu1 }
  0xe3   : > { %4937 = vpow2.f32 %v4363_v23  ;;  %v4366_v29 = vmul.f32 -1.442695, %v5389_v24  ;;  %v5397_v30 = vadd.f32 %v5335_v48, %v599_v28  ;;  %v4662_v37 = vpop.f32.mrf.mxu0 }
  0xe4   : > { %4939 = vpow2.f32 %v4350_v26  ;;  %v4348_v31 = vmul.f32 -1.442695, %v5393_v27  ;;  %v4678_v53 = vpop.f32.mrf.mxu1  ;;  %v5402_v8 = vadd.f32 %v4662_v37, %v5335_v48 }
  0xe5   : > { %v4916_v32 = vpop.eup %4915  ;;  %4941 = vpow2.f32 %v4366_v29  ;;  %v4364_v33 = vmul.f32 -1.442695, %v5397_v30  ;;  %v548_v47 = vpop.f32.mrf.mxu0  ;;  %v5411_v23 = vadd.f32 %v4678_v53, %v5335_v48 }
  0xe6   : > { %v4918_v34 = vpop.eup %4917  ;;  %v741_v35 = vadd.f32 1.0, %v4916_v32  ;;  %4943 = vpow2.f32 %v4348_v31  ;;  %v612_v4 = vpop.f32.mrf.mxu1  ;;  %v5405_v16 = vadd.f32 %v5335_v48, %v548_v47  ;;  %v4353_v29 = vmul.f32 -1.442695, %v5402_v8 }
  0xe7   : > { %v4920_v38 = vpop.eup %4919  ;;  %v757_v39 = vadd.f32 1.0, %v4918_v34  ;;  %4945 = vpow2.f32 %v4364_v33  ;;  %v4663_v63 = vpop.f32.mrf.mxu0  ;;  %v5415_v31 = vadd.f32 %v5335_v48, %v612_v4 }
  0xe8   : > { %v4922_v41 = vpop.eup %4921  ;;  %4947 = vrcp.f32 %v741_v35  ;;  %v739_v42 = vadd.f32 1.0, %v4920_v38  ;;  %v5408_v22 = vadd.f32 %v4663_v63, %v5335_v48  ;;  %v4679_v25 = vpop.f32.mrf.mxu1  ;;  %v4351_v38 = vmul.f32 -1.442695, %v5405_v16 }
  0xe9   : > { %v4924_v43 = vpop.eup %4923  ;;  %4949 = vrcp.f32 %v757_v39  ;;  %v755_v44 = vadd.f32 1.0, %v4922_v41  ;;  %v551_v17 = vpop.f32.mrf.mxu0  ;;  %v5421_v35 = vadd.f32 %v4679_v25, %v5335_v48  ;;  %v4367_v47 = vmul.f32 -1.442695, %v5415_v31 }
  0xea   : > { %v4926_v45 = vpop.eup %4925  ;;  %4951 = vrcp.f32 %v739_v42  ;;  %v742_v46 = vadd.f32 1.0, %v4924_v43  ;;  %v5418_v34 = vadd.f32 %v5335_v48, %v551_v17  ;;  %v4354_v41 = vmul.f32 -1.442695, %v5408_v22  ;;  %v615_v42 = vpop.f32.mrf.mxu1 }
  0xeb   : > { %v4928_v49 = vpop.eup %4927  ;;  %4953 = vrcp.f32 %v755_v44  ;;  %v758_v51 = vadd.f32 1.0, %v4926_v45  ;;  %v4369_v44 = vmul.f32 -1.442695, %v5411_v23 }
  0xec   : > { %v4930_v54 = vpop.eup %4929  ;;  %4955 = vrcp.f32 %v742_v46  ;;  %v740_v56 = vadd.f32 1.0, %v4928_v49  ;;  %v4352_v46 = vmul.f32 -1.442695, %v5418_v34  ;;  %v5429_v49 = vmul.f32 -1.442695, %v5421_v35 }
  0xed   : > { %v4932_v57 = vpop.eup %4931  ;;  %4957 = vrcp.f32 %v758_v51  ;;  %v756_v59 = vadd.f32 1.0, %v4930_v54 }
  0xee   : > { %v4934_v60 = vpop.eup %4933  ;;  %4959 = vrcp.f32 %v740_v56  ;;  %v745_v62 = vadd.f32 1.0, %v4932_v57  ;;  %v5434_v56 = vadd.f32 %v5335_v48, %v615_v42  ;;  %v4666_v57 = vpop.f32.mrf.mxu0 }
  0xef   : > { %v4936_v1 = vpop.eup %4935  ;;  %4961 = vrcp.f32 %v756_v59  ;;  %v761_v2 = vadd.f32 1.0, %v4934_v60  ;;  %v5439_v63 = vadd.f32 %v4666_v57, %v5335_v48 }
  0xf0   : > { %v4938_v5 = vpop.eup %4937  ;;  %4963 = vrcp.f32 %v745_v62  ;;  %v743_v7 = vadd.f32 1.0, %v4936_v1 }
  0xf1   : > { %v4940_v10 = vpop.eup %4939  ;;  %4965 = vrcp.f32 %v761_v2  ;;  %v759_v11 = vadd.f32 1.0, %v4938_v5 }
  0xf2   : > { %v4942_v13 = vpop.eup %4941  ;;  %4967 = vrcp.f32 %v743_v7  ;;  %v746_v14 = vadd.f32 1.0, %v4940_v10 }
  0xf3   : > { %v4944_v19 = vpop.eup %4943  ;;  %v762_v20 = vadd.f32 1.0, %v4942_v13 }
  0xf4   : > { %v4946_v26 = vpop.eup %4945  ;;  %4969 = vrcp.f32 %v746_v14  ;;  %v744_v28 = vadd.f32 1.0, %v4944_v19 }
  0xf5   : > { %v4948_v32 = vpop.eup %4947  ;;  %4971 = vrcp.f32 %v759_v11  ;;  %v760_v33 = vadd.f32 1.0, %v4946_v26 }
  0xf6   : > { %v4950_v37 = vpop.eup %4949  ;;  %4973 = vrcp.f32 %v762_v20  ;;  %v837_v53 = vmul.f32 %v4948_v32, %v5338_v50 }
  0xf7   : > { %v4952_v39 = vpop.eup %4951  ;;  %4975 = vrcp.f32 %v744_v28  ;;  %v853_v60 = vmul.f32 %v4950_v37, %v5341_v52 }
  0xf8   : > { %v4954_v43 = vpop.eup %4953  ;;  %4977 = vrcp.f32 %v760_v33  ;;  %v835_v2 = vmul.f32 %v4952_v39, %v5345_v55 }
  0xf9   : > { %v4956_v45 = vpop.eup %4955  ;;  %4979 = vpow2.f32 %v4353_v29  ;;  %v851_v5 = vmul.f32 %v4954_v43, %v5349_v58 }
  0xfa   : > { %v4958_v51 = vpop.eup %4957  ;;  %v838_v54 = vmul.f32 %v4956_v45, %v5353_v61  ;;  %4981 = vpow2.f32 %v4351_v38 }
  0xfb   : > { %v4960_v59 = vpop.eup %4959  ;;  %v854_v62 = vmul.f32 %v4958_v51, %v5357_v0  ;;  %4983 = vpow2.f32 %v4354_v41 }
  0xfc   : > { %v4962_v1 = vpop.eup %4961  ;;  %v868_v50 = vpack.c.bf16 %v838_v54, %v837_v53  ;;  %v836_v61 = vmul.f32 %v4960_v59, %v5361_v3  ;;  %4985 = vpow2.f32 %v4369_v44 }
  0xfd   : > { %v4964_v4 = vpop.eup %4963  ;;  %v876_v7 = vpack.c.bf16 %v854_v62, %v853_v60  ;;  %v852_v10 = vmul.f32 %v4962_v1, %v5365_v6  ;;  %4987 = vpow2.f32 %v4352_v46 }
  0xfe   : > { %v4966_v52 = vpop.eup %4965  ;;  %v891_v0 = vshrl.u32 %v868_v50, 16  ;;  %v894_v11 = vshll.u32 %v868_v50, 16  ;;  %v867_v13 = vpack.c.bf16 %v836_v61, %v835_v2  ;;  %4989 = vpow2.f32 %v4367_v47 }
  0xff   : > { %v4968_v14 = vpop.eup %4967  ;;  %v947_v3 = vshrl.u32 %v876_v7, 16  ;;  %v950_v17 = vshll.u32 %v876_v7, 16  ;;  %v875_v19 = vpack.c.bf16 %v852_v10, %v851_v5  ;;  %v841_v58 = vmul.f32 %v4964_v4, %v5369_v9 }
 0x100   : > { %v893_v20 = vrot.slane %v891_v0, 7  ;;  %v884_v6 = vshrl.u32 %v867_v13, 16  ;;  %v887_v25 = vshll.u32 %v867_v13, 16  ;;  %v857_v26 = vmul.f32 %v4966_v52, %v5373_v12 }
 0x101   : > { %v4970_v28 = vpop.eup %4969  ;;  %v949_v29 = vrot.slane %v947_v3, 7  ;;  %v940_v32 = vshrl.u32 %v875_v19, 16  ;;  %v943_v33 = vshll.u32 %v875_v19, 16  ;;  %v839_v37 = vmul.f32 %v4968_v14, %v5377_v15 }
 0x102   : > { %v4972_v38 = vpop.eup %4971  ;;  %v896_v39 = vor.u32 %v894_v11, %v893_v20  ;;  %v1047_v41 = vsel %vm5447_vm12, %v893_v20, 0  ;;  %v886_v42 = vrot.slane %v884_v6, 7  ;;  %v842_v43 = vmul.f32 %v4970_v28, %v5385_v21 }
 0x103   : > { %v4974_v9 = vpop.eup %4973  ;;  %v4380_v44 = vcombine.low %v1047_v41, %v1047_v41  ;;  %v952_v45 = vor.u32 %v950_v17, %v949_v29  ;;  %v1055_v12 = vsel %vm5447_vm12, %v949_v29, 0  ;;  %v942_v46 = vrot.slane %v940_v32, 7 }
 0x104   : > { %v4976_v47 = vpop.eup %4975  ;;  %v1031_v51 = vsel %vm5447_vm12, 0, %v896_v39  ;;  %v4404_v15 = vcombine.low %v1055_v12, %v1055_v12  ;;  %v889_v53 = vor.u32 %v887_v25, %v886_v42  ;;  %v1046_v54 = vsel %vm5447_vm12, %v886_v42, 0 }
 0x105   : > { %v4978_v57 = vpop.eup %4977  ;;  %v4378_v59 = vcombine.low %v1031_v51, %v1031_v51  ;;  %v4379_v60 = vcombine.high %v1031_v51, %v1031_v51  ;;  %1246 = vst.msk [vmem:[#allocation2 + $0x20] sm:$0x1] %vm1242_vm3, %v4380_v44  ;;  %v1039_v21 = vsel %vm5447_vm12, 0, %v952_v45  ;;  %v4377_v62 = vcombine.low %v1046_v54, %v1046_v54 }
 0x106   : > { %v4980_v1 = vpop.eup %4979  ;;  %v4402_v2 = vcombine.low %v1039_v21, %v1039_v21  ;;  %v4403_v50 = vcombine.high %v1039_v21, %v1039_v21  ;;  %1270 = vst.msk [vmem:[#allocation2 + $0x80] sm:$0x1] %vm1242_vm3, %v4404_v15  ;;  %v1030_v61 = vsel %vm5447_vm12, 0, %v889_v53  ;;  %v945_v4 = vor.u32 %v943_v33, %v942_v46 }
 0x107   : > { %v4982_v5 = vpop.eup %4981  ;;  %1244 = vst.msk [vmem:[#allocation2 + $0x18] sm:$0xf] %vm1239_vm2, %v4378_v59  ;;  %1245 = vst.msk [vmem:[#allocation2 + $0x1c] sm:$0xf] %vm1239_vm2, %v4379_v60  ;;  %v4375_v7 = vcombine.low %v1030_v61, %v1030_v61  ;;  %v4376_v10 = vcombine.high %v1030_v61, %v1030_v61  ;;  %v1054_v52 = vsel %vm5447_vm12, %v942_v46, 0  ;;  %v870_v0 = vpack.c.bf16 %v842_v43, %v841_v58 }
 0x108   : > { %1243 = vst.msk [vmem:[#allocation2 + $0x14] sm:$0x1] %vm1242_vm3, %v4377_v62  ;;  %v4984_v11 = vpop.eup %4983  ;;  %v1038_v13 = vsel %vm5447_vm12, 0, %v945_v4  ;;  %v4401_v14 = vcombine.low %v1054_v52, %v1054_v52  ;;  %v858_v3 = vmul.f32 %v4974_v9, %v5389_v24  ;;  %v840_v17 = vmul.f32 %v4976_v47, %v5393_v27 }
 0x109   : > { %1268 = vst.msk [vmem:[#allocation2 + $0x78] sm:$0xf] %vm1239_vm2, %v4402_v2  ;;  %1269 = vst.msk [vmem:[#allocation2 + $0x7c] sm:$0xf] %vm1239_vm2, %v4403_v50  ;;  %v5480_v19 = vpop.eup %4985  ;;  %v4399_v58 = vcombine.low %v1038_v13, %v1038_v13  ;;  %v4400_v20 = vcombine.high %v1038_v13, %v1038_v13  ;;  %v855_v6 = vmul.f32 %v4972_v38, %v5381_v18  ;;  %v905_v25 = vshrl.u32 %v870_v0, 16  ;;  %v564_v2 = vpop.f32.mrf.mxu0 }
 0x10a   : > { %1240 = vst.msk [vmem:[#allocation2 + $0xc] sm:$0xf] %vm1239_vm2, %v4375_v7  ;;  %1241 = vst.msk [vmem:[#allocation2 + $0x10] sm:$0xf] %vm1239_vm2, %v4376_v10  ;;  %v4988_v28 = vpop.eup %4987  ;;  %v878_v29 = vpack.c.bf16 %v858_v3, %v857_v26  ;;  %v869_v32 = vpack.c.bf16 %v840_v17, %v839_v37  ;;  %v856_v24 = vmul.f32 %v4978_v57, %v5397_v30  ;;  %v749_v33 = vadd.f32 1.0, %v4980_v1 }
 0x10b   : > { %1267 = vst.msk [vmem:[#allocation2 + $0x74] sm:$0x1] %vm1242_vm3, %v4401_v14  ;;  %v5487_v27 = vpop.eup %4989  ;;  %v907_v39 = vrot.slane %v905_v25, 7  ;;  %v908_v41 = vshll.u32 %v870_v0, 16  ;;  %v747_v42 = vadd.f32 1.0, %v4982_v5  ;;  %v750_v43 = vadd.f32 1.0, %v4984_v11  ;;  %v4667_v25 = vpop.f32.mrf.mxu0 }
 0x10c   : > { %1265 = vst.msk [vmem:[#allocation2 + $0x6c] sm:$0xf] %vm1239_vm2, %v4399_v58  ;;  %1266 = vst.msk [vmem:[#allocation2 + $0x70] sm:$0xf] %vm1239_vm2, %v4400_v20  ;;  %v961_v18 = vshrl.u32 %v878_v29, 16  ;;  %v964_v38 = vshll.u32 %v878_v29, 16  ;;  %v877_v30 = vpack.c.bf16 %v856_v24, %v855_v6  ;;  %4991 = vrcp.f32 %v749_v33 }
 0x10d   : > { %v898_v9 = vshrl.u32 %v869_v32, 16  ;;  %v901_v44 = vshll.u32 %v869_v32, 16  ;;  %v910_v45 = vor.u32 %v908_v41, %v907_v39  ;;  %v1049_v26 = vsel %vm5447_vm12, %v907_v39, 0 }
 0x10e   : > { %v4386_v37 = vcombine.low %v1049_v26, %v1049_v26  ;;  %v963_v12 = vrot.slane %v961_v18, 7  ;;  %4993 = vrcp.f32 %v747_v42  ;;  %v954_v51 = vshrl.u32 %v877_v30, 16  ;;  %v5511_v3 = vld [vmem:[#allocation2 + $0x18] sm:$0xf]  ;;  %v5513_v17 = vld [vmem:[#allocation2 + $0x1c] sm:$0xf] }
 0x10f   : > { %v900_v46 = vrot.slane %v898_v9, 7  ;;  %v1033_v47 = vsel %vm5447_vm12, 0, %v910_v45  ;;  %v957_v15 = vshll.u32 %v877_v30, 16  ;;  %4995 = vrcp.f32 %v750_v43  ;;  %v567_v9 = vpop.f32.mrf.mxu0 }
 0x110   : > { %v4384_v53 = vcombine.low %v1033_v47, %v1033_v47  ;;  %v4385_v54 = vcombine.high %v1033_v47, %v1033_v47  ;;  %1252 = vst.msk [vmem:[#allocation2 + $0x38] sm:$0x1] %vm1242_vm3, %v4386_v37  ;;  %v966_v57 = vor.u32 %v964_v38, %v963_v12  ;;  %v1057_v59 = vsel %vm5447_vm12, %v963_v12, 0  ;;  %v5537_v33 = vld [vmem:[#allocation2 + $0x7c] sm:$0xf] }
 0x111   : > { %v4410_v60 = vcombine.low %v1057_v59, %v1057_v59  ;;  %v903_v21 = vor.u32 %v901_v44, %v900_v46  ;;  %v1048_v62 = vsel %vm5447_vm12, %v900_v46, 0  ;;  %v956_v1 = vrot.slane %v954_v51, 7  ;;  %v5551_v38 = vld [vmem:[#allocation2 + $0x20] sm:$0x1]  ;;  %v5561_v30 = vld [vmem:[#allocation2 + $0xc] sm:$0xf] }
 0x112   : > { %1250 = vst.msk [vmem:[#allocation2 + $0x30] sm:$0xf] %vm1239_vm2, %v4384_v53  ;;  %1251 = vst.msk [vmem:[#allocation2 + $0x34] sm:$0xf] %vm1239_vm2, %v4385_v54  ;;  %v1041_v50 = vsel %vm5447_vm12, 0, %v966_v57  ;;  %v4383_v61 = vcombine.low %v1048_v62, %v1048_v62  ;;  %v748_v4 = vadd.f32 1.0, %v4988_v28  ;;  %v5521_v6 = vadd.f32 %v5335_v48, %v564_v2 }
 0x113   : > { %v4368_v5 = vmul.f32 -1.442695, %v5434_v56  ;;  %v4408_v7 = vcombine.low %v1041_v50, %v1041_v50  ;;  %v4409_v10 = vcombine.high %v1041_v50, %v1041_v50  ;;  %1276 = vst.msk [vmem:[#allocation2 + $0x98] sm:$0x1] %vm1242_vm3, %v4410_v60  ;;  %v1032_v52 = vsel %vm5447_vm12, 0, %v903_v21 }
 0x114   : > { %v959_v0 = vor.u32 %v957_v15, %v956_v1  ;;  %v4381_v11 = vcombine.low %v1032_v52, %v1032_v52  ;;  %v4382_v13 = vcombine.high %v1032_v52, %v1032_v52  ;;  %1249 = vst.msk [vmem:[#allocation2 + $0x2c] sm:$0x1] %vm1242_vm3, %v4383_v61  ;;  %v1056_v14 = vsel %vm5447_vm12, %v956_v1, 0  ;;  %v5563_v37 = vld [vmem:[#allocation2 + $0x10] sm:$0xf] }
 0x115   : > { %4997 = vrcp.f32 %v748_v4  ;;  %1274 = vst.msk [vmem:[#allocation2 + $0x90] sm:$0xf] %vm1239_vm2, %v4408_v7  ;;  %1275 = vst.msk [vmem:[#allocation2 + $0x94] sm:$0xf] %vm1239_vm2, %v4409_v10  ;;  %v4407_v20 = vcombine.low %v1056_v14, %v1056_v14  ;;  %v5526_v32 = vadd.f32 %v4667_v25, %v5335_v48  ;;  %v5531_v24 = vcombine.low %v5511_v3, %v5513_v17  ;;  %v5566_v46 = vld [vmem:[#allocation2 + $0x6c] sm:$0xf] }
 0x116   : > { %v1040_v58 = vsel %vm5447_vm12, 0, %v959_v0  ;;  %4999 = vpow2.f32 %v5429_v49  ;;  %1247 = vst.msk [vmem:[#allocation2 + $0x24] sm:$0xf] %vm1239_vm2, %v4381_v11  ;;  %1248 = vst.msk [vmem:[#allocation2 + $0x28] sm:$0xf] %vm1239_vm2, %v4382_v13  ;;  %v765_v39 = vadd.f32 1.0, %v5480_v19  ;;  %v5577_v53 = vadd.f32 %v5335_v48, %v567_v9 }
 0x117   : > { %v4405_v28 = vcombine.low %v1040_v58, %v1040_v58  ;;  %v4406_v29 = vcombine.high %v1040_v58, %v1040_v58  ;;  %5001 = vpow2.f32 %v4368_v5  ;;  %1273 = vst.msk [vmem:[#allocation2 + $0x8c] sm:$0x1] %vm1242_vm3, %v4407_v20  ;;  %v5535_v49 = vld [vmem:[#allocation2 + $0x78] sm:$0xf]  ;;  %2288 = vrot.lane.b32.xlu0 %v5531_v24, %s5200_s15  ;;  %2185 = vrot.lane.b32.xlu1 %v5531_v24, %s5201_s16  ;;  %v5545_v41 = vmul.f32 -1.442695, %v5439_v63 }
 0x118   : > { %v5548_v42 = vmul.f32 -1.442695, %v5521_v6  ;;  %v763_v18 = vadd.f32 1.0, %v5487_v27  ;;  %v5554_v19 = vmul.f32 -1.442695, %v5526_v32  ;;  %v5559_v26 = vcombine.low %v5535_v49, %v5537_v33 }
 0x119   : > { %1271 = vst.msk [vmem:[#allocation2 + $0x84] sm:$0xf] %vm1239_vm2, %v4405_v28  ;;  %1272 = vst.msk [vmem:[#allocation2 + $0x88] sm:$0xf] %vm1239_vm2, %v4406_v29  ;;  %v4992_v43 = vpop.eup %4991  ;;  %v1808_v12 = vrot.slane %v5513_v17, 5  ;;  %v1864_v51 = vrot.slane %v5537_v33, 5  ;;  %5003 = vrcp.f32 %v765_v39  ;;  %v5591_v1 = vcombine.low %v5561_v30, %v5563_v37 }
 0x11a   : > { %v845_v45 = vmul.f32 %v4992_v43, %v5402_v8  ;;  %v5568_v47 = vld [vmem:[#allocation2 + $0x70] sm:$0xf]  ;;  %5005 = vrcp.f32 %v763_v18  ;;  %v4425_v54 = vrot.slane %v5511_v3, 9  ;;  %v1811_v57 = vrot.slane %v5551_v38, 5  ;;  %v5581_v59 = vld [vmem:[#allocation2 + $0x80] sm:$0x1]  ;;  %v4682_v18 = vpop.f32.mrf.mxu1 }
 0x11b   : > { %v4994_v44 = vpop.eup %4993  ;;  %2304 = vrot.lane.b32.xlu0 %v5559_v26, %s5200_s15  ;;  %2201 = vrot.lane.b32.xlu1 %v5559_v26, %s5201_s16  ;;  %v1810_v8 = vrot.slane %v1808_v12, 4  ;;  %v1406_v21 = vshrl.u32 %v5511_v3, 16  ;;  %v5587_v62 = vcombine.low %v5566_v46, %v5568_v47  ;;  %v1866_v61 = vrot.slane %v1864_v51, 4  ;;  %v5608_v58 = vld [vmem:[#allocation2 + $0x14] sm:$0x1] }
 0x11c   : > { %v4996_v27 = vpop.eup %4995  ;;  %v843_v2 = vmul.f32 %v4994_v44, %v5405_v16  ;;  %v1801_v4 = vrot.slane %v5563_v37, 5  ;;  %v1409_v52 = vshll.u32 %v5511_v3, 16  ;;  %v1867_v0 = vrot.slane %v5581_v59, 5 }
 0x11d   : > { %v846_v15 = vmul.f32 %v4996_v27, %v5408_v22  ;;  %v4433_v22 = vrot.slane %v5535_v49, 9  ;;  %7666 = vst [vmem:[#allocation3_spill] sm:$0xff] %v5587_v62  ;;  %v1812_v50 = vsel %vm5314_vm6, %v1810_v8, %v1811_v57  ;;  %v1809_v13 = vsel %vm5314_vm6, %v4425_v54, %v1808_v12  ;;  %v5620_v57 = vld [vmem:[#allocation2 + $0x74] sm:$0x1] }
 0x11e   : > { %v4424_v20 = vrot.slane %v5561_v30, 9  ;;  %v4475_v39 = vcombine.low %v1809_v13, %v1812_v50  ;;  %v1857_v43 = vrot.slane %v5568_v47, 5  ;;  %v1860_v13 = vrot.slane %v5620_v57, 5 }
 0x11f   : > { %v872_v60 = vpack.c.bf16 %v846_v15, %v845_v45  ;;  %2302 = vrot.lane.b32.xlu1 %v5587_v62, %s5200_s15  ;;  %2183 = vrot.lane.b32.xlu0 %v5591_v1, %s5201_s16  ;;  %v1865_v14 = vsel %vm5314_vm6, %v4433_v22, %v1864_v51  ;;  %v1803_v45 = vrot.slane %v1801_v4, 4  ;;  %v1804_v51 = vrot.slane %v5608_v58, 5 }
 0x120   : > { %v1859_v50 = vrot.slane %v1857_v43, 4 }
 0x121   : > { %v919_v7 = vshrl.u32 %v872_v60, 16  ;;  %v922_v10 = vshll.u32 %v872_v60, 16  ;;  %v1419_v60 = vshrl.u32 %v5513_v17, 16 }
 0x122   : > { %v4998_v5 = vpop.eup %4997 }
 0x123   : > { %v5000_v16 = vpop.eup %4999  ;;  %v844_v11 = vmul.f32 %v4998_v5, %v5418_v34  ;;  %v921_v28 = vrot.slane %v919_v7, 7  ;;  %v1868_v34 = vsel %vm5314_vm6, %v1866_v61, %v1867_v0  ;;  %2255 = vrot.lane.b32.xlu1 %v4475_v39, %s5202_s17  ;;  %2199 = vrot.lane.b32.xlu0 %v5587_v62, %s5201_s16  ;;  %v628_v61 = vpop.f32.mrf.mxu1  ;;  %v1805_v0 = vsel %vm5314_vm6, %v1803_v45, %v1804_v51 }
 0x124   : > { %v5002_v25 = vpop.eup %5001  ;;  %v766_v29 = vadd.f32 1.0, %v5000_v16  ;;  %v1802_v16 = vsel %vm5314_vm6, %v4424_v20, %v1801_v4  ;;  %v1415_v45 = vshll.u32 %v5513_v17, 16 }
 0x125   : > { %v871_v9 = vpack.c.bf16 %v844_v11, %v843_v2  ;;  %v764_v44 = vadd.f32 1.0, %v5002_v25  ;;  %v924_v12 = vor.u32 %v922_v10, %v921_v28  ;;  %v1051_v27 = vsel %vm5447_vm12, %v921_v28, 0 }
 0x126   : > { %5007 = vrcp.f32 %v766_v29  ;;  %v4392_v15 = vcombine.low %v1051_v27, %v1051_v27  ;;  %v5625_v2 = vcombine.low %v1865_v14, %v1868_v34  ;;  %v4432_v11 = vrot.slane %v5566_v46, 9  ;;  %v5004_v25 = vpop.eup %5003  ;;  %v4683_v27 = vpop.f32.mrf.mxu1 }
 0x127   : > { %v912_v8 = vshrl.u32 %v871_v9, 16  ;;  %v915_v54 = vshll.u32 %v871_v9, 16  ;;  %5009 = vrcp.f32 %v764_v44  ;;  %v1035_v22 = vsel %vm5447_vm12, 0, %v924_v12  ;;  %2358 = vrot.lane.b32.xlu0 %v4475_v39, %s5203_s18  ;;  %v5006_v4 = vpop.eup %5005 }
 0x128   : > { %v4390_v5 = vcombine.low %v1035_v22, %v1035_v22  ;;  %v4391_v7 = vcombine.high %v1035_v22, %v1035_v22  ;;  %1258 = vst.msk [vmem:[#allocation2 + $0x50] sm:$0x1] %vm1242_vm3, %v4392_v15  ;;  %2271 = vrot.lane.b32.xlu1 %v5625_v2, %s5202_s17  ;;  %v4356_v14 = vmul.f32 -1.442695, %v5577_v53  ;;  %v1408_v9 = vrot.slane %v1406_v21, 4 }
 0x129   : > { %v914_v10 = vrot.slane %v912_v8, 7  ;;  %v1411_v44 = vrot.slane %v1409_v52, 5  ;;  %v5644_v34 = vcombine.low %v1802_v16, %v1805_v0  ;;  %v1421_v12 = vrot.slane %v1419_v60, 4 }
 0x12a   : > { %1256 = vst.msk [vmem:[#allocation2 + $0x48] sm:$0xf] %vm1239_vm2, %v4390_v5  ;;  %1257 = vst.msk [vmem:[#allocation2 + $0x4c] sm:$0xf] %vm1239_vm2, %v4391_v7  ;;  %v1598_v15 = vshrl.u32 %v5535_v49, 16  ;;  %v1861_v8 = vsel %vm5314_vm6, %v1859_v50, %v1860_v13  ;;  %5011 = vpow2.f32 %v5545_v41  ;;  %v1601_v52 = vshll.u32 %v5535_v49, 16 }
 0x12b   : > { %v917_v28 = vor.u32 %v915_v54, %v914_v10  ;;  %v1050_v29 = vsel %vm5447_vm12, %v914_v10, 0  ;;  %2152 = vrot.lane.b32.xlu0 %v4475_v39, %s5198_s11  ;;  %v5658_v17 = vrot.slane %v1415_v45, 5  ;;  %v1611_v54 = vshrl.u32 %v5537_v33, 16  ;;  %v5670_v39 = vld [vmem:[#allocation2 + $0x30] sm:$0xf] }
 0x12c   : > { %v4389_v20 = vcombine.low %v1050_v29, %v1050_v29  ;;  %2150 = vrot.lane.b32.xlu1 %v5644_v34, %s5198_s11  ;;  %v1858_v22 = vsel %vm5314_vm6, %v4432_v11, %v1857_v43  ;;  %v1412_v60 = vor.u32 %v1411_v44, %v1408_v9  ;;  %v5664_v41 = vadd.f32 %v4682_v18, %v5335_v48  ;;  %v5672_v50 = vld [vmem:[#allocation2 + $0x34] sm:$0xf]  ;;  %v631_v43 = vpop.f32.mrf.mxu1  ;;  %v5695_v11 = vld [vmem:[#allocation2 + $0x90] sm:$0xf] }
 0x12d   : > { %v1034_v51 = vsel %vm5447_vm12, 0, %v917_v28  ;;  %v5668_v49 = vcombine.low %v1858_v22, %v1861_v8  ;;  %v1422_v5 = vor.u32 %v1421_v12, %v5658_v17  ;;  %v1607_v7 = vshll.u32 %v5537_v33, 16 }
 0x12e   : > { %v4387_v3 = vcombine.low %v1034_v51, %v1034_v51  ;;  %v4388_v21 = vcombine.high %v1034_v51, %v1034_v51  ;;  %1255 = vst.msk [vmem:[#allocation2 + $0x44] sm:$0x1] %vm1242_vm3, %v4389_v20  ;;  %5013 = vpow2.f32 %v5548_v42  ;;  %v861_v18 = vmul.f32 %v5004_v25, %v5411_v23 }
 0x12f   : > { %5015 = vpow2.f32 %v5554_v19  ;;  %v5680_v10 = vadd.f32 %v5335_v48, %v628_v61  ;;  %v5683_v0 = vadd.f32 %v4683_v27, %v5335_v48  ;;  %2374 = vrot.lane.b32.xlu0 %v5625_v2, %s5203_s18  ;;  %v1425_v33 = vshll.u32 %v5551_v38, 16  ;;  %v5701_v38 = vld [vmem:[#allocation2 + $0x94] sm:$0xf] }
 0x130   : > { %1253 = vst.msk [vmem:[#allocation2 + $0x3c] sm:$0xf] %vm1239_vm2, %v4387_v3  ;;  %1254 = vst.msk [vmem:[#allocation2 + $0x40] sm:$0xf] %vm1239_vm2, %v4388_v21  ;;  %2166 = vrot.lane.b32.xlu1 %v5668_v49, %s5198_s11  ;;  %v1600_v42 = vrot.slane %v1598_v15, 4  ;;  %v1603_v16 = vrot.slane %v1601_v52, 5  ;;  %5017 = vpow2.f32 %v4356_v14  ;;  %v859_v19 = vmul.f32 %v5006_v4, %v5415_v31 }
 0x131   : > { %v5693_v61 = vcombine.low %v5670_v39, %v5672_v50  ;;  %v1413_v13 = vrot.slane %v1412_v60, 4  ;;  %v5698_v25 = vadd.f32 %v5335_v48, %v631_v43  ;;  %v1423_v9 = vrot.slane %v1422_v5, 4 }
 0x132   : > { %v5703_v14 = vrot.slane %v1607_v7, 5  ;;  %v1613_v44 = vrot.slane %v1611_v54, 4  ;;  %v4373_v4 = vmul.f32 -1.442695, %v5664_v41  ;;  %v4371_v20 = vmul.f32 -1.442695, %v5680_v10 }
 0x133   : > { %v5008_v23 = vpop.eup %5007  ;;  %7667 = vst [vmem:[#allocation4_spill] sm:$0xff] %v5693_v61  ;;  %v5709_v45 = vmul.f32 -1.442695, %v5683_v0  ;;  %2168 = vrot.lane.b32.xlu0 %v5625_v2, %s5198_s11  ;;  %v1604_v12 = vor.u32 %v1603_v16, %v1600_v42  ;;  %v1617_v27 = vshll.u32 %v5581_v59, 16  ;;  %v1418_v15 = vsel %vm5320_vm9, %v1413_v13, %v5658_v17 }
 0x134   : > { %v5010_v28 = vpop.eup %5009  ;;  %v862_v29 = vmul.f32 %v5008_v23, %v5421_v35  ;;  %2189 = vrot.lane.b32.xlu1 %v5693_v61, %s5201_s16  ;;  %v1427_v35 = vrot.slane %v1425_v33, 5  ;;  %v5724_v8 = vmul.f32 -1.442695, %v5698_v25  ;;  %v1614_v52 = vor.u32 %v1613_v44, %v5703_v14 }
 0x135   : > { %v860_v31 = vmul.f32 %v5010_v28, %v5434_v56  ;;  %v5718_v56 = vcombine.low %v5695_v11, %v5701_v38  ;;  %v1574_v22 = vshrl.u32 %v5566_v46, 16  ;;  %v1577_v60 = vshll.u32 %v5566_v46, 16 }
 0x136   : > { %v880_v48 = vpack.c.bf16 %v862_v29, %v861_v18  ;;  %v1428_v21 = vsel %vm5320_vm9, %v1423_v9, %v1427_v35  ;;  %v1587_v17 = vshrl.u32 %v5568_v47, 16  ;;  %v1605_v43 = vrot.slane %v1604_v12, 4 }
 0x137   : > { %v879_v51 = vpack.c.bf16 %v860_v31, %v859_v19  ;;  %7668 = vst [vmem:[#allocation5_spill] sm:$0xff] %v5718_v56  ;;  %v5012_v5 = vpop.eup %5011  ;;  %2253 = vrot.lane.b32.xlu0 %v5644_v34, %s5202_s17  ;;  %v1619_v18 = vrot.slane %v1617_v27, 5  ;;  %v5736_v42 = vcombine.low %v1418_v15, %v1428_v21  ;;  %5019 = vpow2.f32 %v4373_v4 }
 0x138   : > { %v975_v2 = vshrl.u32 %v880_v48, 16  ;;  %v978_v3 = vshll.u32 %v880_v48, 16  ;;  %2205 = vrot.lane.b32.xlu1 %v5718_v56, %s5201_s16  ;;  %v753_v16 = vadd.f32 1.0, %v5012_v5  ;;  %v1615_v19 = vrot.slane %v1614_v52, 4 }
 0x139   : > { %v968_v59 = vshrl.u32 %v879_v51, 16  ;;  %v971_v54 = vshll.u32 %v879_v51, 16  ;;  %5021 = vpow2.f32 %v4371_v20  ;;  %v1583_v20 = vshll.u32 %v5568_v47, 16 }
 0x13a   : > { %v977_v7 = vrot.slane %v975_v2, 7  ;;  %5023 = vrcp.f32 %v753_v16  ;;  %v1610_v47 = vsel %vm5320_vm9, %v1605_v43, %v5703_v14  ;;  %v1620_v21 = vsel %vm5320_vm9, %v1615_v19, %v1619_v18 }
 0x13b   : > { %v970_v33 = vrot.slane %v968_v59, 7  ;;  %v5014_v13 = vpop.eup %5013  ;;  %2372 = vrot.lane.b32.xlu0 %v5668_v49, %s5203_s18  ;;  %v1576_v52 = vrot.slane %v1574_v22, 4  ;;  %v1579_v59 = vrot.slane %v1577_v60, 5  ;;  %v1589_v5 = vrot.slane %v1587_v17, 4 }
 0x13c   : > { %v980_v23 = vor.u32 %v978_v3, %v977_v7  ;;  %v1059_v46 = vsel %vm5447_vm12, %v977_v7, 0  ;;  %v5016_v9 = vpop.eup %5015  ;;  %2220 = vrot.lane.b32.xlu1 %v5736_v42, %s5204_s19  ;;  %v751_v4 = vadd.f32 1.0, %v5014_v13  ;;  %v4467_v14 = vcombine.low %v1610_v47, %v1620_v21 }
 0x13d   : > { %v4416_v28 = vcombine.low %v1059_v46, %v1059_v46  ;;  %v973_v29 = vor.u32 %v971_v54, %v970_v33  ;;  %v1058_v34 = vsel %vm5447_vm12, %v970_v33, 0  ;;  %v5018_v48 = vpop.eup %5017  ;;  %v754_v51 = vadd.f32 1.0, %v5016_v9  ;;  %v5774_v33 = vld [vmem:[#allocation2 + $0x24] sm:$0xf] }
 0x13e   : > { %v1043_v44 = vsel %vm5447_vm12, 0, %v980_v23  ;;  %v4413_v31 = vcombine.low %v1058_v34, %v1058_v34  ;;  %5025 = vrcp.f32 %v751_v4  ;;  %v752_v3 = vadd.f32 1.0, %v5018_v48 }
 0x13f   : > { %v4414_v35 = vcombine.low %v1043_v44, %v1043_v44  ;;  %v4415_v12 = vcombine.high %v1043_v44, %v1043_v44  ;;  %1282 = vst.msk [vmem:[#allocation2 + $0xb0] sm:$0x1] %vm1242_vm3, %v4416_v28  ;;  %v1042_v27 = vsel %vm5447_vm12, 0, %v973_v29  ;;  %5027 = vrcp.f32 %v754_v51  ;;  %2269 = vrot.lane.b32.xlu0 %v5668_v49, %s5202_s17  ;;  %v5787_v28 = vld [vmem:[#allocation2 + $0x84] sm:$0xf] }
 0x140   : > { %v4411_v15 = vcombine.low %v1042_v27, %v1042_v27  ;;  %v4412_v2 = vcombine.high %v1042_v27, %v1042_v27  ;;  %1279 = vst.msk [vmem:[#allocation2 + $0xa4] sm:$0x1] %vm1242_vm3, %v4413_v31  ;;  %2072 = vrot.lane.b32.xlu1 %v5736_v42, %s5199_s12  ;;  %5029 = vrcp.f32 %v752_v3  ;;  %v1585_v54 = vrot.slane %v1583_v20, 5  ;;  %v5790_v44 = vld [vmem:[#allocation2 + $0x88] sm:$0xf] }
 0x141   : > { %1280 = vst.msk [vmem:[#allocation2 + $0xa8] sm:$0xf] %vm1239_vm2, %v4414_v35  ;;  %1281 = vst.msk [vmem:[#allocation2 + $0xac] sm:$0xf] %vm1239_vm2, %v4415_v12  ;;  %5031 = vpow2.f32 %v5709_v45  ;;  %v1580_v7 = vor.u32 %v1579_v59, %v1576_v52  ;;  %v1395_v18 = vshrl.u32 %v5563_v37, 16  ;;  %v1382_v22 = vshrl.u32 %v5561_v30, 16 }
 0x142   : > { %1277 = vst.msk [vmem:[#allocation2 + $0x9c] sm:$0xf] %vm1239_vm2, %v4411_v15  ;;  %1278 = vst.msk [vmem:[#allocation2 + $0xa0] sm:$0xf] %vm1239_vm2, %v4412_v2  ;;  %5033 = vpow2.f32 %v5724_v8  ;;  %v1590_v49 = vor.u32 %v1589_v5, %v1585_v54  ;;  %v1385_v60 = vshll.u32 %v5561_v30, 16  ;;  %v1593_v8 = vshll.u32 %v5620_v57, 16 }
 0x143   : > { %2292 = vrot.lane.b32.xlu0 %v5693_v61, %s5200_s15  ;;  %v5776_v45 = vld [vmem:[#allocation2 + $0x28] sm:$0xf]  ;;  %v1391_v16 = vshll.u32 %v5563_v37, 16  ;;  %v1581_v46 = vrot.slane %v1580_v7, 4  ;;  %v1384_v34 = vrot.slane %v1382_v22, 4  ;;  %v1397_v20 = vrot.slane %v1395_v18, 4 }
 0x144   : > { %2236 = vrot.lane.b32.xlu1 %v4467_v14, %s5204_s19  ;;  %v5020_v43 = vpop.eup %5019  ;;  %v1591_v19 = vrot.slane %v1590_v49, 4  ;;  %v5785_v30 = vcombine.low %v5774_v33, %v5776_v45  ;;  %v1387_v57 = vrot.slane %v1385_v60, 5  ;;  %v1595_v31 = vrot.slane %v1593_v8, 5  ;;  %v5799_v12 = vld [vmem:[#allocation2 + $0x38] sm:$0x1] }
 0x145   : > { %v769_v13 = vadd.f32 1.0, %v5020_v43  ;;  %v5792_v4 = vrot.slane %v1391_v16, 5  ;;  %v1586_v15 = vsel %vm5320_vm9, %v1581_v46, %v1585_v54  ;;  %v5810_v3 = vcombine.low %v5787_v28, %v5790_v44 }
 0x146   : > { %v5022_v17 = vpop.eup %5021  ;;  %v1388_v47 = vor.u32 %v1387_v57, %v1384_v34  ;;  %v1401_v22 = vshll.u32 %v5608_v58, 16  ;;  %v1815_v57 = vrot.slane %v5776_v45, 5 }
 0x147   : > { %v5024_v23 = vpop.eup %5023  ;;  %2308 = vrot.lane.b32.xlu0 %v5718_v56, %s5200_s15  ;;  %v767_v29 = vadd.f32 1.0, %v5022_v17  ;;  %5035 = vrcp.f32 %v769_v13  ;;  %v1398_v54 = vor.u32 %v1397_v20, %v5792_v4 }
 0x148   : > { %2088 = vrot.lane.b32.xlu1 %v4467_v14, %s5199_s12  ;;  %v849_v37 = vmul.f32 %v5024_v23, %v5439_v63  ;;  %v1822_v63 = vrot.slane %v5672_v50, 5  ;;  %v1389_v8 = vrot.slane %v1388_v47, 4  ;;  %v1403_v34 = vrot.slane %v1401_v22, 5  ;;  %v5943_v55 = vld [vmem:[#allocation2 + $0xa8] sm:$0xf] }
 0x149   : > { %5037 = vrcp.f32 %v767_v29  ;;  %v1399_v23 = vrot.slane %v1398_v54, 4 }
 0x14a   : > { %v1824_v49 = vrot.slane %v1822_v63, 4  ;;  %v1394_v20 = vsel %vm5320_vm9, %v1389_v8, %v5792_v4  ;;  %v1467_v8 = vshrl.u32 %v5672_v50, 16 }
 0x14b   : > { %v5026_v9 = vpop.eup %5025  ;;  %2323 = vrot.lane.b32.xlu0 %v5736_v42, %s5205_s20 }
 0x14c   : > { %v5028_v48 = vpop.eup %5027  ;;  %v847_v35 = vmul.f32 %v5026_v9, %v5521_v6  ;;  %2290 = vrot.lane.b32.xlu1 %v5785_v30, %s5200_s15  ;;  %v1596_v6 = vsel %vm5320_vm9, %v1591_v19, %v1595_v31  ;;  %v4427_v19 = vrot.slane %v5670_v39, 9 }
 0x14d   : > { %v5030_v27 = vpop.eup %5029  ;;  %v850_v51 = vmul.f32 %v5028_v48, %v5526_v32  ;;  %v1825_v32 = vrot.slane %v5799_v12, 5  ;;  %v5836_v48 = vld [vmem:[#allocation2 + $0x98] sm:$0x1] }
 0x14e   : > { %v5032_v2 = vpop.eup %5031  ;;  %v848_v42 = vmul.f32 %v5030_v27, %v5577_v53  ;;  %v5817_v53 = vcombine.low %v1586_v15, %v1596_v6  ;;  %v1823_v4 = vsel %vm5314_vm6, %v4427_v19, %v1822_v63 }
 0x14f   : > { %v5034_v21 = vpop.eup %5033  ;;  %v874_v52 = vpack.c.bf16 %v850_v51, %v849_v37  ;;  %v770_v59 = vadd.f32 1.0, %v5032_v2  ;;  %2339 = vrot.lane.b32.xlu0 %v4467_v14, %s5205_s20  ;;  %v1878_v14 = vrot.slane %v5701_v38, 5  ;;  %v1826_v58 = vsel %vm5314_vm6, %v1824_v49, %v1825_v32  ;;  %v5854_v32 = vld [vmem:[#allocation2 + $0x2c] sm:$0x1] }
 0x150   : > { %v873_v5 = vpack.c.bf16 %v848_v42, %v847_v35  ;;  %2306 = vrot.lane.b32.xlu1 %v5810_v3, %s5200_s15  ;;  %v768_v7 = vadd.f32 1.0, %v5034_v21  ;;  %v1404_v51 = vsel %vm5320_vm9, %v1399_v23, %v1403_v34  ;;  %v1817_v49 = vrot.slane %v1815_v57, 4 }
 0x151   : > { %v933_v43 = vshrl.u32 %v874_v52, 16  ;;  %v936_v18 = vshll.u32 %v874_v52, 16  ;;  %5039 = vrcp.f32 %v770_v59  ;;  %v1880_v15 = vrot.slane %v1878_v14, 4 }
 0x152   : > { %v926_v60 = vshrl.u32 %v873_v5, 16  ;;  %v929_v17 = vshll.u32 %v873_v5, 16  ;;  %5041 = vrcp.f32 %v768_v7  ;;  %v4435_v52 = vrot.slane %v5695_v11, 9 }
 0x153   : > { %v935_v16 = vrot.slane %v933_v43, 7  ;;  %2187 = vrot.lane.b32.xlu0 %v5785_v30, %s5201_s16  ;;  %v1881_v59 = vrot.slane %v5836_v48, 5  ;;  %v5858_v5 = vcombine.low %v1823_v4, %v1826_v58  ;;  %v4458_v7 = vcombine.low %v1394_v20, %v1404_v51 }
 0x154   : > { %v928_v46 = vrot.slane %v926_v60, 7  ;;  %2337 = vrot.lane.b32.xlu1 %v5817_v53, %s5205_s20  ;;  %v5036_v54 = vpop.eup %5035  ;;  %v1454_v43 = vshrl.u32 %v5670_v39, 16  ;;  %v1871_v60 = vrot.slane %v5790_v44, 5  ;;  %v4426_v23 = vrot.slane %v5774_v33, 9 }
 0x155   : > { %v938_v13 = vor.u32 %v936_v18, %v935_v16  ;;  %v1053_v29 = vsel %vm5447_vm12, %v935_v16, 0  ;;  %v1457_v18 = vshll.u32 %v5670_v39, 16  ;;  %v1882_v22 = vsel %vm5314_vm6, %v1880_v15, %v1881_v59 }
 0x156   : > { %v4398_v9 = vcombine.low %v1053_v29, %v1053_v29  ;;  %v931_v37 = vor.u32 %v929_v17, %v928_v46  ;;  %v1052_v31 = vsel %vm5447_vm12, %v928_v46, 0  ;;  %v5038_v63 = vpop.eup %5037  ;;  %v1818_v17 = vrot.slane %v5854_v32, 5  ;;  %v5881_v29 = vld [vmem:[#allocation2 + $0x8c] sm:$0x1] }
 0x157   : > { %v1037_v35 = vsel %vm5447_vm12, 0, %v938_v13  ;;  %v4395_v27 = vcombine.low %v1052_v31, %v1052_v31  ;;  %2203 = vrot.lane.b32.xlu0 %v5810_v3, %s5201_s16  ;;  %v865_v39 = vmul.f32 %v5036_v54, %v5664_v41  ;;  %v1879_v16 = vsel %vm5314_vm6, %v4435_v52, %v1878_v14 }
 0x158   : > { %v4396_v6 = vcombine.low %v1037_v35, %v1037_v35  ;;  %v4397_v2 = vcombine.high %v1037_v35, %v1037_v35  ;;  %1264 = vst.msk [vmem:[#allocation2 + $0x68] sm:$0x1] %vm1242_vm3, %v4398_v9  ;;  %v1036_v42 = vsel %vm5447_vm12, 0, %v931_v37  ;;  %2086 = vrot.lane.b32.xlu1 %v5817_v53, %s5199_s12  ;;  %v863_v19 = vmul.f32 %v5038_v63, %v5680_v10  ;;  %v5910_v63 = vld [vmem:[#allocation2 + $0x4c] sm:$0xf] }
 0x159   : > { %v4393_v47 = vcombine.low %v1036_v42, %v1036_v42  ;;  %v4394_v21 = vcombine.high %v1036_v42, %v1036_v42  ;;  %1261 = vst.msk [vmem:[#allocation2 + $0x5c] sm:$0x1] %vm1242_vm3, %v4395_v27  ;;  %v5877_v58 = vcombine.low %v1879_v16, %v1882_v22  ;;  %v1819_v13 = vsel %vm5314_vm6, %v1817_v49, %v1818_v17  ;;  %v5908_v49 = vld [vmem:[#allocation2 + $0x48] sm:$0xf] }
 0x15a   : > { %1262 = vst.msk [vmem:[#allocation2 + $0x60] sm:$0xf] %vm1239_vm2, %v4396_v6  ;;  %1263 = vst.msk [vmem:[#allocation2 + $0x64] sm:$0xf] %vm1239_vm2, %v4397_v2  ;;  %v1463_v34 = vshll.u32 %v5672_v50, 16  ;;  %v1873_v37 = vrot.slane %v1871_v60, 4  ;;  %v1816_v35 = vsel %vm5314_vm6, %v4426_v23, %v1815_v57 }
 0x15b   : > { %1259 = vst.msk [vmem:[#allocation2 + $0x54] sm:$0xf] %vm1239_vm2, %v4393_v47  ;;  %1260 = vst.msk [vmem:[#allocation2 + $0x58] sm:$0xf] %vm1239_vm2, %v4394_v21  ;;  %2070 = vrot.lane.b32.xlu0 %v4458_v7, %s5199_s12  ;;  %v1456_v31 = vrot.slane %v1454_v43, 4  ;;  %v1459_v14 = vrot.slane %v1457_v18, 5  ;;  %v5916_v18 = vcombine.low %v5908_v49, %v5910_v63 }
 0x15c   : > { %2259 = vrot.lane.b32.xlu1 %v5858_v5, %s5202_s17  ;;  %v4434_v27 = vrot.slane %v5787_v28, 9  ;;  %v1874_v50 = vrot.slane %v5881_v29, 5  ;;  %v5895_v15 = vrot.slane %v1463_v34, 5  ;;  %v1469_v6 = vrot.slane %v1467_v8, 4 }
 0x15d   : > { %v1460_v4 = vor.u32 %v1459_v14, %v1456_v31  ;;  %v1646_v47 = vshrl.u32 %v5695_v11, 16  ;;  %v1649_v57 = vshll.u32 %v5695_v11, 16  ;;  %v1659_v59 = vshrl.u32 %v5701_v38, 16  ;;  %7669 = vst [vmem:[#allocation6_spill] sm:$0xff] %v5916_v18 }
 0x15e   : > { %v5040_v46 = vpop.eup %5039  ;;  %v1875_v42 = vsel %vm5314_vm6, %v1873_v37, %v1874_v50  ;;  %v1470_v22 = vor.u32 %v1469_v6, %v5895_v15 }
 0x15f   : > { %v5042_v9 = vpop.eup %5041  ;;  %v866_v41 = vmul.f32 %v5040_v46, %v5683_v0  ;;  %2218 = vrot.lane.b32.xlu0 %v4458_v7, %s5204_s19  ;;  %v5893_v0 = vcombine.low %v1816_v35, %v1819_v13  ;;  %v1872_v7 = vsel %vm5314_vm6, %v4434_v27, %v1871_v60  ;;  %v1461_v8 = vrot.slane %v1460_v4, 4  ;;  %v5945_v35 = vld [vmem:[#allocation2 + $0xac] sm:$0xf] }
 0x160   : > { %v864_v20 = vmul.f32 %v5042_v9, %v5698_v25  ;;  %2275 = vrot.lane.b32.xlu1 %v5877_v58, %s5202_s17  ;;  %v5912_v11 = vcombine.low %v1872_v7, %v1875_v42  ;;  %v1655_v60 = vshll.u32 %v5701_v38, 16  ;;  %v1473_v46 = vshll.u32 %v5799_v12, 16 }
 0x161   : > { %v882_v10 = vpack.c.bf16 %v866_v41, %v865_v39  ;;  %v1648_v34 = vrot.slane %v1646_v47, 4  ;;  %v1651_v9 = vrot.slane %v1649_v57, 5  ;;  %v1471_v31 = vrot.slane %v1470_v22, 4 }
 0x162   : > { %v881_v51 = vpack.c.bf16 %v864_v20, %v863_v19  ;;  %v1661_v12 = vrot.slane %v1659_v59, 4  ;;  %v1475_v27 = vrot.slane %v1473_v46, 5  ;;  %v5949_v50 = vcombine.low %v5943_v55, %v5945_v35 }
 0x163   : > { %v989_v25 = vshrl.u32 %v882_v10, 16  ;;  %v992_v2 = vshll.u32 %v882_v10, 16  ;;  %2234 = vrot.lane.b32.xlu0 %v5817_v53, %s5204_s19  ;;  %v1657_v10 = vrot.slane %v1655_v60, 5  ;;  %v1652_v6 = vor.u32 %v1651_v9, %v1648_v34 }
 0x164   : > { %v982_v21 = vshrl.u32 %v881_v51, 16  ;;  %v985_v52 = vshll.u32 %v881_v51, 16  ;;  %2154 = vrot.lane.b32.xlu1 %v5893_v0, %s5198_s11  ;;  %7670 = vst [vmem:[#allocation7_spill] sm:$0xff] %v5949_v50  ;;  %v1466_v51 = vsel %vm5320_vm9, %v1461_v8, %v5895_v15  ;;  %v1430_v57 = vshrl.u32 %v5774_v33, 16 }
 0x165   : > { %v991_v54 = vrot.slane %v989_v25, 7  ;;  %v1662_v25 = vor.u32 %v1661_v12, %v1657_v10  ;;  %v1653_v4 = vrot.slane %v1652_v6, 4  ;;  %v1635_v8 = vshrl.u32 %v5790_v44, 16 }
 0x166   : > { %v984_v43 = vrot.slane %v982_v21, 7  ;;  %v1433_v21 = vshll.u32 %v5774_v33, 16  ;;  %v1432_v7 = vrot.slane %v1430_v57, 4 }
 0x167   : > { %v994_v53 = vor.u32 %v992_v2, %v991_v54  ;;  %v1061_v17 = vsel %vm5447_vm12, %v991_v54, 0  ;;  %2362 = vrot.lane.b32.xlu0 %v5858_v5, %s5203_s18  ;;  %v1665_v2 = vshll.u32 %v5836_v48, 16  ;;  %v1663_v47 = vrot.slane %v1662_v25, 4 }
 0x168   : > { %v4422_v39 = vcombine.low %v1061_v17, %v1061_v17  ;;  %v987_v16 = vor.u32 %v985_v52, %v984_v43  ;;  %v1060_v23 = vsel %vm5447_vm12, %v984_v43, 0  ;;  %2170 = vrot.lane.b32.xlu1 %v5912_v11, %s5198_s11  ;;  %v1443_v52 = vshrl.u32 %v5776_v45, 16 }
 0x169   : > { %v1045_v19 = vsel %vm5447_vm12, 0, %v994_v53  ;;  %v4419_v13 = vcombine.low %v1060_v23, %v1060_v23  ;;  %v1667_v15 = vrot.slane %v1665_v2, 5  ;;  %v1658_v48 = vsel %vm5320_vm9, %v1653_v4, %v1657_v10  ;;  %v5995_v23 = vld [vmem:[#allocation2 + $0x40] sm:$0xf] }
 0x16a   : > { %v4420_v38 = vcombine.low %v1045_v19, %v1045_v19  ;;  %v4421_v41 = vcombine.high %v1045_v19, %v1045_v19  ;;  %1288 = vst.msk [vmem:[#allocation2 + $0xc8] sm:$0x1] %vm1242_vm3, %v4422_v39  ;;  %v1044_v37 = vsel %vm5447_vm12, 0, %v987_v16  ;;  %v1439_v54 = vshll.u32 %v5776_v45, 16  ;;  %v5993_v16 = vld [vmem:[#allocation2 + $0x3c] sm:$0xf] }
 0x16b   : > { %v4417_v14 = vcombine.low %v1044_v37, %v1044_v37  ;;  %v4418_v20 = vcombine.high %v1044_v37, %v1044_v37  ;;  %1285 = vst.msk [vmem:[#allocation2 + $0xbc] sm:$0x1] %vm1242_vm3, %v4419_v13  ;;  %2156 = vrot.lane.b32.xlu0 %v5858_v5, %s5198_s11  ;;  %v1476_v5 = vsel %vm5320_vm9, %v1471_v31, %v1475_v27  ;;  %v1435_v33 = vrot.slane %v1433_v21, 5  ;;  %v6012_v37 = vld [vmem:[#allocation2 + $0xa0] sm:$0xf] }
 0x16c   : > { %1286 = vst.msk [vmem:[#allocation2 + $0xc0] sm:$0xf] %vm1239_vm2, %v4420_v38  ;;  %1287 = vst.msk [vmem:[#allocation2 + $0xc4] sm:$0xf] %vm1239_vm2, %v4421_v41  ;;  %2193 = vrot.lane.b32.xlu1 %v5916_v18, %s5201_s16  ;;  %v5961_v42 = vcombine.low %v1466_v51, %v1476_v5  ;;  %v1668_v59 = vsel %vm5320_vm9, %v1663_v47, %v1667_v15  ;;  %v1441_v43 = vrot.slane %v1439_v54, 5  ;;  %v1445_v22 = vrot.slane %v1443_v52, 4  ;;  %v6006_v38 = vpop.permute.xlu1 %2148  ;;  %v6008_v41 = vpop.permute.xlu0 %2068 }
 0x16d   : > { %1283 = vst.msk [vmem:[#allocation2 + $0xb4] sm:$0xf] %vm1239_vm2, %v4417_v14  ;;  %1284 = vst.msk [vmem:[#allocation2 + $0xb8] sm:$0xf] %vm1239_vm2, %v4418_v20  ;;  %v1622_v45 = vshrl.u32 %v5787_v28, 16  ;;  %v1436_v53 = vor.u32 %v1435_v33, %v1432_v7  ;;  %v1625_v17 = vshll.u32 %v5787_v28, 16  ;;  %v6000_v28 = vcombine.low %v5993_v16, %v5995_v23 }
 0x16e   : > { %v1446_v60 = vor.u32 %v1445_v22, %v1441_v43  ;;  %v1631_v39 = vshll.u32 %v5790_v44, 16  ;;  %v1637_v9 = vrot.slane %v1635_v8, 4  ;;  %v1641_v27 = vshll.u32 %v5881_v29, 16  ;;  %v4891_v4 = vld [vmem:[%s7644_s3 + $0x20] ss:$0 sps:$4 sm:$0xff]  }
 0x16f   : > { %2378 = vrot.lane.b32.xlu0 %v5877_v58, %s5203_s18  ;;  %7671 = vst [vmem:[#allocation8_spill] sm:$0xff] %v6000_v28  ;;  %v1437_v46 = vrot.slane %v1436_v53, 4  ;;  %v1624_v19 = vrot.slane %v1622_v45, 4  ;;  %v1627_v44 = vrot.slane %v1625_v17, 5  ;;  %v1836_v52 = vrot.slane %v5910_v63, 5  ;;  %4764 = vmatprep.subr.msk.bf16.mxu1 %vm2746_vm13, %v4891_v4 }
 0x170   : > { %2209 = vrot.lane.b32.xlu1 %v5949_v50, %s5201_s16  ;;  %v1447_v13 = vrot.slane %v1446_v60, 4  ;;  %v1633_v34 = vrot.slane %v1631_v39, 5  ;;  %v1643_v47 = vrot.slane %v1641_v27, 5  ;;  %v2748_v54 = vsel %vm2746_vm13, %v4891_v4, 0  ;;  %v6074_v8 = vld [vmem:[#allocation2 + $0xb0] sm:$0x1] }
 0x171   : > { %v1442_v20 = vsel %vm5320_vm9, %v1437_v46, %v1441_v43  ;;  %4685 = vmatpush3.bf16.msra.mxu1 %v2748_v54  ;;  %v4429_v22 = vrot.slane %v5908_v49, 9  ;;  %v1838_v45 = vrot.slane %v1836_v52, 4  ;;  %v1892_v17 = vrot.slane %v5945_v35, 5 }
 0x172   : > { %v1638_v12 = vor.u32 %v1637_v9, %v1633_v34  ;;  %v1829_v46 = vrot.slane %v5995_v23, 5  ;;  %v4895_v9 = vld [vmem:[%s7644_s3 + $0x8] sm:$0xff]   ;;  %v1885_v4 = vrot.slane %v6012_v37, 5  ;;  %vm2538_vm2 = vcmask 326656  }
 0x173   : > { %2172 = vrot.lane.b32.xlu0 %v5877_v58, %s5198_s11  ;;  %v5979_v58 = vcombine.low %v1658_v48, %v1668_v59  ;;  %v4892_v48 = vld [vmem:[%s7644_s3 + $0x18] sm:$0xff]   ;;  %v6056_v59 = vld [vmem:[#allocation2 + $0x50] sm:$0x1]  ;;  %vm2604_vm3 = vcmask 457728   ;;  %vm3616_vm12 = vcmask 1044484   ;;  %vm3619_vm13 = vcmask 1045509  }
 0x174   : > { %2224 = vrot.lane.b32.xlu1 %v5961_v42, %s5204_s19  ;;  %v1639_v2 = vrot.slane %v1638_v12, 4  ;;  %v1839_v53 = vrot.slane %v6056_v59, 5  ;;  %4686 = vmatprep.subr.bf16.mxu1 %v4892_v48 }
 0x175   : > { %4687 = vmatpush3.bf16.msra.mxu1 %v4892_v48  ;;  %v4896_v48 = vld [vmem:[%s7644_s3] sm:$0xff]  }
 0x176   : > { %v1644_v21 = vsel %vm5320_vm9, %v1639_v2, %v1643_v47  ;;  %v1515_v47 = vshrl.u32 %v5910_v63, 16 }
 0x177   : > { %2360 = vrot.lane.b32.xlu0 %v5893_v0, %s5203_s18 }
 0x178   : > { %2076 = vrot.lane.b32.xlu1 %v5961_v42, %s5199_s12 }
 0x17b   : > { %2257 = vrot.lane.b32.xlu0 %v5893_v0, %s5202_s17  ;;  %v1449_v0 = vshll.u32 %v5854_v32, 16  ;;  %v6010_v32 = vld [vmem:[#allocation2 + $0x9c] sm:$0xf] }
 0x17c   : > { %2240 = vrot.lane.b32.xlu1 %v5979_v58, %s5204_s19  ;;  %v6016_v14 = vcombine.low %v6010_v32, %v6012_v37 }
 0x17d   : > { %v1451_v31 = vrot.slane %v1449_v0, 5  ;;  %v4437_v0 = vrot.slane %v5943_v55, 9 }
 0x17e   : > { %7672 = vst [vmem:[#allocation9_spill] sm:$0xff] %v6016_v14 }
 0x17f   : > { %2376 = vrot.lane.b32.xlu0 %v5912_v11, %s5203_s18  ;;  %v1452_v10 = vsel %vm5320_vm9, %v1447_v13, %v1451_v31  ;;  %v1840_v13 = vsel %vm5314_vm6, %v1838_v45, %v1839_v53  ;;  %v1502_v31 = vshrl.u32 %v5908_v49, 16 }
 0x180   : > { %2092 = vrot.lane.b32.xlu1 %v5979_v58, %s5199_s12  ;;  %v6031_v6 = vcombine.low %v1442_v20, %v1452_v10  ;;  %v1505_v20 = vshll.u32 %v5908_v49, 16  ;;  %v4428_v10 = vrot.slane %v5993_v16, 9 }
 0x182   : > { %v1830_v54 = vsel %vm5314_vm6, %v4428_v10, %v1829_v46  ;;  %v1697_v10 = vshll.u32 %v5943_v55, 16 }
 0x183   : > { %2273 = vrot.lane.b32.xlu0 %v5912_v11, %s5202_s17  ;;  %v1628_v11 = vor.u32 %v1627_v44, %v1624_v19  ;;  %v1837_v19 = vsel %vm5314_vm6, %v4429_v22, %v1836_v52  ;;  %v1894_v44 = vrot.slane %v1892_v17, 4  ;;  %v1511_v52 = vshll.u32 %v5910_v63, 16 }
 0x184   : > { %2294 = vrot.lane.b32.xlu1 %v6000_v28, %s5200_s15  ;;  %v6103_v27 = vcombine.low %v1837_v19, %v1840_v13  ;;  %v4436_v22 = vrot.slane %v6010_v32, 9  ;;  %v1504_v19 = vrot.slane %v1502_v31, 4  ;;  %v1507_v13 = vrot.slane %v1505_v20, 5 }
 0x185   : > { %v1629_v25 = vrot.slane %v1628_v11, 4 }
 0x186   : > { %v1886_v20 = vsel %vm5314_vm6, %v4436_v22, %v1885_v4 }
 0x187   : > { %2296 = vrot.lane.b32.xlu0 %v5916_v18, %s5200_s15  ;;  %v1634_v57 = vsel %vm5320_vm9, %v1629_v25, %v1633_v34  ;;  %v6087_v34 = vld [vmem:[#allocation2 + $0x44] sm:$0x1]  ;;  %v1831_v25 = vrot.slane %v1829_v46, 4  ;;  %v1694_v46 = vshrl.u32 %v5943_v55, 16  ;;  %v1521_v55 = vshll.u32 %v6056_v59, 16 }
 0x188   : > { %2310 = vrot.lane.b32.xlu1 %v6016_v14, %s5200_s15  ;;  %v6062_v43 = vcombine.low %v1634_v57, %v1644_v21  ;;  %v1832_v2 = vrot.slane %v6087_v34, 5  ;;  %v1893_v57 = vsel %vm5314_vm6, %v4437_v0, %v1892_v17  ;;  %v6112_v21 = vld [vmem:[#allocation2 + $0xa4] sm:$0x1]  ;;  %v6164_v59 = vld [vmem:[#allocation2 + $0x60] sm:$0xf] }
 0x189   : > { %v6027_v51 = vpop.permute.xlu0 %2288  ;;  %v6029_v5 = vpop.permute.xlu1 %2185  ;;  %v1888_v0 = vrot.slane %v6112_v21, 5  ;;  %v1696_v22 = vrot.slane %v1694_v46, 4 }
 0x18a   : > { %v1833_v17 = vsel %vm5314_vm6, %v1831_v25, %v1832_v2  ;;  %v1707_v25 = vshrl.u32 %v5945_v35, 16 }
 0x18b   : > { %2312 = vrot.lane.b32.xlu0 %v5949_v50, %s5200_s15  ;;  %v4478_v31 = vcombine.low %v1830_v54, %v1833_v17  ;;  %v1699_v17 = vrot.slane %v1697_v10, 5  ;;  %v1673_v50 = vshll.u32 %v6010_v32, 16 }
 0x18c   : > { %2325 = vrot.lane.b32.xlu1 %v6031_v6, %s5205_s20 }
 0x18d   : > { %v6040_v29 = vpop.permute.xlu0 %2304  ;;  %v6042_v15 = vpop.permute.xlu1 %2201  ;;  %v1700_v10 = vor.u32 %v1699_v17, %v1696_v22 }
 0x18e   : > { %7673 = vst [vmem:[#allocation10_spill] sm:$0xff] %v6040_v29  ;;  %7674 = vst [vmem:[#allocation11_spill] sm:$0xff] %v6042_v15 }
 0x18f   : > { %2327 = vrot.lane.b32.xlu0 %v5961_v42, %s5205_s20  ;;  %v4894_v42 = vld [vmem:[%s7644_s3 + $0x10] sm:$0xff]   ;;  %v1701_v22 = vrot.slane %v1700_v10, 4 }
 0x190   : > { %2074 = vrot.lane.b32.xlu1 %v6031_v6, %s5199_s12  ;;  %4688 = vmatprep.subr.bf16.mxu1 %v4894_v42 }
 0x191   : > { %v6058_v7 = vpop.permute.xlu1 %2302  ;;  %v6060_v33 = vpop.permute.xlu0 %2183  ;;  %4689 = vmatpush3.bf16.msra.mxu1 %v4894_v42  ;;  %v1887_v42 = vrot.slane %v1885_v4, 4 }
 0x192   : > { %7675 = vst [vmem:[#allocation12_spill] sm:$0xff] %v6058_v7  ;;  %4690 = vmatprep.subr.bf16.mxu1 %v4895_v9  ;;  %v6242_v7 = vld [vmem:[#allocation2 + $0xb8] sm:$0xf] }
 0x193   : > { %2343 = vrot.lane.b32.xlu0 %v5979_v58, %s5205_s20  ;;  %v1895_v58 = vrot.slane %v6074_v8, 5 }
 0x194   : > { %2341 = vrot.lane.b32.xlu1 %v6062_v43, %s5205_s20 }
 0x195   : > { %v6076_v60 = vpop.permute.xlu1 %2255  ;;  %v6078_v39 = vpop.permute.xlu0 %2199  ;;  %v1896_v49 = vsel %vm5314_vm6, %v1894_v44, %v1895_v58  ;;  %4691 = vmatpush3.bf16.msra.mxu1 %v4895_v9  ;;  %v1513_v44 = vrot.slane %v1511_v52, 5  ;;  %v1517_v58 = vrot.slane %v1515_v47, 4  ;;  %v1889_v47 = vsel %vm5314_vm6, %v1887_v42, %v1888_v0 }
 0x196   : > { %7676 = vst [vmem:[#allocation13_spill] sm:$0xff] %v6078_v39  ;;  %v6129_v63 = vcombine.low %v1893_v57, %v1896_v49  ;;  %4692 = vmatprep.subr.bf16.mxu1 %v4896_v48  ;;  %v1703_v57 = vshll.u32 %v5945_v35, 16  ;;  %v6154_v52 = vcombine.low %v1886_v20, %v1889_v47  ;;  %v1709_v35 = vrot.slane %v1707_v25, 4 }
 0x197   : > { %2191 = vrot.lane.b32.xlu0 %v6000_v28, %s5201_s16  ;;  %v1518_v49 = vor.u32 %v1517_v58, %v1513_v44  ;;  %v1713_v20 = vshll.u32 %v6074_v8, 16 }
 0x198   : > { %2090 = vrot.lane.b32.xlu1 %v6062_v43, %s5199_s12  ;;  %v1705_v42 = vrot.slane %v1703_v57, 5 }
 0x199   : > { %v6101_v12 = vpop.permute.xlu0 %2358  ;;  %4693 = vmatpush3.bf16.msra.mxu1 %v4896_v48  ;;  %v1519_v0 = vrot.slane %v1518_v49, 4  ;;  %v1715_v17 = vrot.slane %v1713_v20, 5 }
 0x19a   : > { %v6099_v11 = vpop.permute.xlu1 %2271  ;;  %v1710_v25 = vor.u32 %v1709_v35, %v1705_v42  ;;  %v1481_v35 = vshll.u32 %v5993_v16, 16  ;;  %v1706_v10 = vsel %vm5320_vm9, %v1701_v22, %v1705_v42 }
 0x19b   : > { %7677 = vst [vmem:[#allocation14_spill] sm:$0xff] %v6099_v11  ;;  %2207 = vrot.lane.b32.xlu0 %v6016_v14, %s5201_s16 }
 0x19c   : > { %2263 = vrot.lane.b32.xlu1 %v6103_v27, %s5202_s17  ;;  %v1711_v8 = vrot.slane %v1710_v25, 4  ;;  %v1483_v20 = vrot.slane %v1481_v35, 5  ;;  %v1679_v35 = vshll.u32 %v6012_v37, 16 }
 0x19d   : > { %v6125_v45 = vpop.permute.xlu0 %2152 }
 0x19e   : > { %v6127_v53 = vpop.permute.xlu1 %2150  ;;  %v1716_v25 = vsel %vm5320_vm9, %v1711_v8, %v1715_v17 }
 0x19f   : > { %2222 = vrot.lane.b32.xlu0 %v6031_v6, %s5204_s19  ;;  %v1508_v6 = vor.u32 %v1507_v13, %v1504_v19  ;;  %v1523_v19 = vrot.slane %v1521_v55, 5  ;;  %v6216_v22 = vcombine.low %v1706_v10, %v1716_v25 }
 0x1a0   : > { %2279 = vrot.lane.b32.xlu1 %v6129_v63, %s5202_s17 }
 0x1a1   : > { %v6141_v2 = vpop.permute.xlu0 %2374  ;;  %v1509_v48 = vrot.slane %v1508_v6, 4  ;;  %v1524_v57 = vsel %vm5320_vm9, %v1519_v0, %v1523_v19  ;;  %v1487_v0 = vshll.u32 %v5995_v23, 16 }
 0x1a2   : > { %7678 = vst [vmem:[#allocation15_spill] sm:$0xff] %v6141_v2  ;;  %v6143_v9 = vpop.permute.xlu1 %2166  ;;  %v1683_v2 = vshrl.u32 %v6012_v37, 16  ;;  %v1675_v37 = vrot.slane %v1673_v50, 5 }
 0x1a3   : > { %7679 = vst [vmem:[#allocation16_spill] sm:$0xff] %v6143_v9  ;;  %2238 = vrot.lane.b32.xlu0 %v6062_v43, %s5204_s19  ;;  %v6166_v43 = vld [vmem:[#allocation2 + $0x64] sm:$0xf]  ;;  %v1514_v47 = vsel %vm5320_vm9, %v1509_v48, %v1513_v44  ;;  %v1478_v44 = vshrl.u32 %v5993_v16, 16  ;;  %v1491_v48 = vshrl.u32 %v5995_v23, 16  ;;  %v1670_v23 = vshrl.u32 %v6010_v32, 16 }
 0x1a4   : > { %2158 = vrot.lane.b32.xlu1 %v4478_v31, %s5198_s11  ;;  %v6174_v46 = vcombine.low %v6164_v59, %v6166_v43  ;;  %v6189_v55 = vcombine.low %v1514_v47, %v1524_v57  ;;  %v1489_v47 = vrot.slane %v1487_v0, 5  ;;  %v6224_v32 = vld [vmem:[#allocation2 + $0x54] sm:$0xf]  ;;  %v1685_v25 = vrot.slane %v1683_v2, 4 }
 0x1a5   : > { %v6156_v54 = vpop.permute.xlu0 %2168  ;;  %v1480_v16 = vrot.slane %v1478_v44, 4  ;;  %v1493_v57 = vrot.slane %v1491_v48, 4  ;;  %v1497_v44 = vshll.u32 %v6087_v34, 16  ;;  %v1672_v34 = vrot.slane %v1670_v23, 4 }
 0x1a6   : > { %v6158_v4 = vpop.permute.xlu1 %2189  ;;  %7680 = vst [vmem:[#allocation17_spill] sm:$0xff] %v6174_v46  ;;  %v1526_v28 = vshrl.u32 %v6224_v32, 16 }
 0x1a7   : > { %2366 = vrot.lane.b32.xlu0 %v6103_v27, %s5203_s18  ;;  %v1484_v8 = vor.u32 %v1483_v20, %v1480_v16  ;;  %v1494_v17 = vor.u32 %v1493_v57, %v1489_v47  ;;  %v1499_v57 = vrot.slane %v1497_v44, 5  ;;  %v1676_v2 = vor.u32 %v1675_v37, %v1672_v34 }
 0x1a8   : > { %2174 = vrot.lane.b32.xlu1 %v6154_v52, %s5198_s11 }
 0x1a9   : > { %v6168_v13 = vpop.permute.xlu0 %2253  ;;  %v1485_v16 = vrot.slane %v1484_v8, 4  ;;  %v1495_v20 = vrot.slane %v1494_v17, 4  ;;  %v1689_v17 = vshll.u32 %v6112_v21, 16  ;;  %v1677_v37 = vrot.slane %v1676_v2, 4 }
 0x1aa   : > { %v6170_v58 = vpop.permute.xlu1 %2205  ;;  %v1550_v21 = vshrl.u32 %v6164_v59, 16 }
 0x1ab   : > { %2160 = vrot.lane.b32.xlu0 %v6103_v27, %s5198_s11  ;;  %v1490_v23 = vsel %vm5320_vm9, %v1485_v16, %v1489_v47  ;;  %v1500_v8 = vsel %vm5320_vm9, %v1495_v20, %v1499_v57  ;;  %v1691_v47 = vrot.slane %v1689_v17, 5  ;;  %v1559_v16 = vshll.u32 %v6166_v43, 16  ;;  %v5171_v17 = vld [vmem:[#allocation2] sm:$0xf] }
 0x1ac   : > { %2197 = vrot.lane.b32.xlu1 %v6174_v46, %s5201_s16  ;;  %v4462_v34 = vcombine.low %v1490_v23, %v1500_v8  ;;  %v1563_v23 = vshrl.u32 %v6166_v43, 16 }
 0x1ad   : > { %v6185_v6 = vpop.permute.xlu0 %2372 }
 0x1ae   : > { %7681 = vst [vmem:[#allocation18_spill] sm:$0xff] %v6185_v6  ;;  %v6187_v49 = vpop.permute.xlu1 %2220  ;;  %v1681_v6 = vrot.slane %v1679_v35, 5  ;;  %v1565_v62 = vrot.slane %v1563_v23, 4 }
 0x1af   : > { %2364 = vrot.lane.b32.xlu0 %v4478_v31, %s5203_s18 }
 0x1b0   : > { %2228 = vrot.lane.b32.xlu1 %v6189_v55, %s5204_s19  ;;  %v1682_v2 = vsel %vm5320_vm9, %v1677_v37, %v1681_v6 }
 0x1b1   : > { %v6198_v27 = vpop.permute.xlu0 %2269 }
 0x1b2   : > { %7682 = vst [vmem:[#allocation19_spill] sm:$0xff] %v6198_v27  ;;  %v6200_v19 = vpop.permute.xlu1 %2072 }
 0x1b3   : > { %2261 = vrot.lane.b32.xlu0 %v4478_v31, %s5202_s17  ;;  %v6226_v31 = vld [vmem:[#allocation2 + $0x58] sm:$0xf] }
 0x1b4   : > { %2080 = vrot.lane.b32.xlu1 %v6189_v55, %s5199_s12  ;;  %v6234_v10 = vcombine.low %v6224_v32, %v6226_v31  ;;  %v1843_v18 = vrot.slane %v6226_v31, 5 }
 0x1b5   : > { %v6212_v11 = vpop.permute.xlu0 %2292 }
 0x1b6   : > { %v6214_v42 = vpop.permute.xlu1 %2236  ;;  %7684 = vst [vmem:[#allocation21_spill] sm:$0xff] %v6234_v10  ;;  %v1845_v14 = vrot.slane %v1843_v18, 4 }
 0x1b7   : > { %7683 = vst [vmem:[#allocation20_spill] sm:$0xff] %v6214_v42  ;;  %2380 = vrot.lane.b32.xlu0 %v6154_v52, %s5203_s18  ;;  %v6240_v42 = vld [vmem:[#allocation2 + $0xb4] sm:$0xf] }
 0x1b8   : > { %2244 = vrot.lane.b32.xlu1 %v6216_v22, %s5204_s19  ;;  %v6250_v50 = vcombine.low %v6240_v42, %v6242_v7 }
 0x1b9   : > { %v6228_v48 = vpop.permute.xlu0 %2308 }
 0x1ba   : > { %v6230_v0 = vpop.permute.xlu1 %2088 }
 0x1bb   : > { %2277 = vrot.lane.b32.xlu0 %v6154_v52, %s5202_s17  ;;  %v1686_v52 = vor.u32 %v1685_v25, %v1681_v6  ;;  %v1553_v25 = vshll.u32 %v6164_v59, 16 }
 0x1bc   : > { %2298 = vrot.lane.b32.xlu1 %v6234_v10, %s5200_s15 }
 0x1bd   : > { %v6244_v29 = vpop.permute.xlu0 %2323  ;;  %v1687_v27 = vrot.slane %v1686_v52, 4  ;;  %v1326_v52 = vld [vmem:[#allocation2 + $0x68] sm:$0x1]  ;;  %v1555_v9 = vrot.slane %v1553_v25, 5  ;;  %v1323_v25 = vld [vmem:[#allocation2 + $0x5c] sm:$0x1] }
 0x1be   : > { %v6246_v15 = vpop.permute.xlu1 %2290  ;;  %v1569_v23 = vshll.u32 %v1326_v52, 16  ;;  %v1846_v56 = vrot.slane %v1323_v25, 5 }
 0x1bf   : > { %2300 = vrot.lane.b32.xlu0 %v6174_v46, %s5200_s15  ;;  %v1692_v8 = vsel %vm5320_vm9, %v1687_v27, %v1691_v47  ;;  %v6290_v47 = vrot.slane %v1559_v16, 5  ;;  %v1853_v46 = vrot.slane %v1326_v52, 5  ;;  %v1539_v16 = vshrl.u32 %v6226_v31, 16 }
 0x1c0   : > { %2314 = vrot.lane.b32.xlu1 %v6250_v50, %s5200_s15  ;;  %v4470_v27 = vcombine.low %v1682_v2, %v1692_v8  ;;  %v4430_v2 = vrot.slane %v6224_v32, 9  ;;  %v1528_v52 = vrot.slane %v1526_v28, 4 }
 0x1c1   : > { %v6261_v44 = vpop.permute.xlu0 %2339 }
 0x1c2   : > { %7685 = vst [vmem:[#allocation22_spill] sm:$0xff] %v6261_v44  ;;  %v6263_v35 = vpop.permute.xlu1 %2306  ;;  %v1844_v28 = vsel %vm5314_vm6, %v4430_v2, %v1843_v18 }
 0x1c3   : > { %7686 = vst [vmem:[#allocation23_spill] sm:$0xff] %v6263_v35  ;;  %2331 = vrot.lane.b32.xlu0 %v6189_v55, %s5205_s20  ;;  %v1850_v55 = vrot.slane %v6166_v43, 5  ;;  %v5172_v35 = vld [vmem:[#allocation2 + $0x4] sm:$0xf]  ;;  %v4431_v43 = vrot.slane %v6164_v59, 9 }
 0x1c4   : > { %2329 = vrot.lane.b32.xlu1 %v4462_v34, %s5205_s20  ;;  %v4441_v44 = vcombine.low %v5171_v17, %v5172_v35  ;;  %v1529_v35 = vshll.u32 %v6224_v32, 16 }
 0x1c5   : > { %v6271_v20 = vpop.permute.xlu0 %2187  ;;  %v1852_v39 = vrot.slane %v1850_v55, 4 }
 0x1c6   : > { %v6273_v57 = vpop.permute.xlu1 %2337  ;;  %v2393_v59 = vsel %vm2390_vm14, %v4441_v44, %v6008_v41  ;;  %v1566_v44 = vor.u32 %v1565_v62, %v6290_v47  ;;  %v1531_v32 = vrot.slane %v1529_v35, 5 }
 0x1c7   : > { %7687 = vst [vmem:[#allocation24_spill] sm:$0xff] %v6273_v57  ;;  %2347 = vrot.lane.b32.xlu0 %v6216_v22, %s5205_s20  ;;  %v1552_v57 = vrot.slane %v1550_v21, 4  ;;  %v1535_v21 = vshll.u32 %v6226_v31, 16  ;;  %v2441_v31 = vsel %vm2439_vm15, %v2393_v59, %v6006_v38  ;;  %v1545_v59 = vshll.u32 %v1323_v25, 16 }
 0x1c8   : > { %2078 = vrot.lane.b32.xlu1 %v4462_v34, %s5199_s12 }
 0x1c9   : > { %v6285_v6 = vpop.permute.xlu0 %2203  ;;  %v1556_v41 = vor.u32 %v1555_v9, %v1552_v57  ;;  %v1537_v61 = vrot.slane %v1535_v21, 5 }
 0x1ca   : > { %v6287_v37 = vpop.permute.xlu1 %2086 }
 0x1cb   : > { %7688 = vst [vmem:[#allocation25_spill] sm:$0xff] %v6287_v37  ;;  %2195 = vrot.lane.b32.xlu0 %v6234_v10, %s5201_s16  ;;  %v1851_v37 = vsel %vm5314_vm6, %v4431_v43, %v1850_v55  ;;  %v1854_v10 = vsel %vm5314_vm6, %v1852_v39, %v1853_v46  ;;  %v1571_v55 = vrot.slane %v1569_v23, 5  ;;  %v2474_v39 = vsel %vm2472_vm0, %v2441_v31, %v6060_v33  ;;  %v6362_v31 = vld [vmem:[#allocation2 + $0xc0] sm:$0xf] }
 0x1cc   : > { %2345 = vrot.lane.b32.xlu1 %v4470_v27, %s5205_s20  ;;  %v4481_v46 = vcombine.low %v1851_v37, %v1854_v10  ;;  %v1557_v57 = vrot.slane %v1556_v41, 4  ;;  %v1567_v43 = vrot.slane %v1566_v44, 4  ;;  %v1532_v37 = vor.u32 %v1531_v32, %v1528_v52  ;;  %v6364_v52 = vld [vmem:[#allocation2 + $0xc4] sm:$0xf] }
 0x1cd   : > { %v6304_v17 = vpop.permute.xlu0 %2070  ;;  %v1899_v32 = vrot.slane %v6242_v7, 5 }
 0x1ce   : > { %v6302_v8 = vpop.permute.xlu1 %2259 }
 0x1cf   : > { %7689 = vst [vmem:[#allocation26_spill] sm:$0xff] %v6302_v8  ;;  %2226 = vrot.lane.b32.xlu0 %v4462_v34, %s5204_s19  ;;  %v1541_v8 = vrot.slane %v1539_v16, 4  ;;  %v1847_v34 = vsel %vm5314_vm6, %v1845_v14, %v1846_v56 }
 0x1d0   : > { %2094 = vrot.lane.b32.xlu1 %v4470_v27, %s5199_s12  ;;  %v4480_v56 = vcombine.low %v1844_v28, %v1847_v34  ;;  %v1908_v28 = vshll.u32 %v6362_v31, 16  ;;  %v1914_v34 = vshll.u32 %v6364_v52, 16 }
 0x1d1   : > { %v2219_v62 = vpop.permute.xlu0 %2218  ;;  %v1542_v21 = vor.u32 %v1541_v8, %v1537_v61  ;;  %v1547_v8 = vrot.slane %v1545_v59, 5 }
 0x1d2   : > { %v6317_v9 = vpop.permute.xlu1 %2275  ;;  %v2507_v38 = vsel %vm2505_vm1, %v2474_v39, %v2219_v62 }
 0x1d3   : > { %v2540_v35 = vsel %vm2538_vm2, %v2507_v38, %v6168_v13  ;;  %2242 = vrot.lane.b32.xlu0 %v4470_v27, %s5204_s19  ;;  %v1562_v27 = vsel %vm5320_vm9, %v1557_v57, %v6290_v47  ;;  %v1543_v2 = vrot.slane %v1542_v21, 4  ;;  %v1918_v38 = vshrl.u32 %v6364_v52, 16 }
 0x1d4   : > { %2267 = vrot.lane.b32.xlu1 %v4481_v46, %s5202_s17  ;;  %v2573_v18 = vsel %vm2571_vm4, %v2540_v35, %v6027_v51  ;;  %v1572_v51 = vsel %vm5320_vm9, %v1567_v43, %v1571_v55  ;;  %v4438_v57 = vrot.slane %v6240_v42, 9  ;;  %v1910_v21 = vrot.slane %v1908_v28, 5 }
 0x1d5   : > { %v6332_v10 = vpop.permute.xlu0 %2234  ;;  %v2606_v14 = vsel %vm2604_vm3, %v2573_v18, %v6244_v29  ;;  %v4465_v23 = vcombine.low %v1562_v27, %v1572_v51  ;;  %v1548_v44 = vsel %vm5320_vm9, %v1543_v2, %v1547_v8  ;;  %v1901_v18 = vrot.slane %v1899_v32, 4  ;;  %v1350_v51 = vld [vmem:[#allocation2 + $0xc8] sm:$0x1] }
 0x1d6   : > { %v6330_v33 = vpop.permute.xlu1 %2154  ;;  %7690 = vst [vmem:[#allocation27_spill] sm:$0xff] %v6332_v10  ;;  %v2639_v13 = vsel %vm2637_vm5, %v2606_v14, %v6101_v12  ;;  %v1533_v12 = vrot.slane %v1532_v37, 4  ;;  %v1920_v27 = vrot.slane %v1918_v38, 4  ;;  %v1727_v28 = vshll.u32 %v6242_v7, 16 }
 0x1d7   : > { %2370 = vrot.lane.b32.xlu0 %v4481_v46, %s5203_s18  ;;  %4694 = vmatprep.mubr.msk.bf16.mxu1 %vm2713_vm7, %v2639_v13  ;;  %v1916_v13 = vrot.slane %v1914_v34, 5  ;;  %v1731_v38 = vshrl.u32 %v6242_v7, 16 }
 0x1d8   : > { %2162 = vrot.lane.b32.xlu1 %v4480_v56, %s5198_s11  ;;  %v1538_v41 = vsel %vm5320_vm9, %v1533_v12, %v1537_v61  ;;  %v1905_v61 = vshrl.u32 %v6362_v31, 16  ;;  %v1900_v12 = vsel %vm5314_vm6, %v4438_v57, %v1899_v32 }
 0x1d9   : > { %v6348_v16 = vpop.permute.xlu0 %2362  ;;  %v4464_v62 = vcombine.low %v1538_v41, %v1548_v44  ;;  %v1921_v41 = vor.u32 %v1920_v27, %v1916_v13  ;;  %v1924_v44 = vshll.u32 %v1350_v51, 16  ;;  %v1733_v27 = vrot.slane %v1731_v38, 4 }
 0x1da   : > { %v6346_v29 = vpop.permute.xlu1 %2170  ;;  %v1907_v37 = vrot.slane %v1905_v61, 4  ;;  %v1721_v61 = vshll.u32 %v6240_v42, 16 }
 0x1db   : > { %2164 = vrot.lane.b32.xlu0 %v4481_v46, %s5198_s11  ;;  %v6371_v46 = vld [vmem:[#allocation2 + $0xbc] sm:$0x1] }
 0x1dc   : > { %2232 = vrot.lane.b32.xlu1 %v4465_v23, %s5204_s19  ;;  %v1902_v14 = vrot.slane %v6371_v46, 5  ;;  %v1911_v8 = vor.u32 %v1910_v21, %v1907_v37  ;;  %v1926_v37 = vrot.slane %v1924_v44, 5  ;;  %v6416_v21 = vrot.slane %v1727_v28, 5  ;;  %v6431_v28 = vld [vmem:[#allocation2 + $0xcc] sm:$0xf] }
 0x1dd   : > { %v6354_v25 = vpop.permute.xlu0 %2156 }
 0x1de   : > { %v6352_v47 = vpop.permute.xlu1 %2193  ;;  %v1903_v2 = vsel %vm5314_vm6, %v1901_v18, %v1902_v14  ;;  %v1933_v18 = vrot.slane %v6364_v52, 5  ;;  %v1922_v14 = vrot.slane %v1921_v41, 4 }
 0x1df   : > { %7691 = vst [vmem:[#allocation28_spill] sm:$0xff] %v6352_v47  ;;  %2368 = vrot.lane.b32.xlu0 %v4480_v56, %s5203_s18  ;;  %v6406_v57 = vcombine.low %v1900_v12, %v1903_v2 }
 0x1e0   : > { %2084 = vrot.lane.b32.xlu1 %v4465_v23, %s5199_s12  ;;  %v1927_v44 = vsel %vm5320_vm9, %v1922_v14, %v1926_v37 }
 0x1e1   : > { %v6369_v39 = vpop.permute.xlu0 %2378 }
 0x1e2   : > { %v6367_v55 = vpop.permute.xlu1 %2209  ;;  %7693 = vst [vmem:[#allocation30_spill] sm:$0xff] %v6369_v39 }
 0x1e3   : > { %7692 = vst [vmem:[#allocation29_spill] sm:$0xff] %v6367_v55  ;;  %2265 = vrot.lane.b32.xlu0 %v4480_v56, %s5202_s17 }
 0x1e4   : > { %2333 = vrot.lane.b32.xlu1 %v4464_v62, %s5205_s20 }
 0x1e5   : > { %v6382_v35 = vpop.permute.xlu0 %2172 }
 0x1e6   : > { %v6380_v43 = vpop.permute.xlu1 %2224 }
 0x1e7   : > { %2335 = vrot.lane.b32.xlu0 %v4465_v23, %s5205_s20  ;;  %v1718_v23 = vshrl.u32 %v6240_v42, 16  ;;  %v1723_v42 = vrot.slane %v1721_v61, 5  ;;  %v1936_v61 = vrot.slane %v1350_v51, 5 }
 0x1e8   : > { %2082 = vrot.lane.b32.xlu1 %v4464_v62, %s5199_s12 }
 0x1e9   : > { %v6389_v56 = vpop.permute.xlu0 %2360  ;;  %v1720_v7 = vrot.slane %v1718_v23, 4  ;;  %v1935_v23 = vrot.slane %v1933_v18, 4 }
 0x1ea   : > { %v6387_v59 = vpop.permute.xlu1 %2076 }
 0x1eb   : > { %2230 = vrot.lane.b32.xlu0 %v4464_v62, %s5204_s19  ;;  %v1912_v62 = vrot.slane %v1911_v8, 4  ;;  %v4439_v8 = vrot.slane %v6362_v31, 9  ;;  %v1937_v39 = vsel %vm5314_vm6, %v1935_v23, %v1936_v61 }
 0x1ec   : > { %2096 = vrot.lane.b32.xlu1 %v6216_v22, %s5199_s12  ;;  %v2396_v22 = vsel %vm2390_vm14, %v5591_v1, %v6304_v17  ;;  %v4489_v17 = vcombine.low %v6362_v31, %v6364_v52  ;;  %v1939_v52 = vshrl.u32 %v6431_v28, 16 }
 0x1ed   : > { %v6404_v34 = vpop.permute.xlu0 %2257  ;;  %v2443_v12 = vsel %vm2439_vm15, %v2396_v22, %v6127_v53  ;;  %v1917_v41 = vsel %vm5320_vm9, %v1912_v62, %v1916_v13  ;;  %v6436_v53 = vld [vmem:[#allocation2 + $0xd0] sm:$0xf]  ;;  %v1942_v13 = vshll.u32 %v6431_v28, 16  ;;  %v1934_v37 = vsel %vm5314_vm6, %v4439_v8, %v1933_v18 }
 0x1ee   : > { %v6402_v32 = vpop.permute.xlu1 %2240  ;;  %v2476_v31 = vsel %vm2472_vm0, %v2443_v12, %v6029_v5  ;;  %v1952_v38 = vshrl.u32 %v6436_v53, 16  ;;  %v1948_v51 = vshll.u32 %v6436_v53, 16  ;;  %v4490_v14 = vcombine.low %v1917_v41, %v1927_v44 }
 0x1ef   : > { %2382 = vrot.lane.b32.xlu0 %v6129_v63, %s5203_s18  ;;  %v1734_v5 = vor.u32 %v1733_v27, %v6416_v21  ;;  %v1737_v12 = vshll.u32 %v6371_v46, 16  ;;  %v2509_v10 = vsel %vm2505_vm1, %v2476_v31, %v6187_v49  ;;  %v1941_v41 = vrot.slane %v1939_v52, 4 }
 0x1f0   : > { %2178 = vrot.lane.b32.xlu1 %v6406_v57, %s5198_s11  ;;  %v1944_v44 = vrot.slane %v1942_v13, 5  ;;  %v1950_v47 = vrot.slane %v1948_v51, 5  ;;  %v1954_v18 = vrot.slane %v1952_v38, 4  ;;  %v2542_v46 = vsel %vm2538_vm2, %v2509_v10, %v6076_v60 }
 0x1f1   : > { %v6422_v1 = vpop.permute.xlu0 %2376  ;;  %v1735_v23 = vrot.slane %v1734_v5, 4  ;;  %v1739_v61 = vrot.slane %v1737_v12, 5  ;;  %v1967_v12 = vrot.slane %v6436_v53, 5 }
 0x1f2   : > { %v6420_v2 = vpop.permute.xlu1 %2092  ;;  %7694 = vst [vmem:[#allocation31_spill] sm:$0xff] %v6422_v1  ;;  %v1724_v1 = vor.u32 %v1723_v42, %v1720_v7  ;;  %v4491_v7 = vcombine.low %v1934_v37, %v1937_v39  ;;  %v1353_v42 = vld [vmem:[#allocation2 + $0xd4] sm:$0x1]  ;;  %v1945_v49 = vor.u32 %v1944_v44, %v1941_v41  ;;  %v1955_v52 = vor.u32 %v1954_v18, %v1950_v47 }
 0x1f3   : > { %2384 = vrot.lane.b32.xlu0 %v6406_v57, %s5203_s18  ;;  %v1958_v31 = vshll.u32 %v1353_v42, 16  ;;  %v2575_v39 = vsel %vm2571_vm4, %v2542_v46, %v6246_v15  ;;  %v1969_v46 = vrot.slane %v1967_v12, 4 }
 0x1f4   : > { %2213 = vrot.lane.b32.xlu1 %v4489_v17, %s5201_s16  ;;  %v1725_v27 = vrot.slane %v1724_v1, 4  ;;  %v1740_v1 = vsel %vm5320_vm9, %v1735_v23, %v1739_v61  ;;  %v1946_v15 = vrot.slane %v1945_v49, 4  ;;  %v1956_v37 = vrot.slane %v1955_v52, 4 }
 0x1f5   : > { %v6446_v62 = vpop.permute.xlu0 %2273  ;;  %v1960_v5 = vrot.slane %v1958_v31, 5  ;;  %v2399_v49 = vsel %vm2390_vm14, %v5531_v24, %v6200_v19  ;;  %v4899_v24 = vld [vmem:[%s5274_s10] sm:$0xff]  }
 0x1f6   : > { %v6444_v22 = vpop.permute.xlu1 %2294  ;;  %v1730_v10 = vsel %vm5320_vm9, %v1725_v27, %v6416_v21  ;;  %v1970_v27 = vrot.slane %v1353_v42, 5  ;;  %v2445_v19 = vsel %vm2439_vm15, %v2399_v49, %v6125_v45  ;;  %v4900_v45 = vld [vmem:[%s5274_s10 + $0x18] sm:$0xff]  }
 0x1f7   : > { %2176 = vrot.lane.b32.xlu0 %v6129_v63, %s5198_s11  ;;  %v4492_v63 = vcombine.low %v6431_v28, %v6436_v53  ;;  %v4472_v44 = vcombine.low %v1730_v10, %v1740_v1  ;;  %v1961_v18 = vsel %vm5320_vm9, %v1956_v37, %v1960_v5 }
 0x1f8   : > { %2248 = vrot.lane.b32.xlu1 %v4490_v14, %s5204_s19 }
 0x1f9   : > { %v6459_v55 = vpop.permute.xlu0 %2296 }
 0x1fa   : > { %v2311_v8 = vpop.permute.xlu1 %2310 }
 0x1fb   : > { %2211 = vrot.lane.b32.xlu0 %v6250_v50, %s5201_s16 }
 0x1fc   : > { %2283 = vrot.lane.b32.xlu1 %v4491_v7, %s5202_s17 }
 0x1fd   : > { %v6470_v38 = vpop.permute.xlu0 %2312 }
 0x1fe   : > { %v2326_v13 = vpop.permute.xlu1 %2325 }
 0x1ff   : > { %v2608_v60 = vsel %vm2604_vm3, %v2575_v39, %v2326_v13  ;;  %2281 = vrot.lane.b32.xlu0 %v6406_v57, %s5202_s17  ;;  %v1951_v57 = vsel %vm5320_vm9, %v1946_v15, %v1950_v47  ;;  %v4898_v13 = vld [vmem:[%s5274_s10 + $0x8] sm:$0xff]   ;;  %v2478_v39 = vsel %vm2472_vm0, %v2445_v19, %v6271_v20  ;;  %vm3607_vm9 = vcmask 1041409  }
 0x200   : > { %v2641_v51 = vsel %vm2637_vm5, %v2608_v60, %v6389_v56  ;;  %2318 = vrot.lane.b32.xlu1 %v4492_v63, %s5200_s15  ;;  %v4440_v56 = vrot.slane %v6431_v28, 9  ;;  %v4493_v61 = vcombine.low %v1951_v57, %v1961_v18  ;;  %v1971_v28 = vsel %vm5314_vm6, %v1969_v46, %v1970_v27 }
 0x201   : > { %4695 = vmatmul.mubr.msk.bf16.vlgmr.msra.gmra.mxu1 %vm2713_vm7, %v2641_v51  ;;  %v2328_v21 = vpop.permute.xlu0 %2327 }
 0x202   : > { %v6485_v41 = vpop.permute.xlu1 %2074 }
 0x203   : > { %2316 = vrot.lane.b32.xlu0 %v4489_v17, %s5200_s15  ;;  %v1968_v17 = vsel %vm5314_vm6, %v4440_v56, %v1967_v12  ;;  %vm3393_vm6 = vcmask 1045504  }
 0x204   : > { %2349 = vrot.lane.b32.xlu1 %v4472_v44, %s5205_s20 }
 0x205   : > { %v2344_v53 = vpop.permute.xlu0 %2343 }
 0x206   : > { %v6494_v23 = vpop.permute.xlu1 %2341 }
 0x207   : > { %2351 = vrot.lane.b32.xlu0 %v4490_v14, %s5205_s20  ;;  %v4494_v14 = vcombine.low %v1968_v17, %v1971_v28 }
 0x208   : > { %2098 = vrot.lane.b32.xlu1 %v4472_v44, %s5199_s12 }
 0x209   : > { %v6502_v40 = vpop.permute.xlu0 %2191 }
 0x20a   : > { %v2091_v47 = vpop.permute.xlu1 %2090 }
 0x20b   : > { %v2426_v42 = vsel %vm2390_vm14, %v5810_v3, %v2091_v47  ;;  %2246 = vrot.lane.b32.xlu0 %v4472_v44, %s5204_s19 }
 0x20c   : > { %v2463_v63 = vsel %vm2439_vm15, %v2426_v42, %v6346_v29  ;;  %2353 = vrot.lane.b32.xlu1 %v4493_v61, %s5205_s20  ;;  %s5206_s20 = smov 96  }
 0x20d   : > { %v2496_v36 = vsel %vm2472_vm0, %v2463_v63, %v6170_v58  ;;  %v6517_v31 = vpop.permute.xlu0 %2207  ;;  %v7695_v63 = vld [vmem:[#allocation26_spill] sm:$0xff] }
 0x20e   : > { %v6515_v52 = vpop.permute.xlu1 %2263  ;;  %v2529_v3 = vsel %vm2505_vm1, %v2496_v36, %v6402_v32  ;;  %v2423_v32 = vsel %vm2390_vm14, %v5559_v26, %v6230_v0  ;;  %v4901_v0 = vld [vmem:[%s5274_s10 + $0x10] sm:$0xff]  }
 0x20f   : > { %v2562_v29 = vsel %vm2538_vm2, %v2529_v3, %v6317_v9  ;;  %2386 = vrot.lane.b32.xlu0 %v4491_v7, %s5203_s18  ;;  %v2461_v10 = vsel %vm2439_vm15, %v2423_v32, %v6156_v54 }
 0x210   : > { %2388 = vrot.lane.b32.xlu1 %v4494_v14, %s5203_s18  ;;  %v2595_v58 = vsel %vm2571_vm4, %v2562_v29, %v2311_v8  ;;  %v2494_v20 = vsel %vm2472_vm0, %v2461_v10, %v6285_v6 }
 0x211   : > { %v2223_v60 = vpop.permute.xlu0 %2222 }
 0x212   : > { %v6535_v9 = vpop.permute.xlu1 %2279  ;;  %v2511_v7 = vsel %vm2505_vm1, %v2478_v39, %v2223_v60  ;;  %v7697_v39 = vld [vmem:[#allocation5_spill] sm:$0xff] }
 0x213   : > { %v2544_v8 = vsel %vm2538_vm2, %v2511_v7, %v6404_v34  ;;  %3266 = vrot.lane.b32.xlu0 %v4899_v24, %s5199_s12  ;;  %v2429_v60 = vsel %vm2390_vm14, %v7697_v39, %v6420_v2  ;;  %v7707_v39 = vld [vmem:[#allocation6_spill] sm:$0xff] }
 0x214   : > { %3268 = vrot.lane.b32.xlu1 %v4898_v13, %s5199_s12  ;;  %v2577_v26 = vsel %vm2571_vm4, %v2544_v8, %v6212_v11 }
 0x215   : > { %v2239_v51 = vpop.permute.xlu0 %2238  ;;  %v2610_v34 = vsel %vm2604_vm3, %v2577_v26, %v2328_v21 }
 0x216   : > { %v6550_v1 = vpop.permute.xlu1 %2158  ;;  %v2527_v15 = vsel %vm2505_vm1, %v2494_v20, %v2239_v51  ;;  %v2643_v37 = vsel %vm2637_vm5, %v2610_v34, %v6348_v16  ;;  %v7699_v20 = vld [vmem:[#allocation29_spill] sm:$0xff] }
 0x217   : > { %v2560_v54 = vsel %vm2538_vm2, %v2527_v15, %v6446_v62  ;;  %4698 = vmatprep.mubr.msk.bf16.mxu1 %vm2713_vm7, %v2643_v37  ;;  %3270 = vrot.lane.b32.xlu0 %v4901_v0, %s5199_s12 }
 0x218   : > { %3272 = vrot.lane.b32.xlu1 %v4900_v45, %s5199_s12  ;;  %v2593_v11 = vsel %vm2571_vm4, %v2560_v54, %v6228_v48  ;;  %v2402_v48 = vsel %vm2390_vm14, %v5785_v30, %v6485_v41 }
 0x219   : > { %v2367_v5 = vpop.permute.xlu0 %2366  ;;  %v6564_v12 = vsel %vm2604_vm3, %v2593_v11, %v2344_v53  ;;  %v2447_v18 = vsel %vm2439_vm15, %v2402_v48, %v6330_v33  ;;  %v7700_v11 = vld [vmem:[#allocation8_spill] sm:$0xff] }
 0x21a   : > { %v2175_v6 = vpop.permute.xlu1 %2174  ;;  %v2480_v53 = vsel %vm2472_vm0, %v2447_v18, %v6158_v4 }
 0x21b   : > { %v2513_v28 = vsel %vm2505_vm1, %v2480_v53, %v6380_v43  ;;  %v7696_v43 = vld [vmem:[#allocation4_spill] sm:$0xff] }
 0x21c   : > { %v2546_v14 = vsel %vm2538_vm2, %v2513_v28, %v7695_v63  ;;  %v2405_v29 = vsel %vm2390_vm14, %v7696_v43, %v6387_v59  ;;  %v7698_v59 = vld [vmem:[#allocation9_spill] sm:$0xff] }
 0x21d   : > { %v6568_v16 = vpop.permute.xlu0 %2160  ;;  %v2579_v30 = vsel %vm2571_vm4, %v2546_v14, %v6444_v22  ;;  %v2449_v32 = vsel %vm2439_vm15, %v2405_v29, %v6354_v25  ;;  %v2465_v25 = vsel %vm2439_vm15, %v2429_v60, %v6382_v35  ;;  %v7702_v14 = vld [vmem:[#allocation17_spill] sm:$0xff] }
 0x21e   : > { %v6566_v21 = vpop.permute.xlu1 %2197  ;;  %v2482_v7 = vsel %vm2472_vm0, %v2449_v32, %v6502_v40  ;;  %v2498_v51 = vsel %vm2472_vm0, %v2465_v25, %v6517_v31  ;;  %v7704_v29 = vld [vmem:[#allocation25_spill] sm:$0xff]  ;;  %v7706_v32 = vld [vmem:[#allocation27_spill] sm:$0xff] }
 0x221   : > { %v2365_v62 = vpop.permute.xlu0 %2364 }
 0x222   : > { %v2229_v44 = vpop.permute.xlu1 %2228 }
 0x225   : > { %v2262_v57 = vpop.permute.xlu0 %2261 }
 0x226   : > { %v6570_v56 = vpop.permute.xlu1 %2080 }
 0x227   : > { %v2411_v60 = vsel %vm2390_vm14, %v7707_v39, %v6570_v56 }
 0x228   : > { %v2453_v25 = vsel %vm2439_vm15, %v2411_v60, %v6568_v16  ;;  %v4904_v60 = vld [vmem:[%s5274_s10 + $0x38] sm:$0xff]  }
 0x229   : > { %v2381_v27 = vpop.permute.xlu0 %2380 }
 0x22a   : > { %v2245_v46 = vpop.permute.xlu1 %2244 }
 0x22d   : > { %v2278_v17 = vpop.permute.xlu0 %2277 }
 0x22e   : > { %v2299_v61 = vpop.permute.xlu1 %2298 }
 0x231   : > { %v6581_v42 = vpop.permute.xlu0 %2300 }
 0x232   : > { %v2315_v47 = vpop.permute.xlu1 %2314 }
 0x235   : > { %v2332_v41 = vpop.permute.xlu0 %2331 }
 0x236   : > { %v2330_v33 = vpop.permute.xlu1 %2329 }
 0x237   : > { %v2612_v36 = vsel %vm2604_vm3, %v2579_v30, %v2330_v33 }
 0x238   : > { %v2645_v4 = vsel %vm2637_vm5, %v2612_v36, %v2365_v62 }
 0x239   : > { %4699 = vmatmul.mubr.msk.bf16.gmra.mxu1 %vm2713_vm7, %v2645_v4  ;;  %v6590_v3 = vpop.permute.xlu0 %2347 }
 0x23a   : > { %v2079_v49 = vpop.permute.xlu1 %2078 }
 0x23d   : > { %v2196_v24 = vpop.permute.xlu0 %2195 }
 0x23e   : > { %v2346_v13 = vpop.permute.xlu1 %2345  ;;  %v2486_v56 = vsel %vm2472_vm0, %v2453_v25, %v2196_v24  ;;  %v4909_v25 = vld [vmem:[%s5274_s10 + $0x58] sm:$0xff]  }
 0x23f   : > { %v2628_v19 = vsel %vm2604_vm3, %v2595_v58, %v2346_v13  ;;  %v7705_v13 = vld [vmem:[#allocation3_spill] sm:$0xff] }
 0x240   : > { %v6597_v22 = vsel %vm2637_vm5, %v2628_v19, %v2381_v27  ;;  %v7701_v27 = vld [vmem:[#allocation28_spill] sm:$0xff]  ;;  %v2420_v19 = vsel %vm2390_vm14, %v7705_v13, %v7704_v29  ;;  %v4902_v13 = vld [vmem:[%s5274_s10 + $0x28] sm:$0xff]  }
 0x241   : > { %v2227_v45 = vpop.permute.xlu0 %2226  ;;  %3276 = vrot.lane.b32.xlu1 %v4902_v13, %s5199_s12 }
 0x242   : > { %v2095_v8 = vpop.permute.xlu1 %2094  ;;  %v2515_v58 = vsel %vm2505_vm1, %v2482_v7, %v2227_v45 }
 0x243   : > { %v2432_v10 = vsel %vm2390_vm14, %v7698_v59, %v2095_v8  ;;  %v2548_v0 = vsel %vm2538_vm2, %v2515_v58, %v2262_v57  ;;  %v7708_v8 = vld [vmem:[#allocation21_spill] sm:$0xff]  ;;  %v7709_v59 = vld [vmem:[#allocation16_spill] sm:$0xff] }
 0x244   : > { %v2467_v26 = vsel %vm2439_vm15, %v2432_v10, %v2175_v6  ;;  %v2581_v40 = vsel %vm2571_vm4, %v2548_v0, %v6459_v55  ;;  %v2408_v6 = vsel %vm2390_vm14, %v7700_v11, %v2079_v49  ;;  %v2459_v10 = vsel %vm2439_vm15, %v2420_v19, %v7709_v59  ;;  %v4903_v19 = vld [vmem:[%s5274_s10 + $0x20] sm:$0xff]  }
 0x245   : > { %v2500_v2 = vsel %vm2472_vm0, %v2467_v26, %v7699_v20  ;;  %v2243_v15 = vpop.permute.xlu0 %2242  ;;  %v2614_v37 = vsel %vm2604_vm3, %v2581_v40, %v2332_v41  ;;  %v2451_v48 = vsel %vm2439_vm15, %v2408_v6, %v6550_v1  ;;  %v7703_v1 = vld [vmem:[#allocation13_spill] sm:$0xff]  ;;  %v7710_v26 = vld [vmem:[#allocation19_spill] sm:$0xff]  ;;  %v7712_v6 = vld [vmem:[#allocation10_spill] sm:$0xff]  ;;  %3274 = vrot.lane.b32.xlu0 %v4903_v19, %s5199_s12  ;;  %3280 = vrot.lane.b32.xlu1 %v4904_v60, %s5199_s12 }
 0x246   : > { %v2268_v34 = vpop.permute.xlu1 %2267  ;;  %v2533_v54 = vsel %vm2505_vm1, %v2500_v2, %v2245_v46  ;;  %v2531_v35 = vsel %vm2505_vm1, %v2498_v51, %v2243_v15  ;;  %v2647_v62 = vsel %vm2637_vm5, %v2614_v37, %v2367_v5  ;;  %v2484_v53 = vsel %vm2472_vm0, %v2451_v48, %v7701_v27  ;;  %v7711_v15 = vld [vmem:[#allocation11_spill] sm:$0xff] }
 0x247   : > { %v2566_v57 = vsel %vm2538_vm2, %v2533_v54, %v6535_v9  ;;  %v6628_v55 = vsel %vm2538_vm2, %v2531_v35, %v2278_v17  ;;  %4702 = vmatprep.mubr.msk.bf16.mxu1 %vm2713_vm7, %v2647_v62  ;;  %v2517_v9 = vsel %vm2505_vm1, %v2484_v53, %v2229_v44  ;;  %v2492_v37 = vsel %vm2472_vm0, %v2459_v10, %v7711_v15  ;;  %v4906_v10 = vld [vmem:[%s5274_s10 + $0x48] sm:$0xff]   ;;  %v4912_v15 = vld [vmem:[%s5274_s10 + $0x60] sm:$0xff]  }
 0x248   : > { %v6632_v31 = vsel %vm2571_vm4, %v2566_v57, %v2315_v47  ;;  %v2550_v47 = vsel %vm2538_vm2, %v2517_v9, %v6515_v52  ;;  %v7714_v57 = vld [vmem:[#allocation24_spill] sm:$0xff] }
 0x249   : > { %v2371_v46 = vpop.permute.xlu0 %2370  ;;  %v2583_v36 = vsel %vm2571_vm4, %v2550_v47, %v2299_v61  ;;  %v7719_v47 = vld [vmem:[#allocation15_spill] sm:$0xff]  ;;  %3284 = vrot.lane.b32.xlu1 %v4906_v10, %s5199_s12 }
 0x24a   : > { %v2163_v18 = vpop.permute.xlu1 %2162 }
 0x24d   : > { %v2165_v28 = vpop.permute.xlu0 %2164  ;;  %3288 = vrot.lane.b32.xlu1 %v4909_v25, %s5199_s12 }
 0x24e   : > { %v2233_v5 = vpop.permute.xlu1 %2232 }
 0x251   : > { %v2369_v17 = vpop.permute.xlu0 %2368 }
 0x252   : > { %v2085_v63 = vpop.permute.xlu1 %2084 }
 0x253   : > { %v2417_v30 = vsel %vm2390_vm14, %v7702_v14, %v2085_v63  ;;  %v7718_v14 = vld [vmem:[#allocation14_spill] sm:$0xff] }
 0x254   : > { %v2457_v33 = vsel %vm2439_vm15, %v2417_v30, %v2165_v28  ;;  %v7716_v28 = vld [vmem:[#allocation22_spill] sm:$0xff] }
 0x255   : > { %v2490_v41 = vsel %vm2472_vm0, %v2457_v33, %v7703_v1  ;;  %v2266_v49 = vpop.permute.xlu0 %2265 }
 0x256   : > { %v2334_v4 = vpop.permute.xlu1 %2333  ;;  %v2523_v52 = vsel %vm2505_vm1, %v2490_v41, %v7706_v32  ;;  %v7722_v32 = vld [vmem:[#allocation30_spill] sm:$0xff] }
 0x257   : > { %v2616_v43 = vsel %vm2604_vm3, %v2583_v36, %v2334_v4  ;;  %v2556_v0 = vsel %vm2538_vm2, %v2523_v52, %v7710_v26  ;;  %v7720_v36 = vld [vmem:[#allocation23_spill] sm:$0xff]  ;;  %v2659_v52 = vsel %vm2637_vm5, %v6564_v12, %v7722_v32  ;;  %v2597_v12 = vsel %vm2571_vm4, %v6628_v55, %v6470_v38 }
 0x258   : > { %v2649_v44 = vsel %vm2637_vm5, %v2616_v43, %v2369_v17  ;;  %v2589_v16 = vsel %vm2571_vm4, %v2556_v0, %v7712_v6  ;;  %v2630_v26 = vsel %vm2604_vm3, %v2597_v12, %v6590_v3 }
 0x259   : > { %4703 = vmatmul.mubr.msk.bf16.gmra.mxu1 %vm2713_vm7, %v2649_v44  ;;  %v2336_v7 = vpop.permute.xlu0 %2335  ;;  %v2622_v9 = vsel %vm2604_vm3, %v2589_v16, %v7716_v28  ;;  %v7721_v44 = vld [vmem:[#allocation31_spill] sm:$0xff] }
 0x25a   : > { %v2083_v61 = vpop.permute.xlu1 %2082  ;;  %v2655_v33 = vsel %vm2637_vm5, %v2622_v9, %v7719_v47 }
 0x25b   : > { %v2414_v45 = vsel %vm2390_vm14, %v7708_v8, %v2083_v61  ;;  %v4908_v61 = vld [vmem:[%s7646_s5] sm:$0x3f]  }
 0x25c   : > { %v2455_v58 = vsel %vm2439_vm15, %v2414_v45, %v2163_v18  ;;  %v7715_v18 = vld [vmem:[#allocation20_spill] sm:$0xff]  ;;  %4765 = vmatprep.subr.msk.bf16.mxu0 %vm3393_vm6, %v4908_v61  ;;  %v3395_v8 = vsel %vm3393_vm6, %v4908_v61, 0 }
 0x25d   : > { %v2488_v20 = vsel %vm2472_vm0, %v2455_v58, %v6566_v21  ;;  %v2231_v51 = vpop.permute.xlu0 %2230  ;;  %v7713_v21 = vld [vmem:[#allocation12_spill] sm:$0xff]  ;;  %v2525_v27 = vsel %vm2505_vm1, %v2492_v37, %v7715_v18  ;;  %4727 = vmatpush3.bf16.msra.mxu0 %v3395_v8  ;;  %v7723_v37 = vld [vmem:[#allocation7_spill] sm:$0xff] }
 0x25e   : > { %v2521_v2 = vsel %vm2505_vm1, %v2488_v20, %v2233_v5  ;;  %v6671_v40 = vpop.permute.xlu1 %2096  ;;  %v2519_v54 = vsel %vm2505_vm1, %v2486_v56, %v2231_v51  ;;  %v2558_v30 = vsel %vm2538_vm2, %v2525_v27, %v7718_v14  ;;  %v4907_v58 = vld [vmem:[%s5274_s10 + $0x40] sm:$0xff]   ;;  %v4910_v20 = vld [vmem:[%s5274_s10 + $0x50] sm:$0xff]   ;;  %v4911_v51 = vld [vmem:[%s5274_s10 + $0x68] sm:$0xff]  }
 0x25f   : > { %v2554_v11 = vsel %vm2538_vm2, %v2521_v2, %v2268_v34  ;;  %v2552_v35 = vsel %vm2538_vm2, %v2519_v54, %v2266_v49  ;;  %v2435_v54 = vsel %vm2390_vm14, %v7723_v37, %v6671_v40  ;;  %3292 = vrot.lane.b32.xlu1 %v4911_v51, %s5199_s12 }
 0x260   : > { %v2587_v24 = vsel %vm2571_vm4, %v2554_v11, %v7713_v21  ;;  %v2585_v62 = vsel %vm2571_vm4, %v2552_v35, %v6581_v42  ;;  %v7717_v42 = vld [vmem:[#allocation18_spill] sm:$0xff] }
 0x261   : > { %v2620_v48 = vsel %vm2604_vm3, %v2587_v24, %v7714_v57  ;;  %v2383_v5 = vpop.permute.xlu0 %2382  ;;  %v2618_v34 = vsel %vm2604_vm3, %v2585_v62, %v2336_v7  ;;  %v4905_v7 = vld [vmem:[%s5274_s10 + $0x30] sm:$0xff]  }
 0x262   : > { %v2179_v53 = vpop.permute.xlu1 %2178  ;;  %v2651_v63 = vsel %vm2637_vm5, %v2618_v34, %v2371_v46  ;;  %v2653_v17 = vsel %vm2637_vm5, %v2620_v48, %v7717_v42  ;;  %v2591_v46 = vsel %vm2571_vm4, %v2558_v30, %v7720_v36  ;;  %3278 = vrot.lane.b32.xlu0 %v4905_v7, %s5199_s12  ;;  %v2663_v0 = vsel %vm2637_vm5, %v2630_v26, %v2383_v5  ;;  %v4914_v42 = vld [vmem:[%s5274_s10 + $0x70] sm:$0xff]  }
 0x263   : > { %4706 = vmatprep.mubr.msk.bf16.mxu1 %vm2713_vm7, %v2651_v63  ;;  %v2624_v4 = vsel %vm2604_vm3, %v2591_v46, %v6494_v23  ;;  %v4913_v63 = vld [vmem:[%s5274_s10 + $0x78] sm:$0xff]  }
 0x264   : > { %4707 = vmatmul.mubr.msk.bf16.gmra.mxu1 %vm2713_vm7, %v2653_v17  ;;  %v2657_v29 = vsel %vm2637_vm5, %v2624_v4, %v7721_v44  ;;  %3296 = vrot.lane.b32.xlu1 %v4913_v63, %s5199_s12  ;;  %v6776_v17 = vld [vmem:[%s7645_s4] ss:$0 sm:$0xff] }
 0x265   : > { %4710 = vmatprep.mubr.msk.bf16.mxu1 %vm2713_vm7, %v2655_v33  ;;  %v2385_v41 = vpop.permute.xlu0 %2384 }
 0x266   : > { %v2214_v1 = vpop.permute.xlu1 %2213  ;;  %3282 = vrot.lane.b32.xlu0 %v4907_v58, %s5199_s12 }
 0x269   : > { %v2177_v43 = vpop.permute.xlu0 %2176 }
 0x26a   : > { %v2249_v49 = vpop.permute.xlu1 %2248  ;;  %3286 = vrot.lane.b32.xlu0 %v4910_v20, %s5199_s12 }
 0x26c   : > { %4711 = vmatmul.mubr.msk.bf16.gmra.mxu1 %vm2713_vm7, %v2657_v29 }
 0x26d   : > { %4714 = vmatprep.mubr.msk.bf16.mxu1 %vm2713_vm7, %v2659_v52  ;;  %v2212_v23 = vpop.permute.xlu0 %2211 }
 0x26e   : > { %v2284_v39 = vpop.permute.xlu1 %2283  ;;  %3290 = vrot.lane.b32.xlu0 %v4912_v15, %s5199_s12 }
 0x271   : > { %v2282_v59 = vpop.permute.xlu0 %2281 }
 0x272   : > { %v2319_v45 = vpop.permute.xlu1 %2318  ;;  %3294 = vrot.lane.b32.xlu0 %v4914_v42, %s5199_s12 }
 0x274   : > { %4715 = vmatmul.mubr.msk.bf16.gmra.mxu1 %vm2713_vm7, %v6597_v22 }
 0x275   : > { %4718 = vmatprep.mubr.msk.bf16.mxu1 %vm2713_vm7, %v2663_v0  ;;  %v2317_v55 = vpop.permute.xlu0 %2316 }
 0x276   : > { %v2350_v38 = vpop.permute.xlu1 %2349 }
 0x277   : > { %v2632_v56 = vsel %vm2604_vm3, %v6632_v31, %v2350_v38  ;;  %v2469_v31 = vsel %vm2439_vm15, %v2435_v54, %v2177_v43 }
 0x278   : > { %v2665_v6 = vsel %vm2637_vm5, %v2632_v56, %v2385_v41  ;;  %v2502_v35 = vsel %vm2472_vm0, %v2469_v31, %v2212_v23 }
 0x279   : > { %v2352_v2 = vpop.permute.xlu0 %2351 }
 0x27a   : > { %v2099_v3 = vpop.permute.xlu1 %2098 }
 0x27b   : > { %v2438_v22 = vsel %vm2390_vm14, %v6250_v50, %v2099_v3 }
 0x27c   : > { %v2471_v11 = vsel %vm2439_vm15, %v2438_v22, %v2179_v53  ;;  %4719 = vmatmul.mubr.msk.bf16.gmra.mxu1 %vm2713_vm7, %v2665_v6  ;;  %vm3625_vm15 = vcmask 1047559  }
 0x27d   : > { %v2504_v16 = vsel %vm2472_vm0, %v2471_v11, %v2214_v1  ;;  %v2247_v24 = vpop.permute.xlu0 %2246  ;;  %vm4161_vm0 = vcmask 785408  }
 0x27e   : > { %v2537_v50 = vsel %vm2505_vm1, %v2504_v16, %v2249_v49  ;;  %v2354_v21 = vpop.permute.xlu1 %2353  ;;  %v2535_v62 = vsel %vm2505_vm1, %v2502_v35, %v2247_v24 }
 0x27f   : > { %v2570_v40 = vsel %vm2538_vm2, %v2537_v50, %v2284_v39  ;;  %v2568_v48 = vsel %vm2538_vm2, %v2535_v62, %v2282_v59 }
 0x280   : > { %v2603_v57 = vsel %vm2571_vm4, %v2570_v40, %v2319_v45  ;;  %v2601_v27 = vsel %vm2571_vm4, %v2568_v48, %v2317_v55 }
 0x281   : > { %v2636_v18 = vsel %vm2604_vm3, %v2603_v57, %v2354_v21  ;;  %v2634_v5 = vsel %vm2604_vm3, %v2601_v27, %v2352_v2  ;;  %v2387_v34 = vpop.permute.xlu0 %2386 }
 0x282   : > { %v2389_v53 = vpop.permute.xlu1 %2388  ;;  %v2667_v9 = vsel %vm2637_vm5, %v2634_v5, %v2387_v34 }
 0x283   : > { %v2669_v28 = vsel %vm2637_vm5, %v2636_v18, %v2389_v53  ;;  %4722 = vmatprep.mubr.msk.bf16.mxu1 %vm2713_vm7, %v2667_v9 }
 0x284   : > { %4723 = vmatmul.mubr.msk.bf16.gmra.mxu1 %vm2713_vm7, %v2669_v28 }
 0x285   : > { %v3267_v0 = vpop.permute.xlu0 %3266 }
 0x286   : > { %v3269_v55 = vpop.permute.xlu1 %3268 }
 0x2c1   : > { %v4696_v14 = vpop.f32.mrf.mxu1 }
 0x2c2   : > { %v2793_v30 = vadd.f32 %v4696_v14, %v6776_v17 }
 0x2c3   : > { %v2784_v47 = vpop.f32.mrf.mxu1 }
 0x2c4   : > { %v4519_v33 = vmul.f32 -1.442695, %v2793_v30  ;;  %v2785_v1 = vadd.f32 %v6776_v17, %v2784_v47 }
 0x2c5   : > { %v4697_v41 = vpop.f32.mrf.mxu1 }
 0x2c6   : > { %5043 = vpow2.f32 %v4519_v33  ;;  %v4517_v36 = vmul.f32 -1.442695, %v2785_v1  ;;  %v2796_v46 = vadd.f32 %v4697_v41, %v6776_v17 }
 0x2c7   : > { %v2787_v4 = vpop.f32.mrf.mxu1 }
 0x2c8   : > { %5045 = vpow2.f32 %v4517_v36  ;;  %v4520_v49 = vmul.f32 -1.442695, %v2796_v46  ;;  %v2788_v43 = vadd.f32 %v6776_v17, %v2787_v4 }
 0x2ca   : > { %5047 = vpow2.f32 %v4520_v49  ;;  %v4518_v44 = vmul.f32 -1.442695, %v2788_v43 }
 0x2cc   : > { %5049 = vpow2.f32 %v4518_v44 }
 0x2d3   : > { %v5044_v29 = vpop.eup %5043 }
 0x2d4   : > { %v3009_v13 = vadd.f32 1.0, %v5044_v29  ;;  %v3271_v29 = vpop.permute.xlu0 %3270 }
 0x2d5   : > { %v5046_v19 = vpop.eup %5045 }
 0x2d6   : > { %v3007_v32 = vadd.f32 1.0, %v5046_v19  ;;  %5051 = vrcp.f32 %v3009_v13  ;;  %v3273_v19 = vpop.permute.xlu1 %3272 }
 0x2d7   : > { %v5048_v52 = vpop.eup %5047 }
 0x2d8   : > { %v3010_v39 = vadd.f32 1.0, %v5048_v52  ;;  %5053 = vrcp.f32 %v3007_v32 }
 0x2d9   : > { %v5050_v23 = vpop.eup %5049 }
 0x2da   : > { %5055 = vrcp.f32 %v3010_v39  ;;  %v3008_v60 = vadd.f32 1.0, %v5050_v23 }
 0x2dc   : > { %5057 = vrcp.f32 %v3008_v60 }
 0x2e3   : > { %v5052_v61 = vpop.eup %5051 }
 0x2e4   : > { %v3105_v59 = vmul.f32 %v5052_v61, %v2793_v30 }
 0x2e5   : > { %v5054_v7 = vpop.eup %5053 }
 0x2e6   : > { %v3103_v10 = vmul.f32 %v5054_v7, %v2785_v1 }
 0x2e7   : > { %v5056_v8 = vpop.eup %5055 }
 0x2e8   : > { %v3106_v12 = vmul.f32 %v5056_v8, %v2796_v46 }
 0x2e9   : > { %v5058_v45 = vpop.eup %5057 }
 0x2ea   : > { %v3104_v58 = vmul.f32 %v5058_v45, %v2788_v43  ;;  %v3136_v26 = vpack.c.bf16 %v3106_v12, %v3105_v59 }
 0x2ec   : > { %v3135_v38 = vpack.c.bf16 %v3104_v58, %v3103_v10  ;;  %v3303_v20 = vsel %vm2390_vm14, %v3136_v26, %v3269_v55 }
 0x2ee   : > { %v3300_v25 = vsel %vm2390_vm14, %v3135_v38, %v3267_v0 }
 0x2ef   : > { %4728 = vmatprep.mubr.msk.bf16.mxu0 %vm3360_vm8, %v3300_v25 }
 0x2f0   : > { %4729 = vmatmul.mubr.msk.bf16.vlgmr.msra.gmra.mxu0 %vm3360_vm8, %v3303_v20 }
 0x2f9   : > { %v4700_v56 = vpop.f32.mrf.mxu1 }
 0x2fa   : > { %v2809_v3 = vadd.f32 %v4700_v56, %v6776_v17 }
 0x2fb   : > { %v2800_v2 = vpop.f32.mrf.mxu1 }
 0x2fc   : > { %v4523_v51 = vmul.f32 -1.442695, %v2809_v3  ;;  %v2801_v22 = vadd.f32 %v6776_v17, %v2800_v2 }
 0x2fd   : > { %v4701_v15 = vpop.f32.mrf.mxu1 }
 0x2fe   : > { %5059 = vpow2.f32 %v4523_v51  ;;  %v4521_v37 = vmul.f32 -1.442695, %v2801_v22  ;;  %v2812_v54 = vadd.f32 %v4701_v15, %v6776_v17 }
 0x2ff   : > { %v2803_v11 = vpop.f32.mrf.mxu1 }
 0x300   : > { %5061 = vpow2.f32 %v4521_v37  ;;  %v4524_v6 = vmul.f32 -1.442695, %v2812_v54  ;;  %v2804_v31 = vadd.f32 %v6776_v17, %v2803_v11 }
 0x302   : > { %5063 = vpow2.f32 %v4524_v6  ;;  %v4522_v16 = vmul.f32 -1.442695, %v2804_v31 }
 0x304   : > { %5065 = vpow2.f32 %v4522_v16 }
 0x30b   : > { %v5060_v35 = vpop.eup %5059 }
 0x30c   : > { %v3013_v50 = vadd.f32 1.0, %v5060_v35 }
 0x30d   : > { %v5062_v21 = vpop.eup %5061 }
 0x30e   : > { %v3011_v24 = vadd.f32 1.0, %v5062_v21  ;;  %5067 = vrcp.f32 %v3013_v50 }
 0x30f   : > { %v5064_v40 = vpop.eup %5063 }
 0x310   : > { %v3014_v62 = vadd.f32 1.0, %v5064_v40  ;;  %5069 = vrcp.f32 %v3011_v24 }
 0x311   : > { %v5066_v57 = vpop.eup %5065 }
 0x312   : > { %5071 = vrcp.f32 %v3014_v62  ;;  %v3012_v48 = vadd.f32 1.0, %v5066_v57 }
 0x314   : > { %5073 = vrcp.f32 %v3012_v48 }
 0x319   : > { %v4704_v18 = vpop.f32.mrf.mxu1 }
 0x31a   : > { %v6791_v27 = vadd.f32 %v4704_v18, %v6776_v17 }
 0x31b   : > { %v2816_v53 = vpop.f32.mrf.mxu1  ;;  %v5068_v28 = vpop.eup %5067 }
 0x31c   : > { %v4527_v5 = vmul.f32 -1.442695, %v6791_v27  ;;  %v6795_v34 = vadd.f32 %v6776_v17, %v2816_v53  ;;  %v3109_v46 = vmul.f32 %v5068_v28, %v2809_v3 }
 0x31d   : > { %v4705_v9 = vpop.f32.mrf.mxu1  ;;  %v5070_v63 = vpop.eup %5069 }
 0x31e   : > { %5075 = vpow2.f32 %v4527_v5  ;;  %v4525_v42 = vmul.f32 -1.442695, %v6795_v34  ;;  %v6799_v14 = vadd.f32 %v4705_v9, %v6776_v17  ;;  %v3107_v4 = vmul.f32 %v5070_v63, %v2801_v22 }
 0x31f   : > { %v5072_v30 = vpop.eup %5071  ;;  %v2819_v47 = vpop.f32.mrf.mxu1 }
 0x320   : > { %v3110_v33 = vmul.f32 %v5072_v30, %v2812_v54  ;;  %5077 = vpow2.f32 %v4525_v42  ;;  %v4528_v1 = vmul.f32 -1.442695, %v6799_v14  ;;  %v6803_v41 = vadd.f32 %v6776_v17, %v2819_v47 }
 0x321   : > { %v5074_v36 = vpop.eup %5073 }
 0x322   : > { %v3108_v49 = vmul.f32 %v5074_v36, %v2804_v31  ;;  %5079 = vpow2.f32 %v4528_v1  ;;  %v4526_v43 = vmul.f32 -1.442695, %v6803_v41  ;;  %v3138_v44 = vpack.c.bf16 %v3110_v33, %v3109_v46 }
 0x324   : > { %v3137_v13 = vpack.c.bf16 %v3108_v49, %v3107_v4  ;;  %5081 = vpow2.f32 %v4526_v43  ;;  %v4708_v32 = vpop.f32.mrf.mxu1  ;;  %v3309_v23 = vsel %vm2390_vm14, %v3138_v44, %v3273_v19 }
 0x325   : > { %v6807_v52 = vadd.f32 %v4708_v32, %v6776_v17 }
 0x326   : > { %v3306_v39 = vsel %vm2390_vm14, %v3137_v13, %v3271_v29  ;;  %v2832_v60 = vpop.f32.mrf.mxu1 }
 0x327   : > { %4732 = vmatprep.mubr.msk.bf16.mxu0 %vm3360_vm8, %v3306_v39  ;;  %v4531_v61 = vmul.f32 -1.442695, %v6807_v52  ;;  %v6814_v7 = vadd.f32 %v6776_v17, %v2832_v60 }
 0x328   : > { %4733 = vmatmul.mubr.msk.bf16.gmra.mxu0 %vm3360_vm8, %v3309_v23  ;;  %v4709_v8 = vpop.f32.mrf.mxu1 }
 0x329   : > { %5083 = vpow2.f32 %v4531_v61  ;;  %v4529_v12 = vmul.f32 -1.442695, %v6814_v7  ;;  %v6819_v45 = vadd.f32 %v4709_v8, %v6776_v17 }
 0x32a   : > { %v2835_v10 = vpop.f32.mrf.mxu1 }
 0x32b   : > { %v5076_v59 = vpop.eup %5075  ;;  %5085 = vpow2.f32 %v4529_v12  ;;  %v4532_v26 = vmul.f32 -1.442695, %v6819_v45  ;;  %v6823_v0 = vadd.f32 %v6776_v17, %v2835_v10 }
 0x32c   : > { %v3017_v58 = vadd.f32 1.0, %v5076_v59  ;;  %v4712_v55 = vpop.f32.mrf.mxu1 }
 0x32d   : > { %v5078_v38 = vpop.eup %5077  ;;  %v4530_v20 = vmul.f32 -1.442695, %v6823_v0  ;;  %v6827_v56 = vadd.f32 %v4712_v55, %v6776_v17 }
 0x32e   : > { %5087 = vrcp.f32 %v3017_v58  ;;  %v3015_v25 = vadd.f32 1.0, %v5078_v38  ;;  %v2848_v2 = vpop.f32.mrf.mxu1 }
 0x32f   : > { %v5080_v3 = vpop.eup %5079  ;;  %5089 = vpow2.f32 %v4532_v26  ;;  %v4535_v22 = vmul.f32 -1.442695, %v6827_v56  ;;  %v6831_v15 = vadd.f32 %v6776_v17, %v2848_v2 }
 0x330   : > { %5091 = vrcp.f32 %v3015_v25  ;;  %v3018_v51 = vadd.f32 1.0, %v5080_v3  ;;  %v4713_v54 = vpop.f32.mrf.mxu1 }
 0x331   : > { %v5082_v37 = vpop.eup %5081  ;;  %5093 = vpow2.f32 %v4530_v20  ;;  %v4533_v6 = vmul.f32 -1.442695, %v6831_v15  ;;  %v6835_v31 = vadd.f32 %v4713_v54, %v6776_v17 }
 0x332   : > { %5095 = vrcp.f32 %v3018_v51  ;;  %v3016_v11 = vadd.f32 1.0, %v5082_v37  ;;  %v2851_v16 = vpop.f32.mrf.mxu1  ;;  %v3277_v37 = vpop.permute.xlu1 %3276 }
 0x333   : > { %5097 = vpow2.f32 %v4535_v22  ;;  %v4536_v35 = vmul.f32 -1.442695, %v6835_v31  ;;  %v6839_v50 = vadd.f32 %v6776_v17, %v2851_v16 }
 0x334   : > { %5099 = vrcp.f32 %v3016_v11  ;;  %v4716_v21 = vpop.f32.mrf.mxu1 }
 0x335   : > { %5101 = vpow2.f32 %v4533_v6  ;;  %v4534_v24 = vmul.f32 -1.442695, %v6839_v50  ;;  %v6843_v40 = vadd.f32 %v4716_v21, %v6776_v17 }
 0x336   : > { %5103 = vpow2.f32 %v4536_v35  ;;  %v5084_v62 = vpop.eup %5083  ;;  %v2864_v57 = vpop.f32.mrf.mxu1 }
 0x337   : > { %v3021_v48 = vadd.f32 1.0, %v5084_v62  ;;  %5105 = vpow2.f32 %v4534_v24  ;;  %v4539_v18 = vmul.f32 -1.442695, %v6843_v40  ;;  %v6847_v53 = vadd.f32 %v6776_v17, %v2864_v57 }
 0x338   : > { %v5086_v5 = vpop.eup %5085  ;;  %v4717_v28 = vpop.f32.mrf.mxu1 }
 0x339   : > { %5107 = vrcp.f32 %v3021_v48  ;;  %v3019_v9 = vadd.f32 1.0, %v5086_v5  ;;  %v4537_v63 = vmul.f32 -1.442695, %v6847_v53  ;;  %v6851_v42 = vadd.f32 %v4717_v28, %v6776_v17 }
 0x33a   : > { %5109 = vpow2.f32 %v4539_v18  ;;  %v2867_v47 = vpop.f32.mrf.mxu1 }
 0x33b   : > { %v5088_v30 = vpop.eup %5087  ;;  %5111 = vrcp.f32 %v3019_v9  ;;  %v4540_v1 = vmul.f32 -1.442695, %v6851_v42  ;;  %v6855_v36 = vadd.f32 %v6776_v17, %v2867_v47 }
 0x33c   : > { %v5090_v33 = vpop.eup %5089  ;;  %5113 = vpow2.f32 %v4537_v63  ;;  %v4720_v49 = vpop.f32.mrf.mxu1  ;;  %v3113_v12 = vmul.f32 %v5088_v30, %v6791_v27 }
 0x33d   : > { %v5092_v46 = vpop.eup %5091  ;;  %v3022_v4 = vadd.f32 1.0, %v5090_v33  ;;  %5115 = vpow2.f32 %v4540_v1  ;;  %v4538_v44 = vmul.f32 -1.442695, %v6855_v36  ;;  %v6859_v29 = vadd.f32 %v4720_v49, %v6776_v17  ;;  %v3275_v27 = vpop.permute.xlu0 %3274 }
 0x33e   : > { %v5094_v43 = vpop.eup %5093  ;;  %v2880_v32 = vpop.f32.mrf.mxu1  ;;  %v3111_v26 = vmul.f32 %v5092_v46, %v6795_v34 }
 0x33f   : > { %v5096_v13 = vpop.eup %5095  ;;  %5117 = vrcp.f32 %v3022_v4  ;;  %v3020_v19 = vadd.f32 1.0, %v5094_v43  ;;  %v4543_v60 = vmul.f32 -1.442695, %v6859_v29  ;;  %v6864_v61 = vadd.f32 %v6776_v17, %v2880_v32 }
 0x340   : > { %v5098_v39 = vpop.eup %5097  ;;  %v3114_v23 = vmul.f32 %v5096_v13, %v6799_v14  ;;  %5119 = vpow2.f32 %v4538_v44  ;;  %v4721_v10 = vpop.f32.mrf.mxu1 }
 0x341   : > { %v5100_v8 = vpop.eup %5099  ;;  %5121 = vrcp.f32 %v3020_v19  ;;  %v3025_v59 = vadd.f32 1.0, %v5098_v39  ;;  %v4541_v14 = vmul.f32 -1.442695, %v6864_v61  ;;  %v6871_v3 = vadd.f32 %v4721_v10, %v6776_v17 }
 0x342   : > { %v5102_v58 = vpop.eup %5101  ;;  %v3112_v38 = vmul.f32 %v5100_v8, %v6803_v41  ;;  %5123 = vpow2.f32 %v4543_v60  ;;  %v3140_v25 = vpack.c.bf16 %v3114_v23, %v3113_v12  ;;  %v2883_v2 = vpop.f32.mrf.mxu1 }
 0x343   : > { %v5104_v55 = vpop.eup %5103  ;;  %5125 = vrcp.f32 %v3025_v59  ;;  %v3023_v20 = vadd.f32 1.0, %v5102_v58  ;;  %v4544_v34 = vmul.f32 -1.442695, %v6871_v3  ;;  %v6875_v41 = vadd.f32 %v6776_v17, %v2883_v2 }
 0x344   : > { %v3139_v51 = vpack.c.bf16 %v3112_v38, %v3111_v26  ;;  %v3026_v22 = vadd.f32 1.0, %v5104_v55  ;;  %5127 = vpow2.f32 %v4541_v14  ;;  %v5106_v54 = vpop.eup %5105  ;;  %v4724_v11 = vpop.f32.mrf.mxu1  ;;  %v3315_v24 = vsel %vm2390_vm14, %v3140_v25, %v3277_v37 }
 0x345   : > { %5129 = vrcp.f32 %v3023_v20  ;;  %v3024_v6 = vadd.f32 1.0, %v5106_v54  ;;  %v6878_v16 = vadd.f32 %v4724_v11, %v6776_v17  ;;  %v4542_v62 = vmul.f32 -1.442695, %v6875_v41  ;;  %v3279_v26 = vpop.permute.xlu0 %3278  ;;  %v3281_v55 = vpop.permute.xlu1 %3280 }
 0x346   : > { %5131 = vrcp.f32 %v3026_v22  ;;  %v3312_v35 = vsel %vm2390_vm14, %v3139_v51, %v3275_v27  ;;  %v5108_v21 = vpop.eup %5107  ;;  %v2896_v57 = vpop.f32.mrf.mxu1 }
 0x347   : > { %5133 = vpow2.f32 %v4544_v34  ;;  %4736 = vmatprep.mubr.msk.bf16.mxu0 %vm3360_vm8, %v3312_v35  ;;  %v5110_v48 = vpop.eup %5109  ;;  %v4547_v18 = vmul.f32 -1.442695, %v6878_v16  ;;  %v6886_v5 = vadd.f32 %v6776_v17, %v2896_v57  ;;  %v3117_v23 = vmul.f32 %v5108_v21, %v6807_v52 }
 0x348   : > { %5135 = vrcp.f32 %v3024_v6  ;;  %4737 = vmatmul.mubr.msk.bf16.gmra.mxu0 %vm3360_vm8, %v3315_v24  ;;  %v5112_v28 = vpop.eup %5111  ;;  %v3029_v9 = vadd.f32 1.0, %v5110_v48  ;;  %v4725_v63 = vpop.f32.mrf.mxu1 }
 0x349   : > { %5137 = vpow2.f32 %v4542_v62  ;;  %v5114_v30 = vpop.eup %5113  ;;  %v4545_v47 = vmul.f32 -1.442695, %v6886_v5  ;;  %v6891_v33 = vadd.f32 %v4725_v63, %v6776_v17  ;;  %v3115_v59 = vmul.f32 %v5112_v28, %v6814_v7  ;;  %v3283_v35 = vpop.permute.xlu0 %3282 }
 0x34a   : > { %5139 = vpow2.f32 %v4547_v18  ;;  %v5116_v1 = vpop.eup %5115  ;;  %v3027_v46 = vadd.f32 1.0, %v5114_v30  ;;  %v2899_v4 = vpop.f32.mrf.mxu1 }
 0x34b   : > { %5141 = vrcp.f32 %v3029_v9  ;;  %v3030_v43 = vadd.f32 1.0, %v5116_v1  ;;  %v4548_v44 = vmul.f32 -1.442695, %v6891_v33  ;;  %v6895_v13 = vadd.f32 %v6776_v17, %v2899_v4  ;;  %v3285_v18 = vpop.permute.xlu1 %3284 }
 0x34c   : > { %v5118_v49 = vpop.eup %5117  ;;  %5143 = vpow2.f32 %v4545_v47 }
 0x34d   : > { %v5120_v19 = vpop.eup %5119  ;;  %v3118_v32 = vmul.f32 %v5118_v49, %v6819_v45  ;;  %5145 = vrcp.f32 %v3027_v46  ;;  %v4546_v8 = vmul.f32 -1.442695, %v6895_v13 }
 0x34e   : > { %v5122_v39 = vpop.eup %5121  ;;  %5147 = vrcp.f32 %v3030_v43  ;;  %v3028_v60 = vadd.f32 1.0, %v5120_v19  ;;  %v3287_v19 = vpop.permute.xlu0 %3286 }
 0x34f   : > { %v5124_v12 = vpop.eup %5123  ;;  %v3116_v10 = vmul.f32 %v5122_v39, %v6823_v0  ;;  %5149 = vpow2.f32 %v4548_v44  ;;  %v3142_v17 = vpack.c.bf16 %v3118_v32, %v3117_v23  ;;  %v3289_v39 = vpop.permute.xlu1 %3288 }
 0x350   : > { %v5126_v58 = vpop.eup %5125  ;;  %5151 = vrcp.f32 %v3028_v60  ;;  %v3033_v14 = vadd.f32 1.0, %v5124_v12 }
 0x351   : > { %v5128_v38 = vpop.eup %5127  ;;  %v3141_v45 = vpack.c.bf16 %v3116_v10, %v3115_v59  ;;  %5153 = vpow2.f32 %v4546_v8  ;;  %v3321_v0 = vsel %vm2390_vm14, %v3142_v17, %v3281_v55  ;;  %v3121_v54 = vmul.f32 %v5126_v58, %v6827_v56 }
 0x352   : > { %v5130_v52 = vpop.eup %5129  ;;  %v3031_v25 = vadd.f32 1.0, %v5128_v38  ;;  %5155 = vrcp.f32 %v3033_v14 }
 0x353   : > { %v5132_v20 = vpop.eup %5131  ;;  %v3318_v2 = vsel %vm2390_vm14, %v3141_v45, %v3279_v26  ;;  %v3119_v34 = vmul.f32 %v5130_v52, %v6831_v15  ;;  %v3291_v26 = vpop.permute.xlu0 %3290 }
 0x354   : > { %v5134_v27 = vpop.eup %5133  ;;  %v3122_v7 = vmul.f32 %v5132_v20, %v6835_v31  ;;  %4740 = vmatprep.mubr.msk.bf16.mxu0 %vm3360_vm8, %v3318_v2  ;;  %5157 = vrcp.f32 %v3031_v25  ;;  %v3293_v45 = vpop.permute.xlu1 %3292 }
 0x355   : > { %v5136_v51 = vpop.eup %5135  ;;  %v3034_v22 = vadd.f32 1.0, %v5134_v27  ;;  %4741 = vmatmul.mubr.msk.bf16.gmra.mxu0 %vm3360_vm8, %v3321_v0 }
 0x356   : > { %v5138_v37 = vpop.eup %5137  ;;  %v3120_v11 = vmul.f32 %v5136_v51, %v6839_v50  ;;  %v3144_v24 = vpack.c.bf16 %v3122_v7, %v3121_v54 }
 0x357   : > { %v5140_v6 = vpop.eup %5139  ;;  %5159 = vrcp.f32 %v3034_v22  ;;  %v3032_v31 = vadd.f32 1.0, %v5138_v37  ;;  %v3295_v7 = vpop.permute.xlu0 %3294 }
 0x358   : > { %v5142_v21 = vpop.eup %5141  ;;  %v3143_v62 = vpack.c.bf16 %v3120_v11, %v3119_v34  ;;  %v3037_v48 = vadd.f32 1.0, %v5140_v6  ;;  %v3327_v30 = vsel %vm2390_vm14, %v3144_v24, %v3285_v18  ;;  %v3297_v51 = vpop.permute.xlu1 %3296 }
 0x359   : > { %v5144_v57 = vpop.eup %5143  ;;  %5161 = vrcp.f32 %v3032_v31  ;;  %v3125_v4 = vmul.f32 %v5142_v21, %v6843_v40 }
 0x35a   : > { %v5146_v28 = vpop.eup %5145  ;;  %v3035_v9 = vadd.f32 1.0, %v5144_v57  ;;  %v3324_v56 = vsel %vm2390_vm14, %v3143_v62, %v3283_v35  ;;  %5163 = vrcp.f32 %v3037_v48 }
 0x35b   : > { %v5148_v63 = vpop.eup %5147  ;;  %4744 = vmatprep.mubr.msk.bf16.mxu0 %vm3360_vm8, %v3324_v56  ;;  %v3123_v49 = vmul.f32 %v5146_v28, %v6847_v53 }
 0x35c   : > { %v5150_v15 = vpop.eup %5149  ;;  %v3126_v50 = vmul.f32 %v5148_v63, %v6851_v42  ;;  %5165 = vrcp.f32 %v3035_v9 }
 0x35d   : > { %v5152_v47 = vpop.eup %5151  ;;  %v3038_v1 = vadd.f32 1.0, %v5150_v15  ;;  %4745 = vmatmul.mubr.msk.bf16.gmra.mxu0 %vm3360_vm8, %v3327_v30 }
 0x35e   : > { %v5154_v46 = vpop.eup %5153  ;;  %v3124_v43 = vmul.f32 %v5152_v47, %v6855_v36  ;;  %v3146_v32 = vpack.c.bf16 %v3126_v50, %v3125_v4 }
 0x35f   : > { %5167 = vrcp.f32 %v3038_v1  ;;  %v3036_v44 = vadd.f32 1.0, %v5154_v46  ;;  %v5156_v23 = vpop.eup %5155 }
 0x360   : > { %v3145_v42 = vpack.c.bf16 %v3124_v43, %v3123_v49  ;;  %v3333_v40 = vsel %vm2390_vm14, %v3146_v32, %v3289_v39  ;;  %v3129_v59 = vmul.f32 %v5156_v23, %v6859_v29 }
 0x361   : > { %5169 = vrcp.f32 %v3036_v44  ;;  %v5158_v8 = vpop.eup %5157 }
 0x362   : > { %v3330_v60 = vsel %vm2390_vm14, %v3145_v42, %v3287_v19  ;;  %v3127_v10 = vmul.f32 %v5158_v8, %v6864_v61 }
 0x363   : > { %4748 = vmatprep.mubr.msk.bf16.mxu0 %vm3360_vm8, %v3330_v60 }
 0x364   : > { %v5160_v12 = vpop.eup %5159 }
 0x365   : > { %v3130_v53 = vmul.f32 %v5160_v12, %v6871_v3  ;;  %4749 = vmatmul.mubr.msk.bf16.gmra.mxu0 %vm3360_vm8, %v3333_v40 }
 0x366   : > { %v5162_v36 = vpop.eup %5161 }
 0x367   : > { %v3128_v58 = vmul.f32 %v5162_v36, %v6875_v41  ;;  %v3148_v17 = vpack.c.bf16 %v3130_v53, %v3129_v59  ;;  %v5164_v14 = vpop.eup %5163 }
 0x368   : > { %v3133_v61 = vmul.f32 %v5164_v14, %v6878_v16  ;;  %v6941_v16 = vld [vmem:[%s7647_s6] ss:$0 sm:$0xff] }
 0x369   : > { %v3147_v38 = vpack.c.bf16 %v3128_v58, %v3127_v10  ;;  %v5166_v55 = vpop.eup %5165  ;;  %v3339_v3 = vsel %vm2390_vm14, %v3148_v17, %v3293_v45 }
 0x36a   : > { %v3131_v41 = vmul.f32 %v5166_v55, %v6886_v5 }
 0x36b   : > { %v3336_v52 = vsel %vm2390_vm14, %v3147_v38, %v3291_v26 }
 0x36c   : > { %v5168_v25 = vpop.eup %5167  ;;  %4752 = vmatprep.mubr.msk.bf16.mxu0 %vm3360_vm8, %v3336_v52 }
 0x36d   : > { %v3134_v20 = vmul.f32 %v5168_v25, %v6891_v33  ;;  %4753 = vmatmul.mubr.msk.bf16.gmra.mxu0 %vm3360_vm8, %v3339_v3 }
 0x36e   : > { %v5170_v29 = vpop.eup %5169 }
 0x36f   : > { %v3132_v2 = vmul.f32 %v5170_v29, %v6895_v13  ;;  %v3150_v27 = vpack.c.bf16 %v3134_v20, %v3133_v61 }
 0x371   : > { %v3149_v0 = vpack.c.bf16 %v3132_v2, %v3131_v41  ;;  %v3345_v37 = vsel %vm2390_vm14, %v3150_v27, %v3297_v51 }
 0x373   : > { %v3342_v22 = vsel %vm2390_vm14, %v3149_v0, %v3295_v7  ;;  %vm3622_vm14 = vcmask 1046534  }
 0x374   : > { %4756 = vmatprep.mubr.msk.bf16.mxu0 %vm3360_vm8, %v3342_v22 }
 0x375   : > { %4757 = vmatmul.mubr.msk.bf16.gmra.mxu0 %vm3360_vm8, %v3345_v37 }
 0x3b0   : > { %v4730_v33 = vpop.f32.mrf.mxu0 }
 0x3b1   : > { %v3440_v13 = vadd.f32 %v4730_v33, %v6941_v16 }
 0x3b2   : > { %v3431_v5 = vpop.f32.mrf.mxu0 }
 0x3b3   : > { %v6944_v11 = vmax.f32 %v3440_v13, 0.0  ;;  %v3432_v6 = vadd.f32 %v6941_v16, %v3431_v5 }
 0x3b4   : > { %v4731_v54 = vpop.f32.mrf.mxu0 }
 0x3b5   : > { %v3443_v31 = vadd.f32 %v4731_v54, %v6941_v16  ;;  %v6949_v21 = vmax.f32 %v3432_v6, 0.0  ;;  %v3606_v24 = vrot.slane %v6944_v11, 7  ;;  %v3746_v28 = vrot.slane %v6944_v11, 3 }
 0x3b6   : > { %v3434_v34 = vpop.f32.mrf.mxu0  ;;  %v3810_v23 = vrot.slane %v6944_v11, 5  ;;  %v3776_v40 = vrot.slane %v6944_v11, 4  ;;  %v3678_v53 = vrot.slane %v6944_v11, 1  ;;  %v3844_v36 = vrot.slane %v6944_v11, 6 }
 0x3b7   : > { %v3435_v35 = vadd.f32 %v6941_v16, %v3434_v34  ;;  %v6952_v62 = vmax.f32 %v3443_v31, 0.0  ;;  %v3608_v48 = vsel %vm3607_vm9, %v3606_v24, %v6949_v21  ;;  %v3745_v18 = vrot.slane %v6949_v21, 4 }
 0x3b8   : > { %v3809_v42 = vrot.slane %v6949_v21, 6  ;;  %v3643_v60 = vrot.slane %v6949_v21, 1  ;;  %v3775_v8 = vrot.slane %v6949_v21, 5  ;;  %v3677_v10 = vrot.slane %v6949_v21, 2 }
 0x3b9   : > { %v6954_v57 = vmax.f32 %v3435_v35, 0.0  ;;  %v3893_v9 = vrot.slane %v6952_v62, 7  ;;  %v4026_v63 = vrot.slane %v6952_v62, 3  ;;  %v3747_v15 = vsel %vm3607_vm9, %v3746_v28, %v3745_v18 }
 0x3ba   : > { %v3712_v58 = vrot.slane %v6944_v11, 2  ;;  %v3811_v17 = vsel %vm3607_vm9, %v3810_v23, %v3809_v42  ;;  %v3843_v26 = vrot.slane %v6949_v21, 7  ;;  %v3644_v45 = vsel %vm3607_vm9, %v6944_v11, %v3643_v60 }
 0x3bb   : > { %v4025_v56 = vrot.slane %v6954_v57, 4  ;;  %v3894_v50 = vsel %vm3607_vm9, %v3893_v9, %v6954_v57  ;;  %v3777_v14 = vsel %vm3607_vm9, %v3776_v40, %v3775_v8  ;;  %v3711_v25 = vrot.slane %v6949_v21, 3 }
 0x3bc   : > { %v3679_v7 = vsel %vm3607_vm9, %v3678_v53, %v3677_v10  ;;  %v3845_v37 = vsel %vm3607_vm9, %v3844_v36, %v3843_v26  ;;  %v4089_v33 = vrot.slane %v6954_v57, 6  ;;  %v3923_v54 = vrot.slane %v6954_v57, 1 }
 0x3bd   : > { %v4027_v30 = vsel %vm3607_vm9, %v4026_v63, %v4025_v56  ;;  %v4055_v34 = vrot.slane %v6954_v57, 5  ;;  %v3957_v11 = vrot.slane %v6954_v57, 2  ;;  %v3713_v31 = vsel %vm3607_vm9, %v3712_v58, %v3711_v25 }
 0x3be   : > { %v4090_v35 = vrot.slane %v6952_v62, 5  ;;  %v4123_v21 = vrot.slane %v6954_v57, 7  ;;  %v3991_v24 = vrot.slane %v6954_v57, 3  ;;  %v4056_v28 = vrot.slane %v6952_v62, 4 }
 0x3bf   : > { %v3958_v9 = vrot.slane %v6952_v62, 1  ;;  %v3924_v57 = vsel %vm3607_vm9, %v6952_v62, %v3923_v54 }
 0x3c0   : > { %v4091_v63 = vsel %vm3607_vm9, %v4090_v35, %v4089_v33 }
 0x3e8   : > { %v4734_v47 = vpop.f32.mrf.mxu0 }
 0x3e9   : > { %v3456_v43 = vadd.f32 %v4734_v47, %v6941_v16  ;;  %v4057_v47 = vsel %vm3607_vm9, %v4056_v28, %v4055_v34 }
 0x3ea   : > { %v3447_v1 = vpop.f32.mrf.mxu0 }
 0x3eb   : > { %v3448_v49 = vadd.f32 %v6941_v16, %v3447_v1  ;;  %v6974_v39 = vmax.f32 %v3456_v43, 0.0  ;;  %v3959_v1 = vsel %vm3607_vm9, %v3958_v9, %v3957_v11 }
 0x3ec   : > { %v4735_v46 = vpop.f32.mrf.mxu0 }
 0x3ed   : > { %v3459_v19 = vadd.f32 %v4735_v46, %v6941_v16  ;;  %v6971_v32 = vmax.f32 %v3448_v49, 0.0  ;;  %v3612_v55 = vrot.slane %v6974_v39, 5  ;;  %v3750_v20 = vrot.slane %v6974_v39, 1 }
 0x3ee   : > { %v3450_v4 = vpop.f32.mrf.mxu0  ;;  %v3814_v46 = vrot.slane %v6974_v39, 3  ;;  %v3647_v23 = vrot.slane %v6974_v39, 6  ;;  %v3780_v8 = vrot.slane %v6974_v39, 2  ;;  %v3848_v36 = vrot.slane %v6974_v39, 4 }
 0x3ef   : > { %v3451_v44 = vadd.f32 %v6941_v16, %v3450_v4  ;;  %v6984_v59 = vmax.f32 %v3459_v19, 0.0  ;;  %v3609_v38 = vrot.slane %v6971_v32, 6  ;;  %v3748_v52 = vrot.slane %v6971_v32, 2 }
 0x3f0   : > { %v3645_v18 = vrot.slane %v6971_v32, 7  ;;  %v3778_v56 = vrot.slane %v6971_v32, 3  ;;  %v3680_v4 = vsel %vm3610_vm10, %v6971_v32, %v3679_v7  ;;  %v3846_v42 = vrot.slane %v6971_v32, 5 }
 0x3f1   : > { %v6979_v12 = vmax.f32 %v3451_v44, 0.0  ;;  %v3611_v3 = vsel %vm3610_vm10, %v3609_v38, %v3608_v48  ;;  %v3749_v41 = vsel %vm3610_vm10, %v3748_v52, %v3747_v15  ;;  %v3897_v2 = vrot.slane %v6984_v59, 5 }
 0x3f2   : > { %v7001_v61 = vsel %vm3613_vm11, %v3612_v55, %v3611_v3  ;;  %v7008_v0 = vsel %vm3613_vm11, %v3750_v20, %v3749_v41  ;;  %v4030_v22 = vrot.slane %v6984_v59, 1  ;;  %v3812_v48 = vrot.slane %v6971_v32, 4 }
 0x3f3   : > { %v3895_v29 = vrot.slane %v6979_v12, 6  ;;  %7724 = vst [vmem:[#allocation26_spill] sm:$0xff] %v7001_v61  ;;  %v4028_v27 = vrot.slane %v6979_v12, 2  ;;  %v4124_v15 = vrot.slane %v6952_v62, 6  ;;  %v3646_v19 = vsel %vm3610_vm10, %v3645_v18, %v3644_v45 }
 0x3f4   : > { %v3813_v44 = vsel %vm3610_vm10, %v3812_v48, %v3811_v17  ;;  %v3779_v60 = vsel %vm3610_vm10, %v3778_v56, %v3777_v14  ;;  %v4092_v40 = vrot.slane %v6979_v12, 4  ;;  %v3925_v10 = vrot.slane %v6979_v12, 7 }
 0x3f5   : > { %v3896_v51 = vsel %vm3610_vm10, %v3895_v29, %v3894_v50  ;;  %v4029_v13 = vsel %vm3610_vm10, %v4028_v27, %v4027_v30  ;;  %v3992_v50 = vrot.slane %v6952_v62, 2  ;;  %v3681_v30 = vrot.slane %v6974_v39, 7 }
 0x3f6   : > { %v7015_v5 = vsel %vm3613_vm11, %v3897_v2, %v3896_v51  ;;  %v7022_v6 = vsel %vm3613_vm11, %v4030_v22, %v4029_v13  ;;  %v4125_v49 = vsel %vm3607_vm9, %v4124_v15, %v4123_v21  ;;  %v3714_v62 = vrot.slane %v6971_v32, 1 }
 0x3f7   : > { %7725 = vst [vmem:[#allocation4_spill] sm:$0xff] %v7015_v5  ;;  %7726 = vst [vmem:[#allocation5_spill] sm:$0xff] %v7022_v6  ;;  %v3993_v43 = vsel %vm3607_vm9, %v3992_v50, %v3991_v24  ;;  %v3682_v53 = vsel %vm3613_vm11, %v3681_v30, %v3680_v4  ;;  %v4058_v58 = vrot.slane %v6979_v12, 3  ;;  %v3815_v17 = vsel %vm3613_vm11, %v3814_v46, %v3813_v44 }
 0x3f8   : > { %v3648_v32 = vsel %vm3613_vm11, %v3647_v23, %v3646_v19  ;;  %v4126_v26 = vrot.slane %v6979_v12, 5  ;;  %v3994_v38 = vrot.slane %v6979_v12, 1  ;;  %v3781_v14 = vsel %vm3613_vm11, %v3780_v8, %v3779_v60 }
 0x3f9   : > { %v3847_v55 = vsel %vm3610_vm10, %v3846_v42, %v3845_v37  ;;  %v3715_v52 = vsel %vm3610_vm10, %v3714_v62, %v3713_v31  ;;  %v4094_v25 = vrot.slane %v6984_v59, 3  ;;  %v4093_v20 = vsel %vm3610_vm10, %v4092_v40, %v4091_v63 }
 0x3fa   : > { %v3927_v29 = vrot.slane %v6984_v59, 6  ;;  %v4060_v41 = vrot.slane %v6984_v59, 2  ;;  %v3926_v27 = vsel %vm3610_vm10, %v3925_v10, %v3924_v57  ;;  %v4059_v7 = vsel %vm3610_vm10, %v4058_v58, %v4057_v47 }
 0x3fb   : > { %v3960_v51 = vsel %vm3610_vm10, %v6979_v12, %v3959_v1  ;;  %v3961_v22 = vrot.slane %v6984_v59, 7  ;;  %v4127_v13 = vsel %vm3610_vm10, %v4126_v26, %v4125_v49  ;;  %v3995_v54 = vsel %vm3610_vm10, %v3994_v38, %v3993_v43 }
 0x3fc   : > { %v3849_v11 = vsel %vm3613_vm11, %v3848_v36, %v3847_v55  ;;  %v3716_v31 = vsel %vm3613_vm11, %v6974_v39, %v3715_v52  ;;  %v4095_v35 = vsel %vm3613_vm11, %v4094_v25, %v4093_v20  ;;  %v4128_v12 = vrot.slane %v6984_v59, 4 }
 0x3fd   : > { %v3928_v48 = vsel %vm3613_vm11, %v3927_v29, %v3926_v27  ;;  %v4061_v18 = vsel %vm3613_vm11, %v4060_v41, %v4059_v7  ;;  %v3962_v56 = vsel %vm3613_vm11, %v3961_v22, %v3960_v51  ;;  %v7095_v39 = vsel %vm3613_vm11, %v6984_v59, %v3995_v54 }
 0x3fe   : > { %v4129_v63 = vsel %vm3613_vm11, %v4128_v12, %v4127_v13 }
 0x408   : > { %v4738_v45 = vpop.f32.mrf.mxu0 }
 0x409   : > { %v3472_v3 = vadd.f32 %v4738_v45, %v6941_v16 }
 0x40a   : > { %v3463_v2 = vpop.f32.mrf.mxu0 }
 0x40b   : > { %v7075_v37 = vmax.f32 %v3472_v3, 0.0  ;;  %v3464_v33 = vadd.f32 %v6941_v16, %v3463_v2 }
 0x40c   : > { %v4739_v34 = vpop.f32.mrf.mxu0 }
 0x40d   : > { %v7085_v21 = vmax.f32 %v3464_v33, 0.0  ;;  %v3475_v24 = vadd.f32 %v4739_v34, %v6941_v16  ;;  %v3818_v9 = vrot.slane %v7075_v37, 1  ;;  %v3651_v47 = vrot.slane %v7075_v37, 4 }
 0x40e   : > { %v3466_v28 = vpop.f32.mrf.mxu0  ;;  %v3685_v62 = vrot.slane %v7075_v37, 5  ;;  %v3852_v23 = vrot.slane %v7075_v37, 2  ;;  %v3719_v40 = vrot.slane %v7075_v37, 6 }
 0x40f   : > { %v7097_v15 = vmax.f32 %v3475_v24, 0.0  ;;  %v3467_v50 = vadd.f32 %v6941_v16, %v3466_v28  ;;  %v3816_v30 = vrot.slane %v7085_v21, 2  ;;  %v3649_v57 = vrot.slane %v7085_v21, 5 }
 0x410   : > { %v3782_v1 = vrot.slane %v7085_v21, 1  ;;  %v3683_v46 = vrot.slane %v7085_v21, 6  ;;  %v3850_v4 = vrot.slane %v7085_v21, 3  ;;  %v3717_v44 = vrot.slane %v7085_v21, 7 }
 0x411   : > { %v7106_v49 = vmax.f32 %v3467_v50, 0.0  ;;  %v3817_v59 = vsel %vm3616_vm12, %v3816_v30, %v3815_v17  ;;  %v3650_v43 = vsel %vm3616_vm12, %v3649_v57, %v3648_v32  ;;  %v4098_v36 = vrot.slane %v7097_v15, 1 }
 0x412   : > { %v3783_v19 = vsel %vm3616_vm12, %v3782_v1, %v3781_v14  ;;  %v3684_v42 = vsel %vm3616_vm12, %v3683_v46, %v3682_v53  ;;  %v3819_v60 = vsel %vm3619_vm13, %v3818_v9, %v3817_v59  ;;  %v3652_v8 = vsel %vm3619_vm13, %v3651_v47, %v3650_v43 }
 0x413   : > { %v3784_v10 = vsel %vm3619_vm13, %v7075_v37, %v3783_v19  ;;  %v3686_v58 = vsel %vm3619_vm13, %v3685_v62, %v3684_v42  ;;  %v4096_v17 = vrot.slane %v7106_v49, 2  ;;  %v3929_v53 = vrot.slane %v7106_v49, 5 }
 0x414   : > { %v3851_v26 = vsel %vm3616_vm12, %v3850_v4, %v3849_v11  ;;  %v3718_v38 = vsel %vm3616_vm12, %v3717_v44, %v3716_v31  ;;  %v4062_v45 = vrot.slane %v7106_v49, 1  ;;  %v3963_v14 = vrot.slane %v7106_v49, 6 }
 0x415   : > { %v4742_v32 = vpop.f32.mrf.mxu0  ;;  %v4097_v52 = vsel %vm3616_vm12, %v4096_v17, %v4095_v35  ;;  %v3930_v25 = vsel %vm3616_vm12, %v3929_v53, %v3928_v48  ;;  %v4130_v3 = vrot.slane %v7106_v49, 3  ;;  %v3931_v29 = vrot.slane %v7097_v15, 4 }
 0x416   : > { %v3488_v55 = vadd.f32 %v4742_v32, %v6941_v16  ;;  %v4063_v41 = vsel %vm3616_vm12, %v4062_v45, %v4061_v18  ;;  %v3964_v2 = vsel %vm3616_vm12, %v3963_v14, %v3962_v56  ;;  %v3965_v27 = vrot.slane %v7097_v15, 5 }
 0x417   : > { %v3479_v20 = vpop.f32.mrf.mxu0  ;;  %v3853_v22 = vsel %vm3619_vm13, %v3852_v23, %v3851_v26  ;;  %v3720_v33 = vsel %vm3619_vm13, %v3719_v40, %v3718_v38  ;;  %v4099_v54 = vsel %vm3619_vm13, %v4098_v36, %v4097_v52  ;;  %v7143_v34 = vsel %vm3619_vm13, %v3931_v29, %v3930_v25 }
 0x418   : > { %v7136_v7 = vmax.f32 %v3488_v55, 0.0  ;;  %v3480_v51 = vadd.f32 %v6941_v16, %v3479_v20  ;;  %v7147_v11 = vsel %vm3619_vm13, %v7097_v15, %v4063_v41  ;;  %v7150_v31 = vsel %vm3619_vm13, %v3965_v27, %v3964_v2 }
 0x419   : > { %v4743_v13 = vpop.f32.mrf.mxu0  ;;  %v7156_v24 = vsel %vm3616_vm12, %v4130_v3, %v4129_v63 }
 0x41a   : > { %7727 = vst [vmem:[#allocation9_spill] sm:$0xff] %v7136_v7  ;;  %v7152_v35 = vmax.f32 %v3480_v51, 0.0  ;;  %v3491_v12 = vadd.f32 %v4743_v13, %v6941_v16  ;;  %v3821_v28 = vrot.slane %v7136_v7, 7  ;;  %v3655_v9 = vrot.slane %v7136_v7, 2 }
 0x41b   : > { %v3482_v18 = vpop.f32.mrf.mxu0  ;;  %v3787_v56 = vrot.slane %v7136_v7, 6  ;;  %v3689_v63 = vrot.slane %v7136_v7, 3  ;;  %v3723_v17 = vrot.slane %v7136_v7, 4 }
 0x41c   : > { %v7163_v30 = vmax.f32 %v3491_v12, 0.0  ;;  %v3483_v57 = vadd.f32 %v6941_v16, %v3482_v18  ;;  %v3653_v47 = vrot.slane %v7152_v35, 3  ;;  %v3820_v46 = vsel %vm3622_vm14, %v7152_v35, %v3819_v60 }
 0x41d   : > { %v4746_v1 = vpop.f32.mrf.mxu0  ;;  %v3785_v4 = vrot.slane %v7152_v35, 7  ;;  %v3687_v59 = vrot.slane %v7152_v35, 4  ;;  %v3854_v43 = vrot.slane %v7152_v35, 1  ;;  %v3721_v62 = vrot.slane %v7152_v35, 5 }
 0x41e   : > { %v7173_v44 = vmax.f32 %v3483_v57, 0.0  ;;  %v3504_v19 = vadd.f32 %v4746_v1, %v6941_v16  ;;  %v3654_v42 = vsel %vm3622_vm14, %v3653_v47, %v3652_v8  ;;  %v7186_v26 = vsel %vm3625_vm15, %v3821_v28, %v3820_v46 }
 0x41f   : > { %v3495_v23 = vpop.f32.mrf.mxu0  ;;  %v3786_v40 = vsel %vm3622_vm14, %v3785_v4, %v3784_v10  ;;  %v3688_v36 = vsel %vm3622_vm14, %v3687_v59, %v3686_v58  ;;  %v3855_v60 = vsel %vm3622_vm14, %v3854_v43, %v3853_v22  ;;  %v7189_v8 = vsel %vm3625_vm15, %v3655_v9, %v3654_v42 }
 0x420   : > { %v7182_v53 = vmax.f32 %v3504_v19, 0.0  ;;  %v3496_v32 = vadd.f32 %v6941_v16, %v3495_v23  ;;  %v7192_v45 = vsel %vm3625_vm15, %v3787_v56, %v3786_v40  ;;  %v7195_v10 = vsel %vm3625_vm15, %v3689_v63, %v3688_v36 }
 0x421   : > { %v4747_v38 = vpop.f32.mrf.mxu0  ;;  %v7199_v58 = vsel %vm3625_vm15, %v7136_v7, %v3855_v60  ;;  %v3722_v14 = vsel %vm3622_vm14, %v3721_v62, %v3720_v33  ;;  %v4100_v25 = vsel %vm3622_vm14, %v7173_v44, %v4099_v54  ;;  %v4101_v3 = vrot.slane %v7163_v30, 7 }
 0x422   : > { %v7202_v55 = vmax.f32 %v3496_v32, 0.0  ;;  %v3507_v52 = vadd.f32 %v4747_v38, %v6941_v16  ;;  %v3824_v29 = vrot.slane %v7182_v53, 5  ;;  %v3790_v41 = vrot.slane %v7182_v53, 4 }
 0x423   : > { %v3498_v20 = vpop.f32.mrf.mxu0  ;;  %v3692_v2 = vrot.slane %v7182_v53, 1  ;;  %v3858_v27 = vrot.slane %v7182_v53, 6  ;;  %v7225_v47 = vsel %vm3625_vm15, %v3723_v17, %v3722_v14  ;;  %v3726_v63 = vrot.slane %v7182_v53, 2 }
 0x424   : > { %v7212_v51 = vmax.f32 %v3507_v52, 0.0  ;;  %v3499_v22 = vadd.f32 %v6941_v16, %v3498_v20  ;;  %v3823_v33 = vrot.slane %v7202_v55, 6  ;;  %v3657_v13 = vrot.slane %v7202_v55, 1 }
 0x425   : > { %v4750_v54 = vpop.f32.mrf.mxu0  ;;  %v3789_v12 = vrot.slane %v7202_v55, 5  ;;  %v3691_v18 = vrot.slane %v7202_v55, 2  ;;  %v3857_v28 = vrot.slane %v7202_v55, 7  ;;  %v3725_v9 = vrot.slane %v7202_v55, 3 }
 0x426   : > { %v7221_v56 = vmax.f32 %v3499_v22, 0.0  ;;  %v3520_v57 = vadd.f32 %v4750_v54, %v6941_v16  ;;  %v3825_v46 = vsel %vm3607_vm9, %v3824_v29, %v3823_v33  ;;  %v3658_v4 = vsel %vm3607_vm9, %v7182_v53, %v3657_v13 }
 0x427   : > { %v3511_v1 = vpop.f32.mrf.mxu0  ;;  %v3791_v59 = vsel %vm3607_vm9, %v3790_v41, %v3789_v12  ;;  %v3693_v43 = vsel %vm3607_vm9, %v3692_v2, %v3691_v18  ;;  %v3859_v62 = vsel %vm3607_vm9, %v3858_v27, %v3857_v28  ;;  %v3727_v23 = vsel %vm3607_vm9, %v3726_v63, %v3725_v9 }
 0x428   : > { %v7233_v19 = vmax.f32 %v3520_v57, 0.0  ;;  %v3512_v42 = vadd.f32 %v6941_v16, %v3511_v1  ;;  %v7239_v36 = vsel %vm3625_vm15, %v4101_v3, %v4100_v25  ;;  %v4103_v60 = vrot.slane %v7221_v56, 6 }
 0x429   : > { %v4751_v40 = vpop.f32.mrf.mxu0  ;;  %v4104_v17 = vrot.slane %v7212_v51, 5 }
 0x42a   : > { %v7244_v38 = vmax.f32 %v3512_v42, 0.0  ;;  %v3523_v14 = vadd.f32 %v4751_v40, %v6941_v16  ;;  %v3828_v52 = vrot.slane %v7233_v19, 3  ;;  %v3661_v41 = vrot.slane %v7233_v19, 6 }
 0x42b   : > { %v3514_v29 = vpop.f32.mrf.mxu0  ;;  %v3794_v25 = vrot.slane %v7233_v19, 2  ;;  %v3695_v3 = vrot.slane %v7233_v19, 7  ;;  %v3862_v2 = vrot.slane %v7233_v19, 4 }
 0x42c   : > { %v7253_v27 = vmax.f32 %v3523_v14, 0.0  ;;  %v3515_v22 = vadd.f32 %v6941_v16, %v3514_v29  ;;  %v3826_v33 = vrot.slane %v7244_v38, 4  ;;  %v3659_v13 = vrot.slane %v7244_v38, 7 }
 0x42d   : > { %v4754_v54 = vpop.f32.mrf.mxu0  ;;  %v3792_v12 = vrot.slane %v7244_v38, 3  ;;  %v3694_v18 = vsel %vm3610_vm10, %v7244_v38, %v3693_v43  ;;  %v3860_v28 = vrot.slane %v7244_v38, 5  ;;  %v3728_v9 = vrot.slane %v7244_v38, 1 }
 0x42e   : > { %v7263_v57 = vmax.f32 %v3515_v22, 0.0  ;;  %v3536_v63 = vadd.f32 %v4754_v54, %v6941_v16  ;;  %v3827_v1 = vsel %vm3610_vm10, %v3826_v33, %v3825_v46  ;;  %v3660_v42 = vsel %vm3610_vm10, %v3659_v13, %v3658_v4 }
 0x42f   : > { %v3527_v40 = vpop.f32.mrf.mxu0  ;;  %v3829_v14 = vsel %vm3613_vm11, %v3828_v52, %v3827_v1  ;;  %v3662_v29 = vsel %vm3613_vm11, %v3661_v41, %v3660_v42  ;;  %v3793_v50 = vsel %vm3610_vm10, %v3792_v12, %v3791_v59  ;;  %v4105_v43 = vsel %vm3607_vm9, %v4104_v17, %v4103_v60 }
 0x430   : > { %v7272_v48 = vmax.f32 %v3536_v63, 0.0  ;;  %v3528_v22 = vadd.f32 %v6941_v16, %v3527_v40  ;;  %v3696_v32 = vsel %vm3613_vm11, %v3695_v3, %v3694_v18  ;;  %v3861_v54 = vsel %vm3610_vm10, %v3860_v28, %v3859_v62 }
 0x431   : > { %v4755_v46 = vpop.f32.mrf.mxu0  ;;  %v3795_v4 = vsel %vm3613_vm11, %v3794_v25, %v3793_v50  ;;  %v3863_v33 = vsel %vm3613_vm11, %v3862_v2, %v3861_v54  ;;  %v3729_v52 = vsel %vm3610_vm10, %v3728_v9, %v3727_v23  ;;  %v4106_v41 = vrot.slane %v7263_v57, 4 }
 0x432   : > { %v7281_v59 = vmax.f32 %v3528_v22, 0.0  ;;  %v3539_v60 = vadd.f32 %v4755_v46, %v6941_v16  ;;  %v3832_v17 = vrot.slane %v7272_v48, 1  ;;  %v3665_v62 = vrot.slane %v7272_v48, 4 }
 0x433   : > { %v3530_v3 = vpop.f32.mrf.mxu0  ;;  %v3699_v12 = vrot.slane %v7272_v48, 5  ;;  %v3866_v50 = vrot.slane %v7272_v48, 2  ;;  %v3730_v23 = vsel %vm3613_vm11, %v7233_v19, %v3729_v52  ;;  %v3733_v28 = vrot.slane %v7272_v48, 6 }
 0x434   : > { %v3531_v25 = vadd.f32 %v6941_v16, %v3530_v3  ;;  %v3830_v2 = vrot.slane %v7281_v59, 2  ;;  %v3663_v18 = vrot.slane %v7281_v59, 5  ;;  %v3796_v63 = vrot.slane %v7281_v59, 1 }
 0x435   : > { %v4758_v9 = vpop.f32.mrf.mxu0  ;;  %v3697_v1 = vrot.slane %v7281_v59, 6  ;;  %v3864_v42 = vrot.slane %v7281_v59, 3  ;;  %v3731_v40 = vrot.slane %v7281_v59, 7  ;;  %v7304_v3 = vmax.f32 %v3539_v60, 0.0 }
 0x436   : > { %v7299_v22 = vmax.f32 %v3531_v25, 0.0  ;;  %v3552_v54 = vadd.f32 %v4758_v9, %v6941_v16  ;;  %v3831_v46 = vsel %vm3616_vm12, %v3830_v2, %v3829_v14  ;;  %v3664_v52 = vsel %vm3616_vm12, %v3663_v18, %v3662_v29 }
 0x437   : > { %v3543_v20 = vpop.f32.mrf.mxu0  ;;  %v3833_v13 = vsel %vm3619_vm13, %v3832_v17, %v3831_v46  ;;  %v3797_v5 = vsel %vm3616_vm12, %v3796_v63, %v3795_v4  ;;  %v3698_v6 = vsel %vm3616_vm12, %v3697_v1, %v3696_v32  ;;  %v3666_v61 = vsel %vm3619_vm13, %v3665_v62, %v3664_v52 }
 0x438   : > { %v7309_v7 = vmax.f32 %v3552_v54, 0.0  ;;  %v3544_v25 = vadd.f32 %v6941_v16, %v3543_v20  ;;  %v3798_v14 = vsel %vm3619_vm13, %v7272_v48, %v3797_v5  ;;  %v3700_v29 = vsel %vm3619_vm13, %v3699_v12, %v3698_v6 }
 0x439   : > { %v4759_v2 = vpop.f32.mrf.mxu0  ;;  %v3865_v60 = vsel %vm3616_vm12, %v3864_v42, %v3863_v33  ;;  %v3732_v17 = vsel %vm3616_vm12, %v3731_v40, %v3730_v23  ;;  %v4107_v4 = vsel %vm3610_vm10, %v4106_v41, %v4105_v43  ;;  %v4110_v62 = vrot.slane %v7299_v22, 2 }
 0x43a   : > { %v7319_v18 = vmax.f32 %v3544_v25, 0.0  ;;  %v3555_v32 = vadd.f32 %v4759_v2, %v6941_v16  ;;  %v3835_v20 = vrot.slane %v7309_v7, 7  ;;  %v3669_v5 = vrot.slane %v7309_v7, 2 }
 0x43b   : > { %v3546_v9 = vpop.f32.mrf.mxu0  ;;  %v3801_v63 = vrot.slane %v7309_v7, 6  ;;  %v3703_v6 = vrot.slane %v7309_v7, 3  ;;  %v3867_v33 = vsel %vm3619_vm13, %v3866_v50, %v3865_v60  ;;  %v3734_v23 = vsel %vm3619_vm13, %v3733_v28, %v3732_v17 }
 0x43c   : > { %v3547_v12 = vadd.f32 %v6941_v16, %v3546_v9  ;;  %v3834_v43 = vsel %vm3622_vm14, %v7319_v18, %v3833_v13  ;;  %v3667_v41 = vrot.slane %v7319_v18, 3  ;;  %v3799_v42 = vrot.slane %v7319_v18, 7 }
 0x43d   : > { %v3836_v1 = vsel %vm3625_vm15, %v3835_v20, %v3834_v43  ;;  %v3701_v40 = vrot.slane %v7319_v18, 4  ;;  %v3868_v54 = vrot.slane %v7319_v18, 1  ;;  %v7337_v46 = vmax.f32 %v3555_v32, 0.0 }
 0x43e   : > { %v4800_v50 = vpack.i.bf16 %v3836_v1, %v7186_v26  ;;  %v3668_v16 = vsel %vm3622_vm14, %v3667_v41, %v3666_v61  ;;  %v3735_v13 = vrot.slane %v7319_v18, 5  ;;  %v3800_v28 = vsel %vm3622_vm14, %v3799_v42, %v3798_v14 }
 0x43f   : > { %v3670_v52 = vsel %vm3625_vm15, %v3669_v5, %v3668_v16  ;;  %v3702_v25 = vsel %vm3622_vm14, %v3701_v40, %v3700_v29  ;;  %v3869_v2 = vsel %vm3622_vm14, %v3868_v54, %v3867_v33  ;;  %v3802_v17 = vsel %vm3625_vm15, %v3801_v63, %v3800_v28 }
 0x440   : > { %4801 = vrot.lane.b32.xlu1 %v4800_v50, %s5203_s18  ;;  %v4805_v60 = vpack.i.bf16 %v3670_v52, %v7189_v8  ;;  %v3704_v26 = vsel %vm3625_vm15, %v3703_v6, %v3702_v25  ;;  %v3870_v61 = vsel %vm3625_vm15, %v7309_v7, %v3869_v2  ;;  %v7352_v32 = vmax.f32 %v3547_v12, 0.0 }
 0x441   : > { %v4810_v20 = vpack.i.bf16 %v3802_v17, %v7192_v45  ;;  %v3736_v14 = vsel %vm3622_vm14, %v3735_v13, %v3734_v23  ;;  %v3935_v29 = vrot.slane %v7163_v30, 2  ;;  %v3737_v9 = vrot.slane %v7309_v7, 4 }
 0x442   : > { %4806 = vrot.lane.b32.xlu0 %v4805_v60, %s5204_s19  ;;  %v7728_v8 = vrot.slane %v7253_v27, 3  ;;  %v4112_v63 = vrot.slane %v7304_v3, 1  ;;  %v4115_v6 = vrot.slane %v7337_v46, 7  ;;  %v4815_v33 = vpack.i.bf16 %v3704_v26, %v7195_v10 }
 0x443   : > { %v4825_v45 = vpack.i.bf16 %v3870_v61, %v7199_v58  ;;  %v3939_v43 = vrot.slane %v7263_v57, 7  ;;  %v3738_v41 = vsel %vm3625_vm15, %v3737_v9, %v3736_v14  ;;  %v3941_v42 = vrot.slane %v7253_v27, 6 }
 0x444   : > { %v4109_v5 = vsel %vm3613_vm11, %v7728_v8, %v4107_v4  ;;  %4811 = vrot.lane.b32.xlu1 %v4810_v20, %s5204_s19  ;;  %v7729_v4 = vrot.slane %v7221_v56, 1  ;;  %v7730_v58 = vrot.slane %v7173_v44, 3  ;;  %v3943_v54 = vrot.slane %v7299_v22, 5 }
 0x445   : > { %v4111_v12 = vsel %vm3616_vm12, %v4110_v62, %v4109_v5  ;;  %v3945_v13 = vrot.slane %v7304_v3, 4  ;;  %v3947_v52 = vrot.slane %v7352_v32, 3  ;;  %v4820_v28 = vpack.i.bf16 %v3738_v41, %v7225_v47 }
 0x446   : > { %v4113_v23 = vsel %vm3619_vm13, %v4112_v63, %v4111_v12  ;;  %v3938_v1 = vsel %vm3607_vm9, %v7212_v51, %v7729_v4  ;;  %v3934_v62 = vsel %vm3622_vm14, %v7730_v58, %v7143_v34  ;;  %4816 = vrot.lane.b32.xlu0 %v4815_v33, %s5203_s18  ;;  %v4065_v2 = vrot.slane %v7173_v44, 7 }
 0x447   : > { %v4114_v10 = vsel %vm3622_vm14, %v7352_v32, %v4113_v23  ;;  %v3940_v40 = vsel %vm3610_vm10, %v3939_v43, %v3938_v1  ;;  %v3949_v17 = vrot.slane %v7337_v46, 2  ;;  %v4069_v26 = vrot.slane %v7221_v56, 5 }
 0x448   : > { %v4116_v50 = vsel %vm3625_vm15, %v4115_v6, %v4114_v10  ;;  %v3942_v16 = vsel %vm3613_vm11, %v3941_v42, %v3940_v40  ;;  %4826 = vrot.lane.b32.xlu1 %v4825_v45, %s5206_s20  ;;  %v4070_v61 = vrot.slane %v7212_v51, 4  ;;  %v4066_v47 = vsel %vm3622_vm14, %v4065_v2, %v7147_v11 }
 0x449   : > { %v4830_v25 = vpack.i.bf16 %v4116_v50, %v7239_v36  ;;  %v3944_v34 = vsel %vm3616_vm12, %v3943_v54, %v3942_v16  ;;  %v4067_v36 = vrot.slane %v7163_v30, 6  ;;  %v4072_v14 = vrot.slane %v7263_v57, 3 }
 0x44a   : > { %v3946_v60 = vsel %vm3619_vm13, %v3945_v13, %v3944_v34  ;;  %4821 = vrot.lane.b32.xlu0 %v4820_v28, %s5206_s20  ;;  %v4071_v8 = vsel %vm3607_vm9, %v4070_v61, %v4069_v26  ;;  %v4074_v5 = vrot.slane %v7253_v27, 2  ;;  %v4076_v63 = vrot.slane %v7299_v22, 1 }
 0x44b   : > { %v3948_v20 = vsel %vm3622_vm14, %v3947_v52, %v3946_v60  ;;  %v3936_v6 = vsel %vm3625_vm15, %v3935_v29, %v3934_v62  ;;  %v4068_v33 = vsel %vm3625_vm15, %v4067_v36, %v4066_v47  ;;  %v4073_v11 = vsel %vm3610_vm10, %v4072_v14, %v4071_v8 }
 0x44c   : > { %v3950_v9 = vsel %vm3625_vm15, %v3949_v17, %v3948_v20  ;;  %v4079_v45 = vrot.slane %v7352_v32, 7  ;;  %4831 = vrot.lane.b32.xlu1 %v4830_v25, %s5203_s18  ;;  %v4075_v43 = vsel %vm3613_vm11, %v4074_v5, %v4073_v11  ;;  %v3967_v41 = vrot.slane %v7173_v44, 4 }
 0x44d   : > { %v4835_v12 = vpack.i.bf16 %v3950_v9, %v3936_v6  ;;  %v3971_v23 = vrot.slane %v7221_v56, 2  ;;  %v4077_v4 = vsel %vm3616_vm12, %v4076_v63, %v4075_v43  ;;  %v4081_v1 = vrot.slane %v7337_v46, 6 }
 0x44e   : > { %v3972_v29 = vrot.slane %v7212_v51, 1  ;;  %v3975_v42 = vrot.slane %v7253_v27, 7  ;;  %v4078_v10 = vsel %vm3619_vm13, %v7304_v3, %v4077_v4  ;;  %v3968_v58 = vsel %vm3622_vm14, %v3967_v41, %v7150_v31 }
 0x44f   : > { %4836 = vrot.lane.b32.xlu0 %v4835_v12, %s5204_s19  ;;  %v3969_v62 = vrot.slane %v7163_v30, 3  ;;  %v3977_v40 = vrot.slane %v7299_v22, 6  ;;  %v4080_v54 = vsel %vm3622_vm14, %v4079_v45, %v4078_v10  ;;  %v3979_v16 = vrot.slane %v7304_v3, 5 }
 0x450   : > { %v3973_v50 = vsel %vm3607_vm9, %v3972_v29, %v3971_v23  ;;  %v3981_v13 = vrot.slane %v7352_v32, 4  ;;  %v4082_v52 = vsel %vm3625_vm15, %v4081_v1, %v4080_v54  ;;  %v4134_v25 = vrot.slane %v7173_v44, 1 }
 0x451   : > { %v3974_v28 = vsel %vm3610_vm10, %v7263_v57, %v3973_v50  ;;  %v4137_v31 = vrot.slane %v7221_v56, 7  ;;  %v4840_v34 = vpack.i.bf16 %v4082_v52, %v4068_v33  ;;  %v4138_v60 = vrot.slane %v7212_v51, 6 }
 0x452   : > { %v3976_v2 = vsel %vm3613_vm11, %v3975_v42, %v3974_v28  ;;  %v4140_v17 = vrot.slane %v7263_v57, 5  ;;  %v3970_v26 = vsel %vm3625_vm15, %v3969_v62, %v3968_v58  ;;  %v7731_v20 = vrot.slane %v7097_v15, 2 }
 0x453   : > { %v3978_v61 = vsel %vm3616_vm12, %v3977_v40, %v3976_v2  ;;  %v4144_v36 = vrot.slane %v7299_v22, 3  ;;  %4841 = vrot.lane.b32.xlu1 %v4840_v34, %s5204_s19  ;;  %v3983_v9 = vrot.slane %v7337_v46, 3  ;;  %v4139_v8 = vsel %vm3607_vm9, %v4138_v60, %v4137_v31 }
 0x454   : > { %v4133_v47 = vsel %vm3619_vm13, %v7731_v20, %v7156_v24  ;;  %v3980_v14 = vsel %vm3619_vm13, %v3979_v16, %v3978_v61  ;;  %v4142_v5 = vrot.slane %v7253_v27, 4  ;;  %v4141_v33 = vsel %vm3610_vm10, %v4140_v17, %v4139_v8 }
 0x455   : > { %v3982_v63 = vsel %vm3622_vm14, %v3981_v13, %v3980_v14  ;;  %v4135_v6 = vsel %vm3622_vm14, %v4134_v25, %v4133_v47  ;;  %v4148_v24 = vrot.slane %v7352_v32, 1  ;;  %v4146_v12 = vrot.slane %v7304_v3, 2 }
 0x456   : > { %v3984_v11 = vsel %vm3625_vm15, %v3983_v9, %v3982_v63  ;;  %v4143_v45 = vsel %vm3613_vm11, %v4142_v5, %v4141_v33  ;;  %v7732_v43 = vrot.slane %v7106_v49, 7  ;;  %v4001_v1 = vrot.slane %v7173_v44, 5 }
 0x457   : > { %v4845_v23 = vpack.i.bf16 %v3984_v11, %v3970_v26  ;;  %v4145_v4 = vsel %vm3616_vm12, %v4144_v36, %v4143_v45  ;;  %v4005_v29 = vrot.slane %v7221_v56, 3  ;;  %v3999_v10 = vrot.slane %v7097_v15, 6 }
 0x458   : > { %v3998_v41 = vsel %vm3616_vm12, %v7732_v43, %v7095_v39  ;;  %v4147_v42 = vsel %vm3619_vm13, %v4146_v12, %v4145_v4  ;;  %v4006_v58 = vrot.slane %v7212_v51, 2  ;;  %v4008_v62 = vrot.slane %v7263_v57, 1 }
 0x459   : > { %4846 = vrot.lane.b32.xlu0 %v4845_v23, %s5203_s18  ;;  %v4149_v40 = vsel %vm3622_vm14, %v4148_v24, %v4147_v42  ;;  %v4011_v39 = vrot.slane %v7299_v22, 7  ;;  %v4136_v54 = vsel %vm3625_vm15, %v7163_v30, %v4135_v6  ;;  %v4000_v16 = vsel %vm3619_vm13, %v3999_v10, %v3998_v41  ;;  %s4590_s18 = sshll.u32 %s7742_s24, 5 }
 0x45a   : > { %v4150_v50 = vsel %vm3625_vm15, %v7337_v46, %v4149_v40  ;;  %v4007_v13 = vsel %vm3607_vm9, %v4006_v58, %v4005_v29  ;;  %v4002_v28 = vsel %vm3622_vm14, %v4001_v1, %v4000_v16  ;;  %v4015_v31 = vrot.slane %v7352_v32, 5  ;;  %s7592_s21 = scalar_lea.vmem %s7648_s7, %s4590_s18 }
 0x45b   : > { %v4855_v52 = vpack.i.bf16 %v4150_v50, %v4136_v54  ;;  %v4009_v25 = vsel %vm3610_vm10, %v4008_v62, %v4007_v13  ;;  %v4013_v2 = vrot.slane %v7304_v3, 6  ;;  %v3627_v60 = vrot.slane %v7182_v53, 7 }
 0x45c   : > { %v4010_v34 = vsel %vm3613_vm11, %v7253_v27, %v4009_v25  ;;  %v3629_v17 = vrot.slane %v7244_v38, 6  ;;  %v4003_v26 = vrot.slane %v7163_v30, 4  ;;  %v3633_v20 = vrot.slane %v7281_v59, 4 }
 0x45d   : > { %4856 = vrot.lane.b32.xlu1 %v4855_v52, %s5206_s20  ;;  %v4012_v61 = vsel %vm3616_vm12, %v4011_v39, %v4010_v34  ;;  %v4017_v36 = vrot.slane %v7337_v46, 4  ;;  %v3628_v14 = vsel %vm3607_vm9, %v3627_v60, %v7202_v55  ;;  %v3631_v9 = vrot.slane %v7233_v19, 5 }
 0x45e   : > { %v4014_v47 = vsel %vm3619_vm13, %v4013_v2, %v4012_v61  ;;  %v4004_v8 = vsel %vm3625_vm15, %v4003_v26, %v4002_v28  ;;  %v3630_v63 = vsel %vm3610_vm10, %v3629_v17, %v3628_v14  ;;  %v3635_v24 = vrot.slane %v7272_v48, 3 }
 0x45f   : > { %v4016_v5 = vsel %vm3622_vm14, %v4015_v31, %v4014_v47  ;;  %v3632_v33 = vsel %vm3613_vm11, %v3631_v9, %v3630_v63  ;;  %v3637_v11 = vrot.slane %v7319_v18, 2  ;;  %v3639_v41 = vrot.slane %v7309_v7, 1 }
 0x460   : > { %v4018_v6 = vsel %vm3625_vm15, %v4017_v36, %v4016_v5  ;;  %v3634_v12 = vsel %vm3616_vm12, %v3633_v20, %v3632_v33  ;;  %v3759_v23 = vrot.slane %v7202_v55, 4  ;;  %v3760_v1 = vrot.slane %v7182_v53, 3 }
 0x461   : > { %v4850_v45 = vpack.i.bf16 %v4018_v6, %v4004_v8  ;;  %v3636_v43 = vsel %vm3619_vm13, %v3635_v24, %v3634_v12  ;;  %v3762_v29 = vrot.slane %v7244_v38, 2  ;;  %v3764_v58 = vrot.slane %v7233_v19, 1 }
 0x462   : > { %v3638_v4 = vsel %vm3622_vm14, %v3637_v11, %v3636_v43  ;;  %v3761_v10 = vsel %vm3607_vm9, %v3760_v1, %v3759_v23  ;;  %v3767_v62 = vrot.slane %v7272_v48, 7  ;;  %v3769_v55 = vrot.slane %v7319_v18, 6  ;;  %v7733_v11 = vld [vmem:[#allocation26_spill] sm:$0xff] }
 0x463   : > { %4851 = vrot.lane.b32.xlu0 %v4850_v45, %s5206_s20  ;;  %v7511_v42 = vsel %vm3625_vm15, %v3639_v41, %v3638_v4  ;;  %v3763_v40 = vsel %vm3610_vm10, %v3762_v29, %v3761_v10  ;;  %v3907_v54 = vrot.slane %v7212_v51, 7  ;;  %v3771_v38 = vrot.slane %v7309_v7, 5 }
 0x464   : > { %v3765_v39 = vsel %vm3613_vm11, %v3764_v58, %v3763_v40  ;;  %v3909_v50 = vrot.slane %v7263_v57, 6  ;;  %v3911_v19 = vrot.slane %v7253_v27, 5  ;;  %v3913_v18 = vrot.slane %v7299_v22, 4 }
 0x465   : > { %v3766_v53 = vsel %vm3616_vm12, %v7281_v59, %v3765_v39  ;;  %v3908_v48 = vsel %vm3607_vm9, %v3907_v54, %v7221_v56  ;;  %v3915_v7 = vrot.slane %v7304_v3, 3  ;;  %v3917_v25 = vrot.slane %v7352_v32, 2 }
 0x466   : > { %v3768_v16 = vsel %vm3619_vm13, %v3767_v62, %v3766_v53  ;;  %v3910_v52 = vsel %vm3610_vm10, %v3909_v50, %v3908_v48  ;;  %v3919_v2 = vrot.slane %v7337_v46, 1  ;;  %v4039_v60 = vrot.slane %v7221_v56, 4 }
 0x467   : > { %v3770_v13 = vsel %vm3622_vm14, %v3769_v55, %v3768_v16  ;;  %v3912_v59 = vsel %vm3613_vm11, %v3911_v19, %v3910_v52  ;;  %v4040_v26 = vrot.slane %v7212_v51, 3  ;;  %v4042_v61 = vrot.slane %v7263_v57, 2 }
 0x468   : > { %v3772_v28 = vsel %vm3625_vm15, %v3771_v38, %v3770_v13  ;;  %v3914_v31 = vsel %vm3616_vm12, %v3913_v18, %v3912_v59  ;;  %v4044_v36 = vrot.slane %v7253_v27, 1  ;;  %v4047_v14 = vrot.slane %v7304_v3, 7 }
 0x469   : > { %v3916_v34 = vsel %vm3619_vm13, %v3915_v7, %v3914_v31  ;;  %v4041_v47 = vsel %vm3607_vm9, %v4040_v26, %v4039_v60  ;;  %v4049_v8 = vrot.slane %v7352_v32, 6  ;;  %v4051_v5 = vrot.slane %v7337_v46, 5 }
 0x46a   : > { %v3918_v17 = vsel %vm3622_vm14, %v3917_v25, %v3916_v34  ;;  %v4043_v9 = vsel %vm3610_vm10, %v4042_v61, %v4041_v47  ;;  %v3615_v27 = vrot.slane %v7085_v21, 4  ;;  %v3753_v33 = vrot.slane %v7075_v37, 7 }
 0x46b   : > { %v7543_v20 = vsel %vm3625_vm15, %v3919_v2, %v3918_v17  ;;  %v4045_v56 = vsel %vm3613_vm11, %v4044_v36, %v4043_v9  ;;  %v3752_v32 = vsel %vm3616_vm12, %v7085_v21, %v7008_v0  ;;  %v3621_v45 = vrot.slane %v7152_v35, 2  ;;  %v7734_v0 = vld [vmem:[#allocation9_spill] sm:$0xff] }
 0x46c   : > { %v4046_v51 = vsel %vm3616_vm12, %v7299_v22, %v4045_v56  ;;  %v3755_v22 = vrot.slane %v7152_v35, 6  ;;  %v3617_v46 = vsel %vm3616_vm12, %v3615_v27, %v7733_v11  ;;  %v3618_v12 = vrot.slane %v7075_v37, 3 }
 0x46d   : > { %v4048_v57 = vsel %vm3619_vm13, %v4047_v14, %v4046_v51  ;;  %v3754_v43 = vsel %vm3619_vm13, %v3753_v33, %v3752_v32  ;;  %v3757_v21 = vrot.slane %v7734_v0, 5  ;;  %v3624_v35 = vrot.slane %v7734_v0, 1  ;;  %v7735_v51 = vld [vmem:[#allocation5_spill] sm:$0xff] }
 0x46e   : > { %v4050_v63 = vsel %vm3622_vm14, %v4049_v8, %v4048_v57  ;;  %v3756_v23 = vsel %vm3622_vm14, %v3755_v22, %v3754_v43  ;;  %v3620_v29 = vsel %vm3619_vm13, %v3618_v12, %v3617_v46  ;;  %v3899_v9 = vrot.slane %v7106_v49, 4 }
 0x46f   : > { %v7557_v6 = vsel %vm3625_vm15, %v4051_v5, %v4050_v63  ;;  %v3623_v58 = vsel %vm3622_vm14, %v3621_v45, %v3620_v29  ;;  %v3758_v37 = vsel %vm3625_vm15, %v3757_v21, %v3756_v23  ;;  %v4033_v8 = vrot.slane %v7097_v15, 7  ;;  %v7736_v63 = vld [vmem:[#allocation4_spill] sm:$0xff] }
 0x470   : > { %v3626_v18 = vsel %vm3625_vm15, %v3624_v35, %v3623_v58  ;;  %v4032_v57 = vsel %vm3616_vm12, %v7106_v49, %v7735_v51  ;;  %v4035_v5 = vrot.slane %v7173_v44, 6  ;;  %v3900_v27 = vsel %vm3616_vm12, %v3899_v9, %v7736_v63 }
 0x471   : > { %v3901_v33 = vrot.slane %v7097_v15, 3  ;;  %v4034_v32 = vsel %vm3619_vm13, %v4033_v8, %v4032_v57  ;;  %v4037_v49 = vrot.slane %v7163_v30, 5 }
 0x473   : > { %v3902_v45 = vsel %vm3619_vm13, %v3901_v33, %v3900_v27 }
 0x4b2   : > { %v4802_v3 = vpop.permute.xlu1 %4801 }
 0x4b3   : > { %v4804_v48 = vunpack.i.h.bf16 %v4802_v3  ;;  %v4803_v19 = vunpack.i.l.bf16 %v4802_v3  ;;  %v3903_v3 = vrot.slane %v7173_v44, 2  ;;  %v3905_v44 = vrot.slane %v7163_v30, 1 }
 0x4b4   : > { %v4807_v24 = vpop.permute.xlu0 %4806 }
 0x4b5   : > { %v4809_v62 = vunpack.i.h.bf16 %v4807_v24  ;;  %v4808_v40 = vunpack.i.l.bf16 %v4807_v24  ;;  %v4036_v24 = vsel %vm3622_vm14, %v4035_v5, %v4034_v32  ;;  %v3904_v43 = vsel %vm3622_vm14, %v3903_v3, %v3902_v45 }
 0x4b6   : > { %v4812_v41 = vpop.permute.xlu1 %4811  ;;  %v4038_v15 = vsel %vm3625_vm15, %v4037_v49, %v4036_v24 }
 0x4b7   : > { %v4814_v4 = vunpack.i.h.bf16 %v4812_v41  ;;  %v4813_v1 = vunpack.i.l.bf16 %v4812_v41  ;;  %v4157_v52 = vsel %vm2505_vm1, %v3626_v18, %v4808_v40  ;;  %v4158_v59 = vsel %vm2505_vm1, %v7511_v42, %v4809_v62 }
 0x4b8   : > { %v4817_v10 = vpop.permute.xlu0 %4816  ;;  %v3906_v40 = vsel %vm3625_vm15, %v3905_v44, %v3904_v43 }
 0x4b9   : > { %v4819_v55 = vunpack.i.h.bf16 %v4817_v10  ;;  %v4818_v39 = vunpack.i.l.bf16 %v4817_v10  ;;  %v4164_v53 = vsel %vm2505_vm1, %v3758_v37, %v4813_v1  ;;  %v4165_v38 = vsel %vm2505_vm1, %v3772_v28, %v4814_v4 }
 0x4ba   : > { %v4827_v54 = vpop.permute.xlu1 %4826  ;;  %v4166_v34 = vsel %vm2637_vm5, %v4164_v53, %v4803_v19  ;;  %v4167_v2 = vsel %vm2637_vm5, %v4165_v38, %v4804_v48 }
 0x4bb   : > { %v4829_v50 = vunpack.i.h.bf16 %v4827_v54  ;;  %v4828_v16 = vunpack.i.l.bf16 %v4827_v54  ;;  %v4159_v31 = vsel %vm2637_vm5, %v4157_v52, %v4818_v39  ;;  %v4160_v28 = vsel %vm2637_vm5, %v4158_v59, %v4819_v55 }
 0x4bc   : > { %v4822_v13 = vpop.permute.xlu0 %4821 }
 0x4bd   : > { %v4824_v7 = vunpack.i.h.bf16 %v4822_v13  ;;  %v4823_v25 = vunpack.i.l.bf16 %v4822_v13  ;;  %v4168_v60 = vsel %vm4161_vm0, %v4166_v34, %v4828_v16  ;;  %v4169_v17 = vsel %vm4161_vm0, %v4167_v2, %v4829_v50 }
 0x4be   : > { %v4832_v36 = vpop.permute.xlu1 %4831 }
 0x4bf   : > { %v4162_v42 = vsel %vm4161_vm0, %v4159_v31, %v4823_v25  ;;  %v4163_v26 = vsel %vm4161_vm0, %v4160_v28, %v4824_v7  ;;  %v4834_v58 = vunpack.i.h.bf16 %v4832_v36  ;;  %v4833_v62 = vunpack.i.l.bf16 %v4832_v36 }
 0x4c0   : > { %v4591_v61 = vpack.c.bf16 %v4168_v60, %v4162_v42  ;;  %v4593_v47 = vpack.c.bf16 %v4169_v17, %v4163_v26 }
 0x4c1   : > { %v4837_v14 = vpop.permute.xlu0 %4836 }
 0x4c2   : > { %4206 = vst [vmem:[%s7592_s21] sm:$0xff] %v4591_v61  ;;  %4208 = vst [vmem:[%s7592_s21 + $0x10] sm:$0xff] %v4593_v47  ;;  %v4839_v41 = vunpack.i.h.bf16 %v4837_v14  ;;  %v4838_v23 = vunpack.i.l.bf16 %v4837_v14 }
 0x4c4   : > { %v4171_v30 = vsel %vm2505_vm1, %v7543_v20, %v4839_v41  ;;  %v4170_v37 = vsel %vm2505_vm1, %v3906_v40, %v4838_v23 }
 0x4c5   : > { %v4842_v56 = vpop.permute.xlu1 %4841 }
 0x4c6   : > { %v4844_v11 = vunpack.i.h.bf16 %v4842_v56  ;;  %v4843_v46 = vunpack.i.l.bf16 %v4842_v56 }
 0x4c8   : > { %v4177_v29 = vsel %vm2505_vm1, %v7557_v6, %v4844_v11  ;;  %v4176_v0 = vsel %vm2505_vm1, %v4038_v15, %v4843_v46 }
 0x4c9   : > { %v4178_v53 = vsel %vm2637_vm5, %v4176_v0, %v4833_v62  ;;  %v4179_v38 = vsel %vm2637_vm5, %v4177_v29, %v4834_v58 }
 0x4cb   : > { %v4847_v22 = vpop.permute.xlu0 %4846 }
 0x4cc   : > { %v4849_v4 = vunpack.i.h.bf16 %v4847_v22  ;;  %v4848_v1 = vunpack.i.l.bf16 %v4847_v22 }
 0x4ce   : > { %v4172_v6 = vsel %vm2637_vm5, %v4170_v37, %v4848_v1  ;;  %v4173_v54 = vsel %vm2637_vm5, %v4171_v30, %v4849_v4 }
 0x4cf   : > { %v4857_v12 = vpop.permute.xlu1 %4856 }
 0x4d0   : > { %v4859_v21 = vunpack.i.h.bf16 %v4857_v12  ;;  %v4858_v10 = vunpack.i.l.bf16 %v4857_v12 }
 0x4d2   : > { %v4180_v50 = vsel %vm4161_vm0, %v4178_v53, %v4858_v10  ;;  %v4181_v16 = vsel %vm4161_vm0, %v4179_v38, %v4859_v21 }
 0x4d5   : > { %v4852_v35 = vpop.permute.xlu0 %4851 }
 0x4d6   : > { %v4854_v55 = vunpack.i.h.bf16 %v4852_v35  ;;  %v4853_v39 = vunpack.i.l.bf16 %v4852_v35 }
 0x4d8   : > { %v4174_v48 = vsel %vm4161_vm0, %v4172_v6, %v4853_v39  ;;  %v4175_v20 = vsel %vm4161_vm0, %v4173_v54, %v4854_v55 }
 0x4d9   : > { %v4592_v19 = vpack.c.bf16 %v4180_v50, %v4174_v48  ;;  %v4594_v18 = vpack.c.bf16 %v4181_v16, %v4175_v20 }
 0x4db   : > { %4207 = vst [vmem:[%s7592_s21 + $0x8] sm:$0xff] %v4592_v19  ;;  %4209 = vst [vmem:[%s7592_s21 + $0x18] sm:$0xff] %v4594_v18 }
 0x4dc PF: > { %s17_s26 = sadd.s32 1, %s5195_s26   ;;  %s7737_s24 = smov %s5191_s25 }
 0x4dd   : > { %p14_p5 = scmp.ge.s32.totalorder %s17_s26, 4   ;;  %s7738_s25 = smov %s7740_s27 }
 0x4df   :  { %16 = sbr.rel (!%p14_p5) target bundleno = 2 (0x2), region = 86 }

</bundles_post_ra>
